<compile_context>
chip_gen: v6e
topology: v6e:2x2x1
jax: 0.10.0
libtpu: 0.0.40
codegen_flags: <defaults>
</compile_context>

<pallas_src>
import math

import jax
import jax.numpy as jnp
from jax.experimental import pallas as pl
from jax.experimental.pallas import tpu as pltpu

# ----------------- small config (consistent with the module defaults,
# shrunk for a quick synthetic run) -----------------
NFEATS = 16          # cond feature dim (nfeats)
LATENT_DIM = 64      # latent_dim[1]
FF_SIZE = 128        # ff_size
NUM_LAYERS = 5       # SkipConnect (U-net style) encoder needs an odd count
NUM_HEADS = 4
LN_EPS = 1e-5
MAX_LEN = 64


# ----------------- in-kernel math helpers -----------------
def _gelu(x):
    # TODO(synk): PyTorch nn.GELU defaults to the erf form; the tanh
    # approximation is used in-kernel for guaranteed Mosaic lowering (~1e-3).
    c = math.sqrt(2.0 / math.pi)
    return 0.5 * x * (1.0 + jnp.tanh(c * (x + 0.044715 * x * x * x)))


def _layer_norm(x, gamma, beta, eps=LN_EPS):
    mu = jnp.mean(x, axis=-1, keepdims=True)
    var = jnp.mean(jnp.square(x - mu), axis=-1, keepdims=True)
    return (x - mu) * jax.lax.rsqrt(var + eps) * gamma + beta


# ----------------- fully fused Pallas kernel -----------------
def _make_fused_kernel(nb_batch, tlen, clen, nf, d, num_layers, num_heads):
    S = tlen + 1 + clen                     # per-sequence length [x ; time ; cond]
    M = nb_batch * S                        # stacked rows per grid step
    hd = d // num_heads
    n_skip = (num_layers - 1) // 2
    L = num_layers
    f32, bf16 = jnp.float32, jnp.bfloat16

    def kernel(te_ref, x_ref, cond_ref, qpos_ref,
               cw1_ref, cb_ref, cw2_ref,            # cond-embedding MLP
               attnw_ref, bvec_ref,                 # packed attn weights / all (L,d) vectors
               fw1_ref, fb1_ref, fw2_ref,           # FFN
               skw_ref, skb_ref,                    # fused skip linears
               o_ref):
        # ---- cond embedding, batched across the whole batch block ----
        c_in = jnp.concatenate([cond_ref[b] for b in range(nb_batch)], axis=0)
        c = _gelu(jnp.dot(c_in.astype(bf16), cw1_ref[...],
                          preferred_element_type=f32) + cb_ref[0:1, :])
        c = (jnp.dot(c.astype(bf16), cw2_ref[...], preferred_element_type=f32)
             + cb_ref[1:2, :])                                     # [nb*clen, d]

        te = te_ref[...].astype(f32)                               # [1, d] (batch-invariant)
        qpos = qpos_ref[...].astype(f32)                           # [S, d]

        # ---- sequence assembly: [x_b ; time ; cond_b] stacked over the block ----
        parts = []
        for b in range(nb_batch):
            parts.append(x_ref[b].astype(f32))                     # [tlen, d]
            parts.append(te)                                       # [1, d]
            parts.append(c[b * clen:(b + 1) * clen])               # [clen, d]
        h = jnp.concatenate(parts, axis=0)                         # [M, d]
        h = h + (jnp.concatenate([qpos] * nb_batch, axis=0)
                 if nb_batch > 1 else qpos)

        # ---- hoisted per-head lane masks (heads live on the lane axis) ----
        lane = jax.lax.broadcasted_iota(jnp.int32, (1, d), 1)
        maskf = [jnp.where((lane >= hh * hd) & (lane < (hh + 1) * hd),
                           1.0, 0.0).astype(f32)
                 for hh in range(num_heads)]

        # ---- hoisted block-diagonal attention bias (only needed when NB > 1) ----
        if nb_batch > 1:
            rb = jax.lax.broadcasted_iota(jnp.int32, (M, M), 0) // S
            cbk = jax.lax.broadcasted_iota(jnp.int32, (M, M), 1) // S
            attn_bias = jnp.where(rb == cbk, 0.0, -1e9).astype(f32)
        else:
            attn_bias = None

        # bvec rows: 0=bq(scaled) 1=bk 2=bv 3=bo 4=ln1_g 5=ln1_b 6=ffn_b2 7=ln2_g 8=ln2_b
        def brow(kind, li):
            r = kind * L + li
            return bvec_ref[r:r + 1, :]                            # [1, d] f32

        def enc_layer(x, li):
            # --- multi-head self-attention (post-norm layer) ---
            xb = x.astype(bf16)
            # 1/sqrt(hd) already folded into wq / bq host-side.
            q = jnp.dot(xb, attnw_ref[0 * L + li], preferred_element_type=f32) + brow(0, li)
            k = jnp.dot(xb, attnw_ref[1 * L + li], preferred_element_type=f32) + brow(1, li)
            v = jnp.dot(xb, attnw_ref[2 * L + li], preferred_element_type=f32) + brow(2, li)
            kb = k.astype(bf16)
            ctx = jnp.zeros((M, d), f32)
            for hh in range(num_heads):
                qh = (q * maskf[hh]).astype(bf16)                  # head-h lanes only
                s = jax.lax.dot_general(qh, kb, (((1,), (1,)), ((), ())),
                                        preferred_element_type=f32)  # [M, M]
                if attn_bias is not None:
                    s = s + attn_bias
                s = s - jnp.max(s, axis=-1, keepdims=True)
                p = jnp.exp(s)
                p = p * pl.reciprocal(jnp.sum(p, axis=-1, keepdims=True),
                                      approx=True)
                vh = (v * maskf[hh]).astype(bf16)
                # head outputs land in disjoint lane blocks -> implicit concat
                ctx = ctx + jnp.dot(p.astype(bf16), vh, preferred_element_type=f32)
            attn = (jnp.dot(ctx.astype(bf16), attnw_ref[3 * L + li],
                            preferred_element_type=f32) + brow(3, li))
            x = _layer_norm(x + attn, brow(4, li), brow(5, li))

            # --- feed-forward ---
            ffh = _gelu(jnp.dot(x.astype(bf16), fw1_ref[li],
                                preferred_element_type=f32) + fb1_ref[li:li + 1, :])
            ffo = jnp.dot(ffh.astype(bf16), fw2_ref[li],
                          preferred_element_type=f32) + brow(6, li)
            return _layer_norm(x + ffo, brow(7, li), brow(8, li))

        # --- U-net style skip-connect encoder (odd layer count) ---
        saved = []
        for i in range(n_skip):                 # input blocks
            h = enc_layer(h, i)
            saved.append(h)
        h = enc_layer(h, n_skip)                # middle block
        for j in range(n_skip):                 # output blocks, fused skip linear
            skip = saved.pop()
            # cat(h, skip) @ W == h @ W_h + skip @ W_s
            h = (jnp.dot(h.astype(bf16), skw_ref[j], preferred_element_type=f32)
                 + jnp.dot(skip.astype(bf16), skw_ref[n_skip + j],
                           preferred_element_type=f32)
                 + skb_ref[j:j + 1, :])
            h = enc_layer(h, n_skip + 1 + j)

        # TODO(synk): SkipConnectTransformerEncoder source not provided; the
        # default norm=None (no final LayerNorm) is assumed, as in the spec call.
        for b in range(nb_batch):
            o_ref[b] = h[b * S:b * S + tlen, :].astype(o_ref.dtype)

    return kernel


# ----------------- deterministic parameter construction -----------------
def init_params(key, nfeats=NFEATS, d=LATENT_DIM, ff=FF_SIZE,
                num_layers=NUM_LAYERS, max_len=MAX_LEN):
    keys = iter(jax.random.split(key, 64))

    def w(shape, scale=0.02):
        return (scale * jax.random.normal(next(keys), shape)).astype(jnp.float32)

    def zeros(shape):
        return jnp.zeros(shape, jnp.float32)

    def ones(shape):
        return jnp.ones(shape, jnp.float32)

    L = num_layers
    nsk = (num_layers - 1) // 2
    # TODO(synk): porting real PyTorch nn.Linear weights ([out,in]) requires a
    # transpose to this x@W ([in,out]) layout, and splitting the skip cat-dim
    # weight into w_h / w_s in that order.
    return dict(
        time=dict(w1=w((d, d)), b1=zeros((d,)), w2=w((d, d)), b2=zeros((d,))),
        cond=dict(w1=w((nfeats, d)), b1=zeros((d,)),
                  w2=w((d, d)), b2=zeros((d,))),
        query_pos=w((max_len, d)),            # PositionEmbeddingLearned1D
        layers=dict(                          # stacked over the L layers
            wq=w((L, d, d)), bq=zeros((L, d)),
            wk=w((L, d, d)), bk=zeros((L, d)),
            wv=w((L, d, d)), bv=zeros((L, d)),
            wo=w((L, d, d)), bo=zeros((L, d)),
            ln1_g=ones((L, d)), ln1_b=zeros((L, d)),
            w1=w((L, d, ff)), b1=zeros((L, ff)),
            w2=w((L, ff, d)), b2=zeros((L, d)),
            ln2_g=ones((L, d)), ln2_b=zeros((L, d)),
        ),
        skip=dict(w_h=w((nsk, d, d)), w_s=w((nsk, d, d)), b=zeros((nsk, d))),
    )


# ----------------- forward pass (thin JAX glue around ONE pallas_call) -------
def sinusoidal_embedding(t, dim):
    # TODO(synk): SinusoidalPositionEmbedding source not provided; uses the
    # common exp(-log(1e4)*i/(half-1)) frequency spacing.
    half = dim // 2
    freqs = jnp.exp(-math.log(10000.0)
                    * jnp.arange(half, dtype=jnp.float32) / (half - 1))
    args = t[:, None].astype(jnp.float32) * freqs[None, :]
    return jnp.concatenate([jnp.sin(args), jnp.cos(args)], axis=-1)


def _pick_block_batch(bs, S):
    """Largest divisor of bs that fills MXU rows (~128) and keeps grid >= 2."""
    target = max(1, 128 // S)
    if bs >= 2:
        target = min(target, bs // 2)   # v7x: keep >= 2 grid steps (2 TCs)
    target = max(1, min(target, bs))
    nb = 1
    for cand in range(1, target + 1):
        if bs % cand == 0:
            nb = cand
    return nb


@jax.jit
def denoiser_forward(params, x, t, cond):
    bs, tlen, d = x.shape
    clen, nf = cond.shape[1], cond.shape[2]
    S = tlen + 1 + clen
    L = NUM_LAYERS
    n_skip = (L - 1) // 2
    hd = d // NUM_HEADS
    scale = 1.0 / math.sqrt(hd)
    bf16 = jnp.bfloat16

    # --- time embedding hoisted out of the grid: t is a broadcast scalar, so
    #     the time-MLP result is identical for every batch element. ---
    t_vec = jnp.reshape(jnp.asarray(t, jnp.float32), (1,))
    tm = params['time']
    te = sinusoidal_embedding(t_vec, d)
    te = jax.nn.gelu(te @ tm['w1'] + tm['b1'], approximate=False) @ tm['w2'] + tm['b2']
    te = te.astype(jnp.float32)                                    # [1, d]

    qpos = params['query_pos'][:S].astype(jnp.float32)             # [S, d]

    # --- packed weights: bf16 MXU operands, f32 biases / LN params ---
    lp, sk, cp = params['layers'], params['skip'], params['cond']
    attn_w = jnp.concatenate([lp['wq'] * scale, lp['wk'], lp['wv'], lp['wo']],
                             axis=0).astype(bf16)                   # (4L, d, d)
    bvec = jnp.concatenate([lp['bq'] * scale, lp['bk'], lp['bv'], lp['bo'],
                            lp['ln1_g'], lp['ln1_b'], lp['b2'],
                            lp['ln2_g'], lp['ln2_b']],
                           axis=0).astype(jnp.float32)              # (9L, d)
    fw1 = lp['w1'].astype(bf16)                                     # (L, d, ff)
    fb1 = lp['b1'].astype(jnp.float32)                              # (L, ff)
    fw2 = lp['w2'].astype(bf16)                                     # (L, ff, d)
    skw = jnp.concatenate([sk['w_h'], sk['w_s']], axis=0).astype(bf16)  # (2*nsk, d, d)
    skb = sk['b'].astype(jnp.float32)                               # (nsk, d)
    cw1 = cp['w1'].astype(bf16)                                     # (nf, d)
    cw2 = cp['w2'].astype(bf16)                                     # (d, d)
    cbias = jnp.stack([cp['b1'], cp['b2']], axis=0).astype(jnp.float32)  # (2, d)

    NB = _pick_block_batch(bs, S)
    grid = (bs // NB,)

    kernel = _make_fused_kernel(NB, tlen, clen, nf, d, NUM_LAYERS, NUM_HEADS)

    def rep(a):
        nd = a.ndim
        return pl.BlockSpec(a.shape, lambda g, _n=nd: (0,) * _n)

    out = pl.pallas_call(
        kernel,
        grid=grid,
        in_specs=[rep(te),
                  pl.BlockSpec((NB, tlen, d), lambda g: (g, 0, 0)),    # x
                  pl.BlockSpec((NB, clen, nf), lambda g: (g, 0, 0)),   # cond
                  rep(qpos), rep(cw1), rep(cbias), rep(cw2),
                  rep(attn_w), rep(bvec), rep(fw1), rep(fb1), rep(fw2),
                  rep(skw), rep(skb)],
        out_specs=pl.BlockSpec((NB, tlen, d), lambda g: (g, 0, 0)),
        out_shape=jax.ShapeDtypeStruct((bs, tlen, d), x.dtype),
        compiler_params=pltpu.CompilerParams(
            dimension_semantics=("parallel",)),
    )(te, x, cond, qpos, cw1, cbias, cw2, attn_w, bvec, fw1, fb1, fw2, skw, skb)
    return out


if __name__ == "__main__":
    key = jax.random.PRNGKey(0)
    kp, kx, kc = jax.random.split(key, 3)
    params = init_params(kp)

    bs, tlen, clen = 2, 4, 4
    x = jax.random.normal(kx, (bs, tlen, LATENT_DIM), jnp.float32)
    cond = jax.random.normal(kc, (bs, clen, NFEATS), jnp.float32)
    t = jnp.array(37.0, jnp.float32)

    out = denoiser_forward(params, x, t, cond)
    jax.block_until_ready(out)
    assert out.shape == (bs, tlen, LATENT_DIM)
    assert bool(jnp.all(jnp.isfinite(out)))
    print("KERNEL_OK")
</pallas_src>

<mosaic_0001>
module attributes {stable_mosaic.version = 11 : i64} {
  func.func @kernel(%arg0: i32, %arg1: memref<1x64xf32, #tpu.memory_space<vmem>>, %arg2: memref<1x4x64xf32, #tpu.memory_space<vmem>>, %arg3: memref<1x4x16xf32, #tpu.memory_space<vmem>>, %arg4: memref<9x64xf32, #tpu.memory_space<vmem>>, %arg5: memref<16x64xbf16, #tpu.memory_space<vmem>>, %arg6: memref<2x64xf32, #tpu.memory_space<vmem>>, %arg7: memref<64x64xbf16, #tpu.memory_space<vmem>>, %arg8: memref<20x64x64xbf16, #tpu.memory_space<vmem>>, %arg9: memref<45x64xf32, #tpu.memory_space<vmem>>, %arg10: memref<5x64x128xbf16, #tpu.memory_space<vmem>>, %arg11: memref<5x128xf32, #tpu.memory_space<vmem>>, %arg12: memref<5x128x64xbf16, #tpu.memory_space<vmem>>, %arg13: memref<4x64x64xbf16, #tpu.memory_space<vmem>>, %arg14: memref<2x64xf32, #tpu.memory_space<vmem>>, %arg15: memref<1x4x64xf32, #tpu.memory_space<vmem>>) attributes {dimension_semantics = [#tpu.dimension_semantics<parallel>], iteration_bounds = array<i64: 2>, scalar_prefetch = 0 : i64, scratch_operands = 0 : i64, tpu.core_type = #tpu.core_type<tc>, window_params = [{pipeline_mode = #tpu.pipeline_mode<synchronous>, transform_indices = @transform_0, window_bounds = array<i64: 1, 64>}, {transform_indices = @transform_1, window_bounds = array<i64: 1, 4, 64>}, {transform_indices = @transform_2, window_bounds = array<i64: 1, 4, 16>}, {pipeline_mode = #tpu.pipeline_mode<synchronous>, transform_indices = @transform_3, window_bounds = array<i64: 9, 64>}, {pipeline_mode = #tpu.pipeline_mode<synchronous>, transform_indices = @transform_4, window_bounds = array<i64: 16, 64>}, {pipeline_mode = #tpu.pipeline_mode<synchronous>, transform_indices = @transform_5, window_bounds = array<i64: 2, 64>}, {pipeline_mode = #tpu.pipeline_mode<synchronous>, transform_indices = @transform_6, window_bounds = array<i64: 64, 64>}, {pipeline_mode = #tpu.pipeline_mode<synchronous>, transform_indices = @transform_7, window_bounds = array<i64: 20, 64, 64>}, {pipeline_mode = #tpu.pipeline_mode<synchronous>, transform_indices = @transform_8, window_bounds = array<i64: 45, 64>}, {pipeline_mode = #tpu.pipeline_mode<synchronous>, transform_indices = @transform_9, window_bounds = array<i64: 5, 64, 128>}, {pipeline_mode = #tpu.pipeline_mode<synchronous>, transform_indices = @transform_10, window_bounds = array<i64: 5, 128>}, {pipeline_mode = #tpu.pipeline_mode<synchronous>, transform_indices = @transform_11, window_bounds = array<i64: 5, 128, 64>}, {pipeline_mode = #tpu.pipeline_mode<synchronous>, transform_indices = @transform_12, window_bounds = array<i64: 4, 64, 64>}, {pipeline_mode = #tpu.pipeline_mode<synchronous>, transform_indices = @transform_13, window_bounds = array<i64: 2, 64>}, {transform_indices = @transform_14, window_bounds = array<i64: 1, 4, 64>}]} {
    %c0 = arith.constant 0 : index
    %c0_0 = arith.constant 0 : index
    %c0_1 = arith.constant 0 : index
    %0 = vector.load %arg3[%c0, %c0_0, %c0_1] : memref<1x4x16xf32, #tpu.memory_space<vmem>>, vector<1x4x16xf32>
    %1 = vector.shape_cast %0 : vector<1x4x16xf32> to vector<4x16xf32>
    %2 = arith.truncf %1 : vector<4x16xf32> to vector<4x16xbf16>
    %c0_2 = arith.constant 0 : index
    %c0_3 = arith.constant 0 : index
    %3 = vector.load %arg5[%c0_2, %c0_3] : memref<16x64xbf16, #tpu.memory_space<vmem>>, vector<16x64xbf16>
    %cst = arith.constant dense<0.000000e+00> : vector<4x64xf32>
    %4 = tpu.matmul %2, %3, %cst {dimension_numbers = #tpu.dot_dimension_numbers<[1], [0], [0], [1], [0, 0, 1, 1], [], []>} : vector<4x16xbf16>, vector<16x64xbf16>, vector<4x64xf32> -> vector<4x64xf32>
    %c0_4 = arith.constant 0 : index
    %c0_5 = arith.constant 0 : index
    %5 = vector.load %arg6[%c0_4, %c0_5] : memref<2x64xf32, #tpu.memory_space<vmem>>, vector<1x64xf32>
    %6 = vector.broadcast %5 : vector<1x64xf32> to vector<4x64xf32>
    %7 = arith.addf %4, %6 : vector<4x64xf32>
    %cst_6 = arith.constant 5.000000e-01 : f32
    %8 = vector.broadcast %cst_6 : f32 to vector<4x64xf32>
    %9 = arith.mulf %8, %7 : vector<4x64xf32>
    %cst_7 = arith.constant 4.471500e-02 : f32
    %10 = vector.broadcast %cst_7 : f32 to vector<4x64xf32>
    %11 = arith.mulf %10, %7 : vector<4x64xf32>
    %12 = arith.mulf %11, %7 : vector<4x64xf32>
    %13 = arith.mulf %12, %7 : vector<4x64xf32>
    %14 = arith.addf %7, %13 : vector<4x64xf32>
    %cst_8 = arith.constant 0.797884583 : f32
    %15 = vector.broadcast %cst_8 : f32 to vector<4x64xf32>
    %16 = arith.mulf %15, %14 : vector<4x64xf32>
    %17 = math.tanh %16 : vector<4x64xf32>
    %cst_9 = arith.constant 1.000000e+00 : f32
    %18 = vector.broadcast %cst_9 : f32 to vector<4x64xf32>
    %19 = arith.addf %18, %17 : vector<4x64xf32>
    %20 = arith.mulf %9, %19 : vector<4x64xf32>
    %21 = arith.truncf %20 : vector<4x64xf32> to vector<4x64xbf16>
    %c0_10 = arith.constant 0 : index
    %c0_11 = arith.constant 0 : index
    %22 = vector.load %arg7[%c0_10, %c0_11] : memref<64x64xbf16, #tpu.memory_space<vmem>>, vector<64x64xbf16>
    %cst_12 = arith.constant dense<0.000000e+00> : vector<4x64xf32>
    %23 = tpu.matmul %21, %22, %cst_12 {dimension_numbers = #tpu.dot_dimension_numbers<[1], [0], [0], [1], [0, 0, 1, 1], [], []>} : vector<4x64xbf16>, vector<64x64xbf16>, vector<4x64xf32> -> vector<4x64xf32>
    %c1 = arith.constant 1 : index
    %c0_13 = arith.constant 0 : index
    %24 = vector.load %arg6[%c1, %c0_13] : memref<2x64xf32, #tpu.memory_space<vmem>>, vector<1x64xf32>
    %25 = vector.broadcast %24 : vector<1x64xf32> to vector<4x64xf32>
    %26 = arith.addf %23, %25 : vector<4x64xf32>
    %c0_14 = arith.constant 0 : index
    %c0_15 = arith.constant 0 : index
    %27 = vector.load %arg1[%c0_14, %c0_15] : memref<1x64xf32, #tpu.memory_space<vmem>>, vector<1x64xf32>
    %c0_16 = arith.constant 0 : index
    %c0_17 = arith.constant 0 : index
    %28 = vector.load %arg4[%c0_16, %c0_17] : memref<9x64xf32, #tpu.memory_space<vmem>>, vector<9x64xf32>
    %c0_18 = arith.constant 0 : index
    %c0_19 = arith.constant 0 : index
    %c0_20 = arith.constant 0 : index
    %29 = vector.load %arg2[%c0_18, %c0_19, %c0_20] : memref<1x4x64xf32, #tpu.memory_space<vmem>>, vector<1x4x64xf32>
    %30 = vector.shape_cast %29 : vector<1x4x64xf32> to vector<4x64xf32>
    %31 = tpu.concatenate %30, %27, %26 in 0 : vector<4x64xf32>, vector<1x64xf32>, vector<4x64xf32> -> vector<9x64xf32>
    %32 = arith.addf %31, %28 : vector<9x64xf32>
    %33 = tpu.iota {dimensions = array<i32: 1>} : vector<1x64xi32>
    %c0_i32 = arith.constant 0 : i32
    %34 = vector.broadcast %c0_i32 : i32 to vector<1x64xi32>
    %35 = arith.cmpi sge, %33, %34 : vector<1x64xi32>
    %c16_i32 = arith.constant 16 : i32
    %36 = vector.broadcast %c16_i32 : i32 to vector<1x64xi32>
    %37 = arith.cmpi slt, %33, %36 : vector<1x64xi32>
    %38 = arith.andi %35, %37 : vector<1x64xi1>
    %cst_21 = arith.constant 1.000000e+00 : f32
    %cst_22 = arith.constant 0.000000e+00 : f32
    %39 = vector.broadcast %cst_21 : f32 to vector<1x64xf32>
    %40 = vector.broadcast %cst_22 : f32 to vector<1x64xf32>
    %41 = arith.select %38, %39, %40 : vector<1x64xi1>, vector<1x64xf32>
    %c16_i32_23 = arith.constant 16 : i32
    %42 = vector.broadcast %c16_i32_23 : i32 to vector<1x64xi32>
    %43 = arith.cmpi sge, %33, %42 : vector<1x64xi32>
    %c32_i32 = arith.constant 32 : i32
    %44 = vector.broadcast %c32_i32 : i32 to vector<1x64xi32>
    %45 = arith.cmpi slt, %33, %44 : vector<1x64xi32>
    %46 = arith.andi %43, %45 : vector<1x64xi1>
    %cst_24 = arith.constant 1.000000e+00 : f32
    %cst_25 = arith.constant 0.000000e+00 : f32
    %47 = vector.broadcast %cst_24 : f32 to vector<1x64xf32>
    %48 = vector.broadcast %cst_25 : f32 to vector<1x64xf32>
    %49 = arith.select %46, %47, %48 : vector<1x64xi1>, vector<1x64xf32>
    %c32_i32_26 = arith.constant 32 : i32
    %50 = vector.broadcast %c32_i32_26 : i32 to vector<1x64xi32>
    %51 = arith.cmpi sge, %33, %50 : vector<1x64xi32>
    %c48_i32 = arith.constant 48 : i32
    %52 = vector.broadcast %c48_i32 : i32 to vector<1x64xi32>
    %53 = arith.cmpi slt, %33, %52 : vector<1x64xi32>
    %54 = arith.andi %51, %53 : vector<1x64xi1>
    %cst_27 = arith.constant 1.000000e+00 : f32
    %cst_28 = arith.constant 0.000000e+00 : f32
    %55 = vector.broadcast %cst_27 : f32 to vector<1x64xf32>
    %56 = vector.broadcast %cst_28 : f32 to vector<1x64xf32>
    %57 = arith.select %54, %55, %56 : vector<1x64xi1>, vector<1x64xf32>
    %c48_i32_29 = arith.constant 48 : i32
    %58 = vector.broadcast %c48_i32_29 : i32 to vector<1x64xi32>
    %59 = arith.cmpi sge, %33, %58 : vector<1x64xi32>
    %c64_i32 = arith.constant 64 : i32
    %60 = vector.broadcast %c64_i32 : i32 to vector<1x64xi32>
    %61 = arith.cmpi slt, %33, %60 : vector<1x64xi32>
    %62 = arith.andi %59, %61 : vector<1x64xi1>
    %cst_30 = arith.constant 1.000000e+00 : f32
    %cst_31 = arith.constant 0.000000e+00 : f32
    %63 = vector.broadcast %cst_30 : f32 to vector<1x64xf32>
    %64 = vector.broadcast %cst_31 : f32 to vector<1x64xf32>
    %65 = arith.select %62, %63, %64 : vector<1x64xi1>, vector<1x64xf32>
    %66 = arith.truncf %32 : vector<9x64xf32> to vector<9x64xbf16>
    %c0_32 = arith.constant 0 : index
    %c0_33 = arith.constant 0 : index
    %c0_34 = arith.constant 0 : index
    %67 = vector.load %arg8[%c0_32, %c0_33, %c0_34] : memref<20x64x64xbf16, #tpu.memory_space<vmem>>, vector<1x64x64xbf16>
    %68 = vector.shape_cast %67 : vector<1x64x64xbf16> to vector<64x64xbf16>
    %cst_35 = arith.constant dense<0.000000e+00> : vector<9x64xf32>
    %69 = tpu.matmul %66, %68, %cst_35 {dimension_numbers = #tpu.dot_dimension_numbers<[1], [0], [0], [1], [0, 0, 1, 1], [], []>} : vector<9x64xbf16>, vector<64x64xbf16>, vector<9x64xf32> -> vector<9x64xf32>
    %c0_36 = arith.constant 0 : index
    %c0_37 = arith.constant 0 : index
    %70 = vector.load %arg9[%c0_36, %c0_37] : memref<45x64xf32, #tpu.memory_space<vmem>>, vector<1x64xf32>
    %71 = vector.broadcast %70 : vector<1x64xf32> to vector<9x64xf32>
    %72 = arith.addf %69, %71 : vector<9x64xf32>
    %c5 = arith.constant 5 : index
    %c0_38 = arith.constant 0 : index
    %c0_39 = arith.constant 0 : index
    %73 = vector.load %arg8[%c5, %c0_38, %c0_39] : memref<20x64x64xbf16, #tpu.memory_space<vmem>>, vector<1x64x64xbf16>
    %74 = vector.shape_cast %73 : vector<1x64x64xbf16> to vector<64x64xbf16>
    %cst_40 = arith.constant dense<0.000000e+00> : vector<9x64xf32>
    %75 = tpu.matmul %66, %74, %cst_40 {dimension_numbers = #tpu.dot_dimension_numbers<[1], [0], [0], [1], [0, 0, 1, 1], [], []>} : vector<9x64xbf16>, vector<64x64xbf16>, vector<9x64xf32> -> vector<9x64xf32>
    %c5_41 = arith.constant 5 : index
    %c0_42 = arith.constant 0 : index
    %76 = vector.load %arg9[%c5_41, %c0_42] : memref<45x64xf32, #tpu.memory_space<vmem>>, vector<1x64xf32>
    %77 = vector.broadcast %76 : vector<1x64xf32> to vector<9x64xf32>
    %78 = arith.addf %75, %77 : vector<9x64xf32>
    %c10 = arith.constant 10 : index
    %c0_43 = arith.constant 0 : index
    %c0_44 = arith.constant 0 : index
    %79 = vector.load %arg8[%c10, %c0_43, %c0_44] : memref<20x64x64xbf16, #tpu.memory_space<vmem>>, vector<1x64x64xbf16>
    %80 = vector.shape_cast %79 : vector<1x64x64xbf16> to vector<64x64xbf16>
    %cst_45 = arith.constant dense<0.000000e+00> : vector<9x64xf32>
    %81 = tpu.matmul %66, %80, %cst_45 {dimension_numbers = #tpu.dot_dimension_numbers<[1], [0], [0], [1], [0, 0, 1, 1], [], []>} : vector<9x64xbf16>, vector<64x64xbf16>, vector<9x64xf32> -> vector<9x64xf32>
    %c10_46 = arith.constant 10 : index
    %c0_47 = arith.constant 0 : index
    %82 = vector.load %arg9[%c10_46, %c0_47] : memref<45x64xf32, #tpu.memory_space<vmem>>, vector<1x64xf32>
    %83 = vector.broadcast %82 : vector<1x64xf32> to vector<9x64xf32>
    %84 = arith.addf %81, %83 : vector<9x64xf32>
    %85 = arith.truncf %78 : vector<9x64xf32> to vector<9x64xbf16>
    %cst_48 = arith.constant 0.000000e+00 : f32
    %86 = vector.broadcast %cst_48 : f32 to vector<9x64xf32>
    %87 = vector.broadcast %41 : vector<1x64xf32> to vector<9x64xf32>
    %88 = arith.mulf %72, %87 : vector<9x64xf32>
    %89 = arith.truncf %88 : vector<9x64xf32> to vector<9x64xbf16>
    %cst_49 = arith.constant dense<0.000000e+00> : vector<9x9xf32>
    %90 = tpu.matmul %89, %85, %cst_49 {dimension_numbers = #tpu.dot_dimension_numbers<[1], [1], [0], [0], [0, 0, 1, 0], [], []>} : vector<9x64xbf16>, vector<9x64xbf16>, vector<9x9xf32> -> vector<9x9xf32>
    %cst_50 = arith.constant dense<0xFF800000> : vector<9xf32>
    %91 = vector.multi_reduction <maximumf>, %90, %cst_50 [1] : vector<9x9xf32> to vector<9xf32>
    %92 = vector.shape_cast %91 : vector<9xf32> to vector<9x1xf32>
    %93 = vector.broadcast %92 : vector<9x1xf32> to vector<9x9xf32>
    %94 = arith.subf %90, %93 : vector<9x9xf32>
    %95 = math.exp %94 : vector<9x9xf32>
    %cst_51 = arith.constant dense<0.000000e+00> : vector<9xf32>
    %96 = vector.multi_reduction <add>, %95, %cst_51 [1] : vector<9x9xf32> to vector<9xf32>
    %97 = vector.shape_cast %96 : vector<9xf32> to vector<9x1xf32>
    %98 = tpu.reciprocal %97 {approx = true} : vector<9x1xf32> -> vector<9x1xf32>
    %99 = vector.broadcast %98 : vector<9x1xf32> to vector<9x9xf32>
    %100 = arith.mulf %95, %99 : vector<9x9xf32>
    %101 = vector.broadcast %41 : vector<1x64xf32> to vector<9x64xf32>
    %102 = arith.mulf %84, %101 : vector<9x64xf32>
    %103 = arith.truncf %102 : vector<9x64xf32> to vector<9x64xbf16>
    %104 = arith.truncf %100 : vector<9x9xf32> to vector<9x9xbf16>
    %cst_52 = arith.constant dense<0.000000e+00> : vector<9x64xf32>
    %105 = tpu.matmul %104, %103, %cst_52 {dimension_numbers = #tpu.dot_dimension_numbers<[1], [0], [0], [1], [0, 0, 1, 1], [], []>} : vector<9x9xbf16>, vector<9x64xbf16>, vector<9x64xf32> -> vector<9x64xf32>
    %106 = arith.addf %86, %105 : vector<9x64xf32>
    %107 = vector.broadcast %49 : vector<1x64xf32> to vector<9x64xf32>
    %108 = arith.mulf %72, %107 : vector<9x64xf32>
    %109 = arith.truncf %108 : vector<9x64xf32> to vector<9x64xbf16>
    %cst_53 = arith.constant dense<0.000000e+00> : vector<9x9xf32>
    %110 = tpu.matmul %109, %85, %cst_53 {dimension_numbers = #tpu.dot_dimension_numbers<[1], [1], [0], [0], [0, 0, 1, 0], [], []>} : vector<9x64xbf16>, vector<9x64xbf16>, vector<9x9xf32> -> vector<9x9xf32>
    %cst_54 = arith.constant dense<0xFF800000> : vector<9xf32>
    %111 = vector.multi_reduction <maximumf>, %110, %cst_54 [1] : vector<9x9xf32> to vector<9xf32>
    %112 = vector.shape_cast %111 : vector<9xf32> to vector<9x1xf32>
    %113 = vector.broadcast %112 : vector<9x1xf32> to vector<9x9xf32>
    %114 = arith.subf %110, %113 : vector<9x9xf32>
    %115 = math.exp %114 : vector<9x9xf32>
    %cst_55 = arith.constant dense<0.000000e+00> : vector<9xf32>
    %116 = vector.multi_reduction <add>, %115, %cst_55 [1] : vector<9x9xf32> to vector<9xf32>
    %117 = vector.shape_cast %116 : vector<9xf32> to vector<9x1xf32>
    %118 = tpu.reciprocal %117 {approx = true} : vector<9x1xf32> -> vector<9x1xf32>
    %119 = vector.broadcast %118 : vector<9x1xf32> to vector<9x9xf32>
    %120 = arith.mulf %115, %119 : vector<9x9xf32>
    %121 = vector.broadcast %49 : vector<1x64xf32> to vector<9x64xf32>
    %122 = arith.mulf %84, %121 : vector<9x64xf32>
    %123 = arith.truncf %122 : vector<9x64xf32> to vector<9x64xbf16>
    %124 = arith.truncf %120 : vector<9x9xf32> to vector<9x9xbf16>
    %cst_56 = arith.constant dense<0.000000e+00> : vector<9x64xf32>
    %125 = tpu.matmul %124, %123, %cst_56 {dimension_numbers = #tpu.dot_dimension_numbers<[1], [0], [0], [1], [0, 0, 1, 1], [], []>} : vector<9x9xbf16>, vector<9x64xbf16>, vector<9x64xf32> -> vector<9x64xf32>
    %126 = arith.addf %106, %125 : vector<9x64xf32>
    %127 = vector.broadcast %57 : vector<1x64xf32> to vector<9x64xf32>
    %128 = arith.mulf %72, %127 : vector<9x64xf32>
    %129 = arith.truncf %128 : vector<9x64xf32> to vector<9x64xbf16>
    %cst_57 = arith.constant dense<0.000000e+00> : vector<9x9xf32>
    %130 = tpu.matmul %129, %85, %cst_57 {dimension_numbers = #tpu.dot_dimension_numbers<[1], [1], [0], [0], [0, 0, 1, 0], [], []>} : vector<9x64xbf16>, vector<9x64xbf16>, vector<9x9xf32> -> vector<9x9xf32>
    %cst_58 = arith.constant dense<0xFF800000> : vector<9xf32>
    %131 = vector.multi_reduction <maximumf>, %130, %cst_58 [1] : vector<9x9xf32> to vector<9xf32>
    %132 = vector.shape_cast %131 : vector<9xf32> to vector<9x1xf32>
    %133 = vector.broadcast %132 : vector<9x1xf32> to vector<9x9xf32>
    %134 = arith.subf %130, %133 : vector<9x9xf32>
    %135 = math.exp %134 : vector<9x9xf32>
    %cst_59 = arith.constant dense<0.000000e+00> : vector<9xf32>
    %136 = vector.multi_reduction <add>, %135, %cst_59 [1] : vector<9x9xf32> to vector<9xf32>
    %137 = vector.shape_cast %136 : vector<9xf32> to vector<9x1xf32>
    %138 = tpu.reciprocal %137 {approx = true} : vector<9x1xf32> -> vector<9x1xf32>
    %139 = vector.broadcast %138 : vector<9x1xf32> to vector<9x9xf32>
    %140 = arith.mulf %135, %139 : vector<9x9xf32>
    %141 = vector.broadcast %57 : vector<1x64xf32> to vector<9x64xf32>
    %142 = arith.mulf %84, %141 : vector<9x64xf32>
    %143 = arith.truncf %142 : vector<9x64xf32> to vector<9x64xbf16>
    %144 = arith.truncf %140 : vector<9x9xf32> to vector<9x9xbf16>
    %cst_60 = arith.constant dense<0.000000e+00> : vector<9x64xf32>
    %145 = tpu.matmul %144, %143, %cst_60 {dimension_numbers = #tpu.dot_dimension_numbers<[1], [0], [0], [1], [0, 0, 1, 1], [], []>} : vector<9x9xbf16>, vector<9x64xbf16>, vector<9x64xf32> -> vector<9x64xf32>
    %146 = arith.addf %126, %145 : vector<9x64xf32>
    %147 = vector.broadcast %65 : vector<1x64xf32> to vector<9x64xf32>
    %148 = arith.mulf %72, %147 : vector<9x64xf32>
    %149 = arith.truncf %148 : vector<9x64xf32> to vector<9x64xbf16>
    %cst_61 = arith.constant dense<0.000000e+00> : vector<9x9xf32>
    %150 = tpu.matmul %149, %85, %cst_61 {dimension_numbers = #tpu.dot_dimension_numbers<[1], [1], [0], [0], [0, 0, 1, 0], [], []>} : vector<9x64xbf16>, vector<9x64xbf16>, vector<9x9xf32> -> vector<9x9xf32>
    %cst_62 = arith.constant dense<0xFF800000> : vector<9xf32>
    %151 = vector.multi_reduction <maximumf>, %150, %cst_62 [1] : vector<9x9xf32> to vector<9xf32>
    %152 = vector.shape_cast %151 : vector<9xf32> to vector<9x1xf32>
    %153 = vector.broadcast %152 : vector<9x1xf32> to vector<9x9xf32>
    %154 = arith.subf %150, %153 : vector<9x9xf32>
    %155 = math.exp %154 : vector<9x9xf32>
    %cst_63 = arith.constant dense<0.000000e+00> : vector<9xf32>
    %156 = vector.multi_reduction <add>, %155, %cst_63 [1] : vector<9x9xf32> to vector<9xf32>
    %157 = vector.shape_cast %156 : vector<9xf32> to vector<9x1xf32>
    %158 = tpu.reciprocal %157 {approx = true} : vector<9x1xf32> -> vector<9x1xf32>
    %159 = vector.broadcast %158 : vector<9x1xf32> to vector<9x9xf32>
    %160 = arith.mulf %155, %159 : vector<9x9xf32>
    %161 = vector.broadcast %65 : vector<1x64xf32> to vector<9x64xf32>
    %162 = arith.mulf %84, %161 : vector<9x64xf32>
    %163 = arith.truncf %162 : vector<9x64xf32> to vector<9x64xbf16>
    %164 = arith.truncf %160 : vector<9x9xf32> to vector<9x9xbf16>
    %cst_64 = arith.constant dense<0.000000e+00> : vector<9x64xf32>
    %165 = tpu.matmul %164, %163, %cst_64 {dimension_numbers = #tpu.dot_dimension_numbers<[1], [0], [0], [1], [0, 0, 1, 1], [], []>} : vector<9x9xbf16>, vector<9x64xbf16>, vector<9x64xf32> -> vector<9x64xf32>
    %166 = arith.addf %146, %165 : vector<9x64xf32>
    %167 = arith.truncf %166 : vector<9x64xf32> to vector<9x64xbf16>
    %c15 = arith.constant 15 : index
    %c0_65 = arith.constant 0 : index
    %c0_66 = arith.constant 0 : index
    %168 = vector.load %arg8[%c15, %c0_65, %c0_66] : memref<20x64x64xbf16, #tpu.memory_space<vmem>>, vector<1x64x64xbf16>
    %169 = vector.shape_cast %168 : vector<1x64x64xbf16> to vector<64x64xbf16>
    %cst_67 = arith.constant dense<0.000000e+00> : vector<9x64xf32>
    %170 = tpu.matmul %167, %169, %cst_67 {dimension_numbers = #tpu.dot_dimension_numbers<[1], [0], [0], [1], [0, 0, 1, 1], [], []>} : vector<9x64xbf16>, vector<64x64xbf16>, vector<9x64xf32> -> vector<9x64xf32>
    %c15_68 = arith.constant 15 : index
    %c0_69 = arith.constant 0 : index
    %171 = vector.load %arg9[%c15_68, %c0_69] : memref<45x64xf32, #tpu.memory_space<vmem>>, vector<1x64xf32>
    %172 = vector.broadcast %171 : vector<1x64xf32> to vector<9x64xf32>
    %173 = arith.addf %170, %172 : vector<9x64xf32>
    %174 = arith.addf %32, %173 : vector<9x64xf32>
    %c20 = arith.constant 20 : index
    %c0_70 = arith.constant 0 : index
    %175 = vector.load %arg9[%c20, %c0_70] : memref<45x64xf32, #tpu.memory_space<vmem>>, vector<1x64xf32>
    %c25 = arith.constant 25 : index
    %c0_71 = arith.constant 0 : index
    %176 = vector.load %arg9[%c25, %c0_71] : memref<45x64xf32, #tpu.memory_space<vmem>>, vector<1x64xf32>
    %cst_72 = arith.constant dense<0.000000e+00> : vector<9xf32>
    %177 = vector.multi_reduction <add>, %174, %cst_72 [1] : vector<9x64xf32> to vector<9xf32>
    %178 = vector.shape_cast %177 : vector<9xf32> to vector<9x1xf32>
    %cst_73 = arith.constant 6.400000e+01 : f32
    %179 = vector.broadcast %cst_73 : f32 to vector<9x1xf32>
    %180 = arith.divf %178, %179 : vector<9x1xf32>
    %181 = vector.broadcast %180 : vector<9x1xf32> to vector<9x64xf32>
    %182 = arith.subf %174, %181 : vector<9x64xf32>
    %183 = arith.mulf %182, %182 : vector<9x64xf32>
    %cst_74 = arith.constant dense<0.000000e+00> : vector<9xf32>
    %184 = vector.multi_reduction <add>, %183, %cst_74 [1] : vector<9x64xf32> to vector<9xf32>
    %185 = vector.shape_cast %184 : vector<9xf32> to vector<9x1xf32>
    %cst_75 = arith.constant 6.400000e+01 : f32
    %186 = vector.broadcast %cst_75 : f32 to vector<9x1xf32>
    %187 = arith.divf %185, %186 : vector<9x1xf32>
    %188 = vector.broadcast %180 : vector<9x1xf32> to vector<9x64xf32>
    %189 = arith.subf %174, %188 : vector<9x64xf32>
    %cst_76 = arith.constant 9.99999974E-6 : f32
    %190 = vector.broadcast %cst_76 : f32 to vector<9x1xf32>
    %191 = arith.addf %187, %190 : vector<9x1xf32>
    %192 = math.rsqrt %191 : vector<9x1xf32>
    %193 = vector.broadcast %192 : vector<9x1xf32> to vector<9x64xf32>
    %194 = arith.mulf %189, %193 : vector<9x64xf32>
    %195 = vector.broadcast %175 : vector<1x64xf32> to vector<9x64xf32>
    %196 = arith.mulf %194, %195 : vector<9x64xf32>
    %197 = vector.broadcast %176 : vector<1x64xf32> to vector<9x64xf32>
    %198 = arith.addf %196, %197 : vector<9x64xf32>
    %199 = arith.truncf %198 : vector<9x64xf32> to vector<9x64xbf16>
    %c0_77 = arith.constant 0 : index
    %c0_78 = arith.constant 0 : index
    %c0_79 = arith.constant 0 : index
    %200 = vector.load %arg10[%c0_77, %c0_78, %c0_79] : memref<5x64x128xbf16, #tpu.memory_space<vmem>>, vector<1x64x128xbf16>
    %201 = vector.shape_cast %200 : vector<1x64x128xbf16> to vector<64x128xbf16>
    %cst_80 = arith.constant dense<0.000000e+00> : vector<9x128xf32>
    %202 = tpu.matmul %199, %201, %cst_80 {dimension_numbers = #tpu.dot_dimension_numbers<[1], [0], [0], [1], [0, 0, 1, 1], [], []>} : vector<9x64xbf16>, vector<64x128xbf16>, vector<9x128xf32> -> vector<9x128xf32>
    %c0_81 = arith.constant 0 : index
    %c0_82 = arith.constant 0 : index
    %203 = vector.load %arg11[%c0_81, %c0_82] : memref<5x128xf32, #tpu.memory_space<vmem>>, vector<1x128xf32>
    %204 = vector.broadcast %203 : vector<1x128xf32> to vector<9x128xf32>
    %205 = arith.addf %202, %204 : vector<9x128xf32>
    %cst_83 = arith.constant 5.000000e-01 : f32
    %206 = vector.broadcast %cst_83 : f32 to vector<9x128xf32>
    %207 = arith.mulf %206, %205 : vector<9x128xf32>
    %cst_84 = arith.constant 4.471500e-02 : f32
    %208 = vector.broadcast %cst_84 : f32 to vector<9x128xf32>
    %209 = arith.mulf %208, %205 : vector<9x128xf32>
    %210 = arith.mulf %209, %205 : vector<9x128xf32>
    %211 = arith.mulf %210, %205 : vector<9x128xf32>
    %212 = arith.addf %205, %211 : vector<9x128xf32>
    %cst_85 = arith.constant 0.797884583 : f32
    %213 = vector.broadcast %cst_85 : f32 to vector<9x128xf32>
    %214 = arith.mulf %213, %212 : vector<9x128xf32>
    %215 = math.tanh %214 : vector<9x128xf32>
    %cst_86 = arith.constant 1.000000e+00 : f32
    %216 = vector.broadcast %cst_86 : f32 to vector<9x128xf32>
    %217 = arith.addf %216, %215 : vector<9x128xf32>
    %218 = arith.mulf %207, %217 : vector<9x128xf32>
    %219 = arith.truncf %218 : vector<9x128xf32> to vector<9x128xbf16>
    %c0_87 = arith.constant 0 : index
    %c0_88 = arith.constant 0 : index
    %c0_89 = arith.constant 0 : index
    %220 = vector.load %arg12[%c0_87, %c0_88, %c0_89] : memref<5x128x64xbf16, #tpu.memory_space<vmem>>, vector<1x128x64xbf16>
    %221 = vector.shape_cast %220 : vector<1x128x64xbf16> to vector<128x64xbf16>
    %cst_90 = arith.constant dense<0.000000e+00> : vector<9x64xf32>
    %222 = tpu.matmul %219, %221, %cst_90 {dimension_numbers = #tpu.dot_dimension_numbers<[1], [0], [0], [1], [0, 0, 1, 1], [], []>} : vector<9x128xbf16>, vector<128x64xbf16>, vector<9x64xf32> -> vector<9x64xf32>
    %c30 = arith.constant 30 : index
    %c0_91 = arith.constant 0 : index
    %223 = vector.load %arg9[%c30, %c0_91] : memref<45x64xf32, #tpu.memory_space<vmem>>, vector<1x64xf32>
    %224 = vector.broadcast %223 : vector<1x64xf32> to vector<9x64xf32>
    %225 = arith.addf %222, %224 : vector<9x64xf32>
    %226 = arith.addf %198, %225 : vector<9x64xf32>
    %c35 = arith.constant 35 : index
    %c0_92 = arith.constant 0 : index
    %227 = vector.load %arg9[%c35, %c0_92] : memref<45x64xf32, #tpu.memory_space<vmem>>, vector<1x64xf32>
    %c40 = arith.constant 40 : index
    %c0_93 = arith.constant 0 : index
    %228 = vector.load %arg9[%c40, %c0_93] : memref<45x64xf32, #tpu.memory_space<vmem>>, vector<1x64xf32>
    %cst_94 = arith.constant dense<0.000000e+00> : vector<9xf32>
    %229 = vector.multi_reduction <add>, %226, %cst_94 [1] : vector<9x64xf32> to vector<9xf32>
    %230 = vector.shape_cast %229 : vector<9xf32> to vector<9x1xf32>
    %cst_95 = arith.constant 6.400000e+01 : f32
    %231 = vector.broadcast %cst_95 : f32 to vector<9x1xf32>
    %232 = arith.divf %230, %231 : vector<9x1xf32>
    %233 = vector.broadcast %232 : vector<9x1xf32> to vector<9x64xf32>
    %234 = arith.subf %226, %233 : vector<9x64xf32>
    %235 = arith.mulf %234, %234 : vector<9x64xf32>
    %cst_96 = arith.constant dense<0.000000e+00> : vector<9xf32>
    %236 = vector.multi_reduction <add>, %235, %cst_96 [1] : vector<9x64xf32> to vector<9xf32>
    %237 = vector.shape_cast %236 : vector<9xf32> to vector<9x1xf32>
    %cst_97 = arith.constant 6.400000e+01 : f32
    %238 = vector.broadcast %cst_97 : f32 to vector<9x1xf32>
    %239 = arith.divf %237, %238 : vector<9x1xf32>
    %240 = vector.broadcast %232 : vector<9x1xf32> to vector<9x64xf32>
    %241 = arith.subf %226, %240 : vector<9x64xf32>
    %cst_98 = arith.constant 9.99999974E-6 : f32
    %242 = vector.broadcast %cst_98 : f32 to vector<9x1xf32>
    %243 = arith.addf %239, %242 : vector<9x1xf32>
    %244 = math.rsqrt %243 : vector<9x1xf32>
    %245 = vector.broadcast %244 : vector<9x1xf32> to vector<9x64xf32>
    %246 = arith.mulf %241, %245 : vector<9x64xf32>
    %247 = vector.broadcast %227 : vector<1x64xf32> to vector<9x64xf32>
    %248 = arith.mulf %246, %247 : vector<9x64xf32>
    %249 = vector.broadcast %228 : vector<1x64xf32> to vector<9x64xf32>
    %250 = arith.addf %248, %249 : vector<9x64xf32>
    %251 = arith.truncf %250 : vector<9x64xf32> to vector<9x64xbf16>
    %c1_99 = arith.constant 1 : index
    %c0_100 = arith.constant 0 : index
    %c0_101 = arith.constant 0 : index
    %252 = vector.load %arg8[%c1_99, %c0_100, %c0_101] : memref<20x64x64xbf16, #tpu.memory_space<vmem>>, vector<1x64x64xbf16>
    %253 = vector.shape_cast %252 : vector<1x64x64xbf16> to vector<64x64xbf16>
    %cst_102 = arith.constant dense<0.000000e+00> : vector<9x64xf32>
    %254 = tpu.matmul %251, %253, %cst_102 {dimension_numbers = #tpu.dot_dimension_numbers<[1], [0], [0], [1], [0, 0, 1, 1], [], []>} : vector<9x64xbf16>, vector<64x64xbf16>, vector<9x64xf32> -> vector<9x64xf32>
    %c1_103 = arith.constant 1 : index
    %c0_104 = arith.constant 0 : index
    %255 = vector.load %arg9[%c1_103, %c0_104] : memref<45x64xf32, #tpu.memory_space<vmem>>, vector<1x64xf32>
    %256 = vector.broadcast %255 : vector<1x64xf32> to vector<9x64xf32>
    %257 = arith.addf %254, %256 : vector<9x64xf32>
    %c6 = arith.constant 6 : index
    %c0_105 = arith.constant 0 : index
    %c0_106 = arith.constant 0 : index
    %258 = vector.load %arg8[%c6, %c0_105, %c0_106] : memref<20x64x64xbf16, #tpu.memory_space<vmem>>, vector<1x64x64xbf16>
    %259 = vector.shape_cast %258 : vector<1x64x64xbf16> to vector<64x64xbf16>
    %cst_107 = arith.constant dense<0.000000e+00> : vector<9x64xf32>
    %260 = tpu.matmul %251, %259, %cst_107 {dimension_numbers = #tpu.dot_dimension_numbers<[1], [0], [0], [1], [0, 0, 1, 1], [], []>} : vector<9x64xbf16>, vector<64x64xbf16>, vector<9x64xf32> -> vector<9x64xf32>
    %c6_108 = arith.constant 6 : index
    %c0_109 = arith.constant 0 : index
    %261 = vector.load %arg9[%c6_108, %c0_109] : memref<45x64xf32, #tpu.memory_space<vmem>>, vector<1x64xf32>
    %262 = vector.broadcast %261 : vector<1x64xf32> to vector<9x64xf32>
    %263 = arith.addf %260, %262 : vector<9x64xf32>
    %c11 = arith.constant 11 : index
    %c0_110 = arith.constant 0 : index
    %c0_111 = arith.constant 0 : index
    %264 = vector.load %arg8[%c11, %c0_110, %c0_111] : memref<20x64x64xbf16, #tpu.memory_space<vmem>>, vector<1x64x64xbf16>
    %265 = vector.shape_cast %264 : vector<1x64x64xbf16> to vector<64x64xbf16>
    %cst_112 = arith.constant dense<0.000000e+00> : vector<9x64xf32>
    %266 = tpu.matmul %251, %265, %cst_112 {dimension_numbers = #tpu.dot_dimension_numbers<[1], [0], [0], [1], [0, 0, 1, 1], [], []>} : vector<9x64xbf16>, vector<64x64xbf16>, vector<9x64xf32> -> vector<9x64xf32>
    %c11_113 = arith.constant 11 : index
    %c0_114 = arith.constant 0 : index
    %267 = vector.load %arg9[%c11_113, %c0_114] : memref<45x64xf32, #tpu.memory_space<vmem>>, vector<1x64xf32>
    %268 = vector.broadcast %267 : vector<1x64xf32> to vector<9x64xf32>
    %269 = arith.addf %266, %268 : vector<9x64xf32>
    %270 = arith.truncf %263 : vector<9x64xf32> to vector<9x64xbf16>
    %cst_115 = arith.constant 0.000000e+00 : f32
    %271 = vector.broadcast %cst_115 : f32 to vector<9x64xf32>
    %272 = vector.broadcast %41 : vector<1x64xf32> to vector<9x64xf32>
    %273 = arith.mulf %257, %272 : vector<9x64xf32>
    %274 = arith.truncf %273 : vector<9x64xf32> to vector<9x64xbf16>
    %cst_116 = arith.constant dense<0.000000e+00> : vector<9x9xf32>
    %275 = tpu.matmul %274, %270, %cst_116 {dimension_numbers = #tpu.dot_dimension_numbers<[1], [1], [0], [0], [0, 0, 1, 0], [], []>} : vector<9x64xbf16>, vector<9x64xbf16>, vector<9x9xf32> -> vector<9x9xf32>
    %cst_117 = arith.constant dense<0xFF800000> : vector<9xf32>
    %276 = vector.multi_reduction <maximumf>, %275, %cst_117 [1] : vector<9x9xf32> to vector<9xf32>
    %277 = vector.shape_cast %276 : vector<9xf32> to vector<9x1xf32>
    %278 = vector.broadcast %277 : vector<9x1xf32> to vector<9x9xf32>
    %279 = arith.subf %275, %278 : vector<9x9xf32>
    %280 = math.exp %279 : vector<9x9xf32>
    %cst_118 = arith.constant dense<0.000000e+00> : vector<9xf32>
    %281 = vector.multi_reduction <add>, %280, %cst_118 [1] : vector<9x9xf32> to vector<9xf32>
    %282 = vector.shape_cast %281 : vector<9xf32> to vector<9x1xf32>
    %283 = tpu.reciprocal %282 {approx = true} : vector<9x1xf32> -> vector<9x1xf32>
    %284 = vector.broadcast %283 : vector<9x1xf32> to vector<9x9xf32>
    %285 = arith.mulf %280, %284 : vector<9x9xf32>
    %286 = vector.broadcast %41 : vector<1x64xf32> to vector<9x64xf32>
    %287 = arith.mulf %269, %286 : vector<9x64xf32>
    %288 = arith.truncf %287 : vector<9x64xf32> to vector<9x64xbf16>
    %289 = arith.truncf %285 : vector<9x9xf32> to vector<9x9xbf16>
    %cst_119 = arith.constant dense<0.000000e+00> : vector<9x64xf32>
    %290 = tpu.matmul %289, %288, %cst_119 {dimension_numbers = #tpu.dot_dimension_numbers<[1], [0], [0], [1], [0, 0, 1, 1], [], []>} : vector<9x9xbf16>, vector<9x64xbf16>, vector<9x64xf32> -> vector<9x64xf32>
    %291 = arith.addf %271, %290 : vector<9x64xf32>
    %292 = vector.broadcast %49 : vector<1x64xf32> to vector<9x64xf32>
    %293 = arith.mulf %257, %292 : vector<9x64xf32>
    %294 = arith.truncf %293 : vector<9x64xf32> to vector<9x64xbf16>
    %cst_120 = arith.constant dense<0.000000e+00> : vector<9x9xf32>
    %295 = tpu.matmul %294, %270, %cst_120 {dimension_numbers = #tpu.dot_dimension_numbers<[1], [1], [0], [0], [0, 0, 1, 0], [], []>} : vector<9x64xbf16>, vector<9x64xbf16>, vector<9x9xf32> -> vector<9x9xf32>
    %cst_121 = arith.constant dense<0xFF800000> : vector<9xf32>
    %296 = vector.multi_reduction <maximumf>, %295, %cst_121 [1] : vector<9x9xf32> to vector<9xf32>
    %297 = vector.shape_cast %296 : vector<9xf32> to vector<9x1xf32>
    %298 = vector.broadcast %297 : vector<9x1xf32> to vector<9x9xf32>
    %299 = arith.subf %295, %298 : vector<9x9xf32>
    %300 = math.exp %299 : vector<9x9xf32>
    %cst_122 = arith.constant dense<0.000000e+00> : vector<9xf32>
    %301 = vector.multi_reduction <add>, %300, %cst_122 [1] : vector<9x9xf32> to vector<9xf32>
    %302 = vector.shape_cast %301 : vector<9xf32> to vector<9x1xf32>
    %303 = tpu.reciprocal %302 {approx = true} : vector<9x1xf32> -> vector<9x1xf32>
    %304 = vector.broadcast %303 : vector<9x1xf32> to vector<9x9xf32>
    %305 = arith.mulf %300, %304 : vector<9x9xf32>
    %306 = vector.broadcast %49 : vector<1x64xf32> to vector<9x64xf32>
    %307 = arith.mulf %269, %306 : vector<9x64xf32>
    %308 = arith.truncf %307 : vector<9x64xf32> to vector<9x64xbf16>
    %309 = arith.truncf %305 : vector<9x9xf32> to vector<9x9xbf16>
    %cst_123 = arith.constant dense<0.000000e+00> : vector<9x64xf32>
    %310 = tpu.matmul %309, %308, %cst_123 {dimension_numbers = #tpu.dot_dimension_numbers<[1], [0], [0], [1], [0, 0, 1, 1], [], []>} : vector<9x9xbf16>, vector<9x64xbf16>, vector<9x64xf32> -> vector<9x64xf32>
    %311 = arith.addf %291, %310 : vector<9x64xf32>
    %312 = vector.broadcast %57 : vector<1x64xf32> to vector<9x64xf32>
    %313 = arith.mulf %257, %312 : vector<9x64xf32>
    %314 = arith.truncf %313 : vector<9x64xf32> to vector<9x64xbf16>
    %cst_124 = arith.constant dense<0.000000e+00> : vector<9x9xf32>
    %315 = tpu.matmul %314, %270, %cst_124 {dimension_numbers = #tpu.dot_dimension_numbers<[1], [1], [0], [0], [0, 0, 1, 0], [], []>} : vector<9x64xbf16>, vector<9x64xbf16>, vector<9x9xf32> -> vector<9x9xf32>
    %cst_125 = arith.constant dense<0xFF800000> : vector<9xf32>
    %316 = vector.multi_reduction <maximumf>, %315, %cst_125 [1] : vector<9x9xf32> to vector<9xf32>
    %317 = vector.shape_cast %316 : vector<9xf32> to vector<9x1xf32>
    %318 = vector.broadcast %317 : vector<9x1xf32> to vector<9x9xf32>
    %319 = arith.subf %315, %318 : vector<9x9xf32>
    %320 = math.exp %319 : vector<9x9xf32>
    %cst_126 = arith.constant dense<0.000000e+00> : vector<9xf32>
    %321 = vector.multi_reduction <add>, %320, %cst_126 [1] : vector<9x9xf32> to vector<9xf32>
    %322 = vector.shape_cast %321 : vector<9xf32> to vector<9x1xf32>
    %323 = tpu.reciprocal %322 {approx = true} : vector<9x1xf32> -> vector<9x1xf32>
    %324 = vector.broadcast %323 : vector<9x1xf32> to vector<9x9xf32>
    %325 = arith.mulf %320, %324 : vector<9x9xf32>
    %326 = vector.broadcast %57 : vector<1x64xf32> to vector<9x64xf32>
    %327 = arith.mulf %269, %326 : vector<9x64xf32>
    %328 = arith.truncf %327 : vector<9x64xf32> to vector<9x64xbf16>
    %329 = arith.truncf %325 : vector<9x9xf32> to vector<9x9xbf16>
    %cst_127 = arith.constant dense<0.000000e+00> : vector<9x64xf32>
    %330 = tpu.matmul %329, %328, %cst_127 {dimension_numbers = #tpu.dot_dimension_numbers<[1], [0], [0], [1], [0, 0, 1, 1], [], []>} : vector<9x9xbf16>, vector<9x64xbf16>, vector<9x64xf32> -> vector<9x64xf32>
    %331 = arith.addf %311, %330 : vector<9x64xf32>
    %332 = vector.broadcast %65 : vector<1x64xf32> to vector<9x64xf32>
    %333 = arith.mulf %257, %332 : vector<9x64xf32>
    %334 = arith.truncf %333 : vector<9x64xf32> to vector<9x64xbf16>
    %cst_128 = arith.constant dense<0.000000e+00> : vector<9x9xf32>
    %335 = tpu.matmul %334, %270, %cst_128 {dimension_numbers = #tpu.dot_dimension_numbers<[1], [1], [0], [0], [0, 0, 1, 0], [], []>} : vector<9x64xbf16>, vector<9x64xbf16>, vector<9x9xf32> -> vector<9x9xf32>
    %cst_129 = arith.constant dense<0xFF800000> : vector<9xf32>
    %336 = vector.multi_reduction <maximumf>, %335, %cst_129 [1] : vector<9x9xf32> to vector<9xf32>
    %337 = vector.shape_cast %336 : vector<9xf32> to vector<9x1xf32>
    %338 = vector.broadcast %337 : vector<9x1xf32> to vector<9x9xf32>
    %339 = arith.subf %335, %338 : vector<9x9xf32>
    %340 = math.exp %339 : vector<9x9xf32>
    %cst_130 = arith.constant dense<0.000000e+00> : vector<9xf32>
    %341 = vector.multi_reduction <add>, %340, %cst_130 [1] : vector<9x9xf32> to vector<9xf32>
    %342 = vector.shape_cast %341 : vector<9xf32> to vector<9x1xf32>
    %343 = tpu.reciprocal %342 {approx = true} : vector<9x1xf32> -> vector<9x1xf32>
    %344 = vector.broadcast %343 : vector<9x1xf32> to vector<9x9xf32>
    %345 = arith.mulf %340, %344 : vector<9x9xf32>
    %346 = vector.broadcast %65 : vector<1x64xf32> to vector<9x64xf32>
    %347 = arith.mulf %269, %346 : vector<9x64xf32>
    %348 = arith.truncf %347 : vector<9x64xf32> to vector<9x64xbf16>
    %349 = arith.truncf %345 : vector<9x9xf32> to vector<9x9xbf16>
    %cst_131 = arith.constant dense<0.000000e+00> : vector<9x64xf32>
    %350 = tpu.matmul %349, %348, %cst_131 {dimension_numbers = #tpu.dot_dimension_numbers<[1], [0], [0], [1], [0, 0, 1, 1], [], []>} : vector<9x9xbf16>, vector<9x64xbf16>, vector<9x64xf32> -> vector<9x64xf32>
    %351 = arith.addf %331, %350 : vector<9x64xf32>
    %352 = arith.truncf %351 : vector<9x64xf32> to vector<9x64xbf16>
    %c16 = arith.constant 16 : index
    %c0_132 = arith.constant 0 : index
    %c0_133 = arith.constant 0 : index
    %353 = vector.load %arg8[%c16, %c0_132, %c0_133] : memref<20x64x64xbf16, #tpu.memory_space<vmem>>, vector<1x64x64xbf16>
    %354 = vector.shape_cast %353 : vector<1x64x64xbf16> to vector<64x64xbf16>
    %cst_134 = arith.constant dense<0.000000e+00> : vector<9x64xf32>
    %355 = tpu.matmul %352, %354, %cst_134 {dimension_numbers = #tpu.dot_dimension_numbers<[1], [0], [0], [1], [0, 0, 1, 1], [], []>} : vector<9x64xbf16>, vector<64x64xbf16>, vector<9x64xf32> -> vector<9x64xf32>
    %c16_135 = arith.constant 16 : index
    %c0_136 = arith.constant 0 : index
    %356 = vector.load %arg9[%c16_135, %c0_136] : memref<45x64xf32, #tpu.memory_space<vmem>>, vector<1x64xf32>
    %357 = vector.broadcast %356 : vector<1x64xf32> to vector<9x64xf32>
    %358 = arith.addf %355, %357 : vector<9x64xf32>
    %359 = arith.addf %250, %358 : vector<9x64xf32>
    %c21 = arith.constant 21 : index
    %c0_137 = arith.constant 0 : index
    %360 = vector.load %arg9[%c21, %c0_137] : memref<45x64xf32, #tpu.memory_space<vmem>>, vector<1x64xf32>
    %c26 = arith.constant 26 : index
    %c0_138 = arith.constant 0 : index
    %361 = vector.load %arg9[%c26, %c0_138] : memref<45x64xf32, #tpu.memory_space<vmem>>, vector<1x64xf32>
    %cst_139 = arith.constant dense<0.000000e+00> : vector<9xf32>
    %362 = vector.multi_reduction <add>, %359, %cst_139 [1] : vector<9x64xf32> to vector<9xf32>
    %363 = vector.shape_cast %362 : vector<9xf32> to vector<9x1xf32>
    %cst_140 = arith.constant 6.400000e+01 : f32
    %364 = vector.broadcast %cst_140 : f32 to vector<9x1xf32>
    %365 = arith.divf %363, %364 : vector<9x1xf32>
    %366 = vector.broadcast %365 : vector<9x1xf32> to vector<9x64xf32>
    %367 = arith.subf %359, %366 : vector<9x64xf32>
    %368 = arith.mulf %367, %367 : vector<9x64xf32>
    %cst_141 = arith.constant dense<0.000000e+00> : vector<9xf32>
    %369 = vector.multi_reduction <add>, %368, %cst_141 [1] : vector<9x64xf32> to vector<9xf32>
    %370 = vector.shape_cast %369 : vector<9xf32> to vector<9x1xf32>
    %cst_142 = arith.constant 6.400000e+01 : f32
    %371 = vector.broadcast %cst_142 : f32 to vector<9x1xf32>
    %372 = arith.divf %370, %371 : vector<9x1xf32>
    %373 = vector.broadcast %365 : vector<9x1xf32> to vector<9x64xf32>
    %374 = arith.subf %359, %373 : vector<9x64xf32>
    %cst_143 = arith.constant 9.99999974E-6 : f32
    %375 = vector.broadcast %cst_143 : f32 to vector<9x1xf32>
    %376 = arith.addf %372, %375 : vector<9x1xf32>
    %377 = math.rsqrt %376 : vector<9x1xf32>
    %378 = vector.broadcast %377 : vector<9x1xf32> to vector<9x64xf32>
    %379 = arith.mulf %374, %378 : vector<9x64xf32>
    %380 = vector.broadcast %360 : vector<1x64xf32> to vector<9x64xf32>
    %381 = arith.mulf %379, %380 : vector<9x64xf32>
    %382 = vector.broadcast %361 : vector<1x64xf32> to vector<9x64xf32>
    %383 = arith.addf %381, %382 : vector<9x64xf32>
    %384 = arith.truncf %383 : vector<9x64xf32> to vector<9x64xbf16>
    %c1_144 = arith.constant 1 : index
    %c0_145 = arith.constant 0 : index
    %c0_146 = arith.constant 0 : index
    %385 = vector.load %arg10[%c1_144, %c0_145, %c0_146] : memref<5x64x128xbf16, #tpu.memory_space<vmem>>, vector<1x64x128xbf16>
    %386 = vector.shape_cast %385 : vector<1x64x128xbf16> to vector<64x128xbf16>
    %cst_147 = arith.constant dense<0.000000e+00> : vector<9x128xf32>
    %387 = tpu.matmul %384, %386, %cst_147 {dimension_numbers = #tpu.dot_dimension_numbers<[1], [0], [0], [1], [0, 0, 1, 1], [], []>} : vector<9x64xbf16>, vector<64x128xbf16>, vector<9x128xf32> -> vector<9x128xf32>
    %c1_148 = arith.constant 1 : index
    %c0_149 = arith.constant 0 : index
    %388 = vector.load %arg11[%c1_148, %c0_149] : memref<5x128xf32, #tpu.memory_space<vmem>>, vector<1x128xf32>
    %389 = vector.broadcast %388 : vector<1x128xf32> to vector<9x128xf32>
    %390 = arith.addf %387, %389 : vector<9x128xf32>
    %cst_150 = arith.constant 5.000000e-01 : f32
    %391 = vector.broadcast %cst_150 : f32 to vector<9x128xf32>
    %392 = arith.mulf %391, %390 : vector<9x128xf32>
    %cst_151 = arith.constant 4.471500e-02 : f32
    %393 = vector.broadcast %cst_151 : f32 to vector<9x128xf32>
    %394 = arith.mulf %393, %390 : vector<9x128xf32>
    %395 = arith.mulf %394, %390 : vector<9x128xf32>
    %396 = arith.mulf %395, %390 : vector<9x128xf32>
    %397 = arith.addf %390, %396 : vector<9x128xf32>
    %cst_152 = arith.constant 0.797884583 : f32
    %398 = vector.broadcast %cst_152 : f32 to vector<9x128xf32>
    %399 = arith.mulf %398, %397 : vector<9x128xf32>
    %400 = math.tanh %399 : vector<9x128xf32>
    %cst_153 = arith.constant 1.000000e+00 : f32
    %401 = vector.broadcast %cst_153 : f32 to vector<9x128xf32>
    %402 = arith.addf %401, %400 : vector<9x128xf32>
    %403 = arith.mulf %392, %402 : vector<9x128xf32>
    %404 = arith.truncf %403 : vector<9x128xf32> to vector<9x128xbf16>
    %c1_154 = arith.constant 1 : index
    %c0_155 = arith.constant 0 : index
    %c0_156 = arith.constant 0 : index
    %405 = vector.load %arg12[%c1_154, %c0_155, %c0_156] : memref<5x128x64xbf16, #tpu.memory_space<vmem>>, vector<1x128x64xbf16>
    %406 = vector.shape_cast %405 : vector<1x128x64xbf16> to vector<128x64xbf16>
    %cst_157 = arith.constant dense<0.000000e+00> : vector<9x64xf32>
    %407 = tpu.matmul %404, %406, %cst_157 {dimension_numbers = #tpu.dot_dimension_numbers<[1], [0], [0], [1], [0, 0, 1, 1], [], []>} : vector<9x128xbf16>, vector<128x64xbf16>, vector<9x64xf32> -> vector<9x64xf32>
    %c31 = arith.constant 31 : index
    %c0_158 = arith.constant 0 : index
    %408 = vector.load %arg9[%c31, %c0_158] : memref<45x64xf32, #tpu.memory_space<vmem>>, vector<1x64xf32>
    %409 = vector.broadcast %408 : vector<1x64xf32> to vector<9x64xf32>
    %410 = arith.addf %407, %409 : vector<9x64xf32>
    %411 = arith.addf %383, %410 : vector<9x64xf32>
    %c36 = arith.constant 36 : index
    %c0_159 = arith.constant 0 : index
    %412 = vector.load %arg9[%c36, %c0_159] : memref<45x64xf32, #tpu.memory_space<vmem>>, vector<1x64xf32>
    %c41 = arith.constant 41 : index
    %c0_160 = arith.constant 0 : index
    %413 = vector.load %arg9[%c41, %c0_160] : memref<45x64xf32, #tpu.memory_space<vmem>>, vector<1x64xf32>
    %cst_161 = arith.constant dense<0.000000e+00> : vector<9xf32>
    %414 = vector.multi_reduction <add>, %411, %cst_161 [1] : vector<9x64xf32> to vector<9xf32>
    %415 = vector.shape_cast %414 : vector<9xf32> to vector<9x1xf32>
    %cst_162 = arith.constant 6.400000e+01 : f32
    %416 = vector.broadcast %cst_162 : f32 to vector<9x1xf32>
    %417 = arith.divf %415, %416 : vector<9x1xf32>
    %418 = vector.broadcast %417 : vector<9x1xf32> to vector<9x64xf32>
    %419 = arith.subf %411, %418 : vector<9x64xf32>
    %420 = arith.mulf %419, %419 : vector<9x64xf32>
    %cst_163 = arith.constant dense<0.000000e+00> : vector<9xf32>
    %421 = vector.multi_reduction <add>, %420, %cst_163 [1] : vector<9x64xf32> to vector<9xf32>
    %422 = vector.shape_cast %421 : vector<9xf32> to vector<9x1xf32>
    %cst_164 = arith.constant 6.400000e+01 : f32
    %423 = vector.broadcast %cst_164 : f32 to vector<9x1xf32>
    %424 = arith.divf %422, %423 : vector<9x1xf32>
    %425 = vector.broadcast %417 : vector<9x1xf32> to vector<9x64xf32>
    %426 = arith.subf %411, %425 : vector<9x64xf32>
    %cst_165 = arith.constant 9.99999974E-6 : f32
    %427 = vector.broadcast %cst_165 : f32 to vector<9x1xf32>
    %428 = arith.addf %424, %427 : vector<9x1xf32>
    %429 = math.rsqrt %428 : vector<9x1xf32>
    %430 = vector.broadcast %429 : vector<9x1xf32> to vector<9x64xf32>
    %431 = arith.mulf %426, %430 : vector<9x64xf32>
    %432 = vector.broadcast %412 : vector<1x64xf32> to vector<9x64xf32>
    %433 = arith.mulf %431, %432 : vector<9x64xf32>
    %434 = vector.broadcast %413 : vector<1x64xf32> to vector<9x64xf32>
    %435 = arith.addf %433, %434 : vector<9x64xf32>
    %436 = arith.truncf %435 : vector<9x64xf32> to vector<9x64xbf16>
    %c2 = arith.constant 2 : index
    %c0_166 = arith.constant 0 : index
    %c0_167 = arith.constant 0 : index
    %437 = vector.load %arg8[%c2, %c0_166, %c0_167] : memref<20x64x64xbf16, #tpu.memory_space<vmem>>, vector<1x64x64xbf16>
    %438 = vector.shape_cast %437 : vector<1x64x64xbf16> to vector<64x64xbf16>
    %cst_168 = arith.constant dense<0.000000e+00> : vector<9x64xf32>
    %439 = tpu.matmul %436, %438, %cst_168 {dimension_numbers = #tpu.dot_dimension_numbers<[1], [0], [0], [1], [0, 0, 1, 1], [], []>} : vector<9x64xbf16>, vector<64x64xbf16>, vector<9x64xf32> -> vector<9x64xf32>
    %c2_169 = arith.constant 2 : index
    %c0_170 = arith.constant 0 : index
    %440 = vector.load %arg9[%c2_169, %c0_170] : memref<45x64xf32, #tpu.memory_space<vmem>>, vector<1x64xf32>
    %441 = vector.broadcast %440 : vector<1x64xf32> to vector<9x64xf32>
    %442 = arith.addf %439, %441 : vector<9x64xf32>
    %c7 = arith.constant 7 : index
    %c0_171 = arith.constant 0 : index
    %c0_172 = arith.constant 0 : index
    %443 = vector.load %arg8[%c7, %c0_171, %c0_172] : memref<20x64x64xbf16, #tpu.memory_space<vmem>>, vector<1x64x64xbf16>
    %444 = vector.shape_cast %443 : vector<1x64x64xbf16> to vector<64x64xbf16>
    %cst_173 = arith.constant dense<0.000000e+00> : vector<9x64xf32>
    %445 = tpu.matmul %436, %444, %cst_173 {dimension_numbers = #tpu.dot_dimension_numbers<[1], [0], [0], [1], [0, 0, 1, 1], [], []>} : vector<9x64xbf16>, vector<64x64xbf16>, vector<9x64xf32> -> vector<9x64xf32>
    %c7_174 = arith.constant 7 : index
    %c0_175 = arith.constant 0 : index
    %446 = vector.load %arg9[%c7_174, %c0_175] : memref<45x64xf32, #tpu.memory_space<vmem>>, vector<1x64xf32>
    %447 = vector.broadcast %446 : vector<1x64xf32> to vector<9x64xf32>
    %448 = arith.addf %445, %447 : vector<9x64xf32>
    %c12 = arith.constant 12 : index
    %c0_176 = arith.constant 0 : index
    %c0_177 = arith.constant 0 : index
    %449 = vector.load %arg8[%c12, %c0_176, %c0_177] : memref<20x64x64xbf16, #tpu.memory_space<vmem>>, vector<1x64x64xbf16>
    %450 = vector.shape_cast %449 : vector<1x64x64xbf16> to vector<64x64xbf16>
    %cst_178 = arith.constant dense<0.000000e+00> : vector<9x64xf32>
    %451 = tpu.matmul %436, %450, %cst_178 {dimension_numbers = #tpu.dot_dimension_numbers<[1], [0], [0], [1], [0, 0, 1, 1], [], []>} : vector<9x64xbf16>, vector<64x64xbf16>, vector<9x64xf32> -> vector<9x64xf32>
    %c12_179 = arith.constant 12 : index
    %c0_180 = arith.constant 0 : index
    %452 = vector.load %arg9[%c12_179, %c0_180] : memref<45x64xf32, #tpu.memory_space<vmem>>, vector<1x64xf32>
    %453 = vector.broadcast %452 : vector<1x64xf32> to vector<9x64xf32>
    %454 = arith.addf %451, %453 : vector<9x64xf32>
    %455 = arith.truncf %448 : vector<9x64xf32> to vector<9x64xbf16>
    %cst_181 = arith.constant 0.000000e+00 : f32
    %456 = vector.broadcast %cst_181 : f32 to vector<9x64xf32>
    %457 = vector.broadcast %41 : vector<1x64xf32> to vector<9x64xf32>
    %458 = arith.mulf %442, %457 : vector<9x64xf32>
    %459 = arith.truncf %458 : vector<9x64xf32> to vector<9x64xbf16>
    %cst_182 = arith.constant dense<0.000000e+00> : vector<9x9xf32>
    %460 = tpu.matmul %459, %455, %cst_182 {dimension_numbers = #tpu.dot_dimension_numbers<[1], [1], [0], [0], [0, 0, 1, 0], [], []>} : vector<9x64xbf16>, vector<9x64xbf16>, vector<9x9xf32> -> vector<9x9xf32>
    %cst_183 = arith.constant dense<0xFF800000> : vector<9xf32>
    %461 = vector.multi_reduction <maximumf>, %460, %cst_183 [1] : vector<9x9xf32> to vector<9xf32>
    %462 = vector.shape_cast %461 : vector<9xf32> to vector<9x1xf32>
    %463 = vector.broadcast %462 : vector<9x1xf32> to vector<9x9xf32>
    %464 = arith.subf %460, %463 : vector<9x9xf32>
    %465 = math.exp %464 : vector<9x9xf32>
    %cst_184 = arith.constant dense<0.000000e+00> : vector<9xf32>
    %466 = vector.multi_reduction <add>, %465, %cst_184 [1] : vector<9x9xf32> to vector<9xf32>
    %467 = vector.shape_cast %466 : vector<9xf32> to vector<9x1xf32>
    %468 = tpu.reciprocal %467 {approx = true} : vector<9x1xf32> -> vector<9x1xf32>
    %469 = vector.broadcast %468 : vector<9x1xf32> to vector<9x9xf32>
    %470 = arith.mulf %465, %469 : vector<9x9xf32>
    %471 = vector.broadcast %41 : vector<1x64xf32> to vector<9x64xf32>
    %472 = arith.mulf %454, %471 : vector<9x64xf32>
    %473 = arith.truncf %472 : vector<9x64xf32> to vector<9x64xbf16>
    %474 = arith.truncf %470 : vector<9x9xf32> to vector<9x9xbf16>
    %cst_185 = arith.constant dense<0.000000e+00> : vector<9x64xf32>
    %475 = tpu.matmul %474, %473, %cst_185 {dimension_numbers = #tpu.dot_dimension_numbers<[1], [0], [0], [1], [0, 0, 1, 1], [], []>} : vector<9x9xbf16>, vector<9x64xbf16>, vector<9x64xf32> -> vector<9x64xf32>
    %476 = arith.addf %456, %475 : vector<9x64xf32>
    %477 = vector.broadcast %49 : vector<1x64xf32> to vector<9x64xf32>
    %478 = arith.mulf %442, %477 : vector<9x64xf32>
    %479 = arith.truncf %478 : vector<9x64xf32> to vector<9x64xbf16>
    %cst_186 = arith.constant dense<0.000000e+00> : vector<9x9xf32>
    %480 = tpu.matmul %479, %455, %cst_186 {dimension_numbers = #tpu.dot_dimension_numbers<[1], [1], [0], [0], [0, 0, 1, 0], [], []>} : vector<9x64xbf16>, vector<9x64xbf16>, vector<9x9xf32> -> vector<9x9xf32>
    %cst_187 = arith.constant dense<0xFF800000> : vector<9xf32>
    %481 = vector.multi_reduction <maximumf>, %480, %cst_187 [1] : vector<9x9xf32> to vector<9xf32>
    %482 = vector.shape_cast %481 : vector<9xf32> to vector<9x1xf32>
    %483 = vector.broadcast %482 : vector<9x1xf32> to vector<9x9xf32>
    %484 = arith.subf %480, %483 : vector<9x9xf32>
    %485 = math.exp %484 : vector<9x9xf32>
    %cst_188 = arith.constant dense<0.000000e+00> : vector<9xf32>
    %486 = vector.multi_reduction <add>, %485, %cst_188 [1] : vector<9x9xf32> to vector<9xf32>
    %487 = vector.shape_cast %486 : vector<9xf32> to vector<9x1xf32>
    %488 = tpu.reciprocal %487 {approx = true} : vector<9x1xf32> -> vector<9x1xf32>
    %489 = vector.broadcast %488 : vector<9x1xf32> to vector<9x9xf32>
    %490 = arith.mulf %485, %489 : vector<9x9xf32>
    %491 = vector.broadcast %49 : vector<1x64xf32> to vector<9x64xf32>
    %492 = arith.mulf %454, %491 : vector<9x64xf32>
    %493 = arith.truncf %492 : vector<9x64xf32> to vector<9x64xbf16>
    %494 = arith.truncf %490 : vector<9x9xf32> to vector<9x9xbf16>
    %cst_189 = arith.constant dense<0.000000e+00> : vector<9x64xf32>
    %495 = tpu.matmul %494, %493, %cst_189 {dimension_numbers = #tpu.dot_dimension_numbers<[1], [0], [0], [1], [0, 0, 1, 1], [], []>} : vector<9x9xbf16>, vector<9x64xbf16>, vector<9x64xf32> -> vector<9x64xf32>
    %496 = arith.addf %476, %495 : vector<9x64xf32>
    %497 = vector.broadcast %57 : vector<1x64xf32> to vector<9x64xf32>
    %498 = arith.mulf %442, %497 : vector<9x64xf32>
    %499 = arith.truncf %498 : vector<9x64xf32> to vector<9x64xbf16>
    %cst_190 = arith.constant dense<0.000000e+00> : vector<9x9xf32>
    %500 = tpu.matmul %499, %455, %cst_190 {dimension_numbers = #tpu.dot_dimension_numbers<[1], [1], [0], [0], [0, 0, 1, 0], [], []>} : vector<9x64xbf16>, vector<9x64xbf16>, vector<9x9xf32> -> vector<9x9xf32>
    %cst_191 = arith.constant dense<0xFF800000> : vector<9xf32>
    %501 = vector.multi_reduction <maximumf>, %500, %cst_191 [1] : vector<9x9xf32> to vector<9xf32>
    %502 = vector.shape_cast %501 : vector<9xf32> to vector<9x1xf32>
    %503 = vector.broadcast %502 : vector<9x1xf32> to vector<9x9xf32>
    %504 = arith.subf %500, %503 : vector<9x9xf32>
    %505 = math.exp %504 : vector<9x9xf32>
    %cst_192 = arith.constant dense<0.000000e+00> : vector<9xf32>
    %506 = vector.multi_reduction <add>, %505, %cst_192 [1] : vector<9x9xf32> to vector<9xf32>
    %507 = vector.shape_cast %506 : vector<9xf32> to vector<9x1xf32>
    %508 = tpu.reciprocal %507 {approx = true} : vector<9x1xf32> -> vector<9x1xf32>
    %509 = vector.broadcast %508 : vector<9x1xf32> to vector<9x9xf32>
    %510 = arith.mulf %505, %509 : vector<9x9xf32>
    %511 = vector.broadcast %57 : vector<1x64xf32> to vector<9x64xf32>
    %512 = arith.mulf %454, %511 : vector<9x64xf32>
    %513 = arith.truncf %512 : vector<9x64xf32> to vector<9x64xbf16>
    %514 = arith.truncf %510 : vector<9x9xf32> to vector<9x9xbf16>
    %cst_193 = arith.constant dense<0.000000e+00> : vector<9x64xf32>
    %515 = tpu.matmul %514, %513, %cst_193 {dimension_numbers = #tpu.dot_dimension_numbers<[1], [0], [0], [1], [0, 0, 1, 1], [], []>} : vector<9x9xbf16>, vector<9x64xbf16>, vector<9x64xf32> -> vector<9x64xf32>
    %516 = arith.addf %496, %515 : vector<9x64xf32>
    %517 = vector.broadcast %65 : vector<1x64xf32> to vector<9x64xf32>
    %518 = arith.mulf %442, %517 : vector<9x64xf32>
    %519 = arith.truncf %518 : vector<9x64xf32> to vector<9x64xbf16>
    %cst_194 = arith.constant dense<0.000000e+00> : vector<9x9xf32>
    %520 = tpu.matmul %519, %455, %cst_194 {dimension_numbers = #tpu.dot_dimension_numbers<[1], [1], [0], [0], [0, 0, 1, 0], [], []>} : vector<9x64xbf16>, vector<9x64xbf16>, vector<9x9xf32> -> vector<9x9xf32>
    %cst_195 = arith.constant dense<0xFF800000> : vector<9xf32>
    %521 = vector.multi_reduction <maximumf>, %520, %cst_195 [1] : vector<9x9xf32> to vector<9xf32>
    %522 = vector.shape_cast %521 : vector<9xf32> to vector<9x1xf32>
    %523 = vector.broadcast %522 : vector<9x1xf32> to vector<9x9xf32>
    %524 = arith.subf %520, %523 : vector<9x9xf32>
    %525 = math.exp %524 : vector<9x9xf32>
    %cst_196 = arith.constant dense<0.000000e+00> : vector<9xf32>
    %526 = vector.multi_reduction <add>, %525, %cst_196 [1] : vector<9x9xf32> to vector<9xf32>
    %527 = vector.shape_cast %526 : vector<9xf32> to vector<9x1xf32>
    %528 = tpu.reciprocal %527 {approx = true} : vector<9x1xf32> -> vector<9x1xf32>
    %529 = vector.broadcast %528 : vector<9x1xf32> to vector<9x9xf32>
    %530 = arith.mulf %525, %529 : vector<9x9xf32>
    %531 = vector.broadcast %65 : vector<1x64xf32> to vector<9x64xf32>
    %532 = arith.mulf %454, %531 : vector<9x64xf32>
    %533 = arith.truncf %532 : vector<9x64xf32> to vector<9x64xbf16>
    %534 = arith.truncf %530 : vector<9x9xf32> to vector<9x9xbf16>
    %cst_197 = arith.constant dense<0.000000e+00> : vector<9x64xf32>
    %535 = tpu.matmul %534, %533, %cst_197 {dimension_numbers = #tpu.dot_dimension_numbers<[1], [0], [0], [1], [0, 0, 1, 1], [], []>} : vector<9x9xbf16>, vector<9x64xbf16>, vector<9x64xf32> -> vector<9x64xf32>
    %536 = arith.addf %516, %535 : vector<9x64xf32>
    %537 = arith.truncf %536 : vector<9x64xf32> to vector<9x64xbf16>
    %c17 = arith.constant 17 : index
    %c0_198 = arith.constant 0 : index
    %c0_199 = arith.constant 0 : index
    %538 = vector.load %arg8[%c17, %c0_198, %c0_199] : memref<20x64x64xbf16, #tpu.memory_space<vmem>>, vector<1x64x64xbf16>
    %539 = vector.shape_cast %538 : vector<1x64x64xbf16> to vector<64x64xbf16>
    %cst_200 = arith.constant dense<0.000000e+00> : vector<9x64xf32>
    %540 = tpu.matmul %537, %539, %cst_200 {dimension_numbers = #tpu.dot_dimension_numbers<[1], [0], [0], [1], [0, 0, 1, 1], [], []>} : vector<9x64xbf16>, vector<64x64xbf16>, vector<9x64xf32> -> vector<9x64xf32>
    %c17_201 = arith.constant 17 : index
    %c0_202 = arith.constant 0 : index
    %541 = vector.load %arg9[%c17_201, %c0_202] : memref<45x64xf32, #tpu.memory_space<vmem>>, vector<1x64xf32>
    %542 = vector.broadcast %541 : vector<1x64xf32> to vector<9x64xf32>
    %543 = arith.addf %540, %542 : vector<9x64xf32>
    %544 = arith.addf %435, %543 : vector<9x64xf32>
    %c22 = arith.constant 22 : index
    %c0_203 = arith.constant 0 : index
    %545 = vector.load %arg9[%c22, %c0_203] : memref<45x64xf32, #tpu.memory_space<vmem>>, vector<1x64xf32>
    %c27 = arith.constant 27 : index
    %c0_204 = arith.constant 0 : index
    %546 = vector.load %arg9[%c27, %c0_204] : memref<45x64xf32, #tpu.memory_space<vmem>>, vector<1x64xf32>
    %cst_205 = arith.constant dense<0.000000e+00> : vector<9xf32>
    %547 = vector.multi_reduction <add>, %544, %cst_205 [1] : vector<9x64xf32> to vector<9xf32>
    %548 = vector.shape_cast %547 : vector<9xf32> to vector<9x1xf32>
    %cst_206 = arith.constant 6.400000e+01 : f32
    %549 = vector.broadcast %cst_206 : f32 to vector<9x1xf32>
    %550 = arith.divf %548, %549 : vector<9x1xf32>
    %551 = vector.broadcast %550 : vector<9x1xf32> to vector<9x64xf32>
    %552 = arith.subf %544, %551 : vector<9x64xf32>
    %553 = arith.mulf %552, %552 : vector<9x64xf32>
    %cst_207 = arith.constant dense<0.000000e+00> : vector<9xf32>
    %554 = vector.multi_reduction <add>, %553, %cst_207 [1] : vector<9x64xf32> to vector<9xf32>
    %555 = vector.shape_cast %554 : vector<9xf32> to vector<9x1xf32>
    %cst_208 = arith.constant 6.400000e+01 : f32
    %556 = vector.broadcast %cst_208 : f32 to vector<9x1xf32>
    %557 = arith.divf %555, %556 : vector<9x1xf32>
    %558 = vector.broadcast %550 : vector<9x1xf32> to vector<9x64xf32>
    %559 = arith.subf %544, %558 : vector<9x64xf32>
    %cst_209 = arith.constant 9.99999974E-6 : f32
    %560 = vector.broadcast %cst_209 : f32 to vector<9x1xf32>
    %561 = arith.addf %557, %560 : vector<9x1xf32>
    %562 = math.rsqrt %561 : vector<9x1xf32>
    %563 = vector.broadcast %562 : vector<9x1xf32> to vector<9x64xf32>
    %564 = arith.mulf %559, %563 : vector<9x64xf32>
    %565 = vector.broadcast %545 : vector<1x64xf32> to vector<9x64xf32>
    %566 = arith.mulf %564, %565 : vector<9x64xf32>
    %567 = vector.broadcast %546 : vector<1x64xf32> to vector<9x64xf32>
    %568 = arith.addf %566, %567 : vector<9x64xf32>
    %569 = arith.truncf %568 : vector<9x64xf32> to vector<9x64xbf16>
    %c2_210 = arith.constant 2 : index
    %c0_211 = arith.constant 0 : index
    %c0_212 = arith.constant 0 : index
    %570 = vector.load %arg10[%c2_210, %c0_211, %c0_212] : memref<5x64x128xbf16, #tpu.memory_space<vmem>>, vector<1x64x128xbf16>
    %571 = vector.shape_cast %570 : vector<1x64x128xbf16> to vector<64x128xbf16>
    %cst_213 = arith.constant dense<0.000000e+00> : vector<9x128xf32>
    %572 = tpu.matmul %569, %571, %cst_213 {dimension_numbers = #tpu.dot_dimension_numbers<[1], [0], [0], [1], [0, 0, 1, 1], [], []>} : vector<9x64xbf16>, vector<64x128xbf16>, vector<9x128xf32> -> vector<9x128xf32>
    %c2_214 = arith.constant 2 : index
    %c0_215 = arith.constant 0 : index
    %573 = vector.load %arg11[%c2_214, %c0_215] : memref<5x128xf32, #tpu.memory_space<vmem>>, vector<1x128xf32>
    %574 = vector.broadcast %573 : vector<1x128xf32> to vector<9x128xf32>
    %575 = arith.addf %572, %574 : vector<9x128xf32>
    %cst_216 = arith.constant 5.000000e-01 : f32
    %576 = vector.broadcast %cst_216 : f32 to vector<9x128xf32>
    %577 = arith.mulf %576, %575 : vector<9x128xf32>
    %cst_217 = arith.constant 4.471500e-02 : f32
    %578 = vector.broadcast %cst_217 : f32 to vector<9x128xf32>
    %579 = arith.mulf %578, %575 : vector<9x128xf32>
    %580 = arith.mulf %579, %575 : vector<9x128xf32>
    %581 = arith.mulf %580, %575 : vector<9x128xf32>
    %582 = arith.addf %575, %581 : vector<9x128xf32>
    %cst_218 = arith.constant 0.797884583 : f32
    %583 = vector.broadcast %cst_218 : f32 to vector<9x128xf32>
    %584 = arith.mulf %583, %582 : vector<9x128xf32>
    %585 = math.tanh %584 : vector<9x128xf32>
    %cst_219 = arith.constant 1.000000e+00 : f32
    %586 = vector.broadcast %cst_219 : f32 to vector<9x128xf32>
    %587 = arith.addf %586, %585 : vector<9x128xf32>
    %588 = arith.mulf %577, %587 : vector<9x128xf32>
    %589 = arith.truncf %588 : vector<9x128xf32> to vector<9x128xbf16>
    %c2_220 = arith.constant 2 : index
    %c0_221 = arith.constant 0 : index
    %c0_222 = arith.constant 0 : index
    %590 = vector.load %arg12[%c2_220, %c0_221, %c0_222] : memref<5x128x64xbf16, #tpu.memory_space<vmem>>, vector<1x128x64xbf16>
    %591 = vector.shape_cast %590 : vector<1x128x64xbf16> to vector<128x64xbf16>
    %cst_223 = arith.constant dense<0.000000e+00> : vector<9x64xf32>
    %592 = tpu.matmul %589, %591, %cst_223 {dimension_numbers = #tpu.dot_dimension_numbers<[1], [0], [0], [1], [0, 0, 1, 1], [], []>} : vector<9x128xbf16>, vector<128x64xbf16>, vector<9x64xf32> -> vector<9x64xf32>
    %c32 = arith.constant 32 : index
    %c0_224 = arith.constant 0 : index
    %593 = vector.load %arg9[%c32, %c0_224] : memref<45x64xf32, #tpu.memory_space<vmem>>, vector<1x64xf32>
    %594 = vector.broadcast %593 : vector<1x64xf32> to vector<9x64xf32>
    %595 = arith.addf %592, %594 : vector<9x64xf32>
    %596 = arith.addf %568, %595 : vector<9x64xf32>
    %c37 = arith.constant 37 : index
    %c0_225 = arith.constant 0 : index
    %597 = vector.load %arg9[%c37, %c0_225] : memref<45x64xf32, #tpu.memory_space<vmem>>, vector<1x64xf32>
    %c42 = arith.constant 42 : index
    %c0_226 = arith.constant 0 : index
    %598 = vector.load %arg9[%c42, %c0_226] : memref<45x64xf32, #tpu.memory_space<vmem>>, vector<1x64xf32>
    %cst_227 = arith.constant dense<0.000000e+00> : vector<9xf32>
    %599 = vector.multi_reduction <add>, %596, %cst_227 [1] : vector<9x64xf32> to vector<9xf32>
    %600 = vector.shape_cast %599 : vector<9xf32> to vector<9x1xf32>
    %cst_228 = arith.constant 6.400000e+01 : f32
    %601 = vector.broadcast %cst_228 : f32 to vector<9x1xf32>
    %602 = arith.divf %600, %601 : vector<9x1xf32>
    %603 = vector.broadcast %602 : vector<9x1xf32> to vector<9x64xf32>
    %604 = arith.subf %596, %603 : vector<9x64xf32>
    %605 = arith.mulf %604, %604 : vector<9x64xf32>
    %cst_229 = arith.constant dense<0.000000e+00> : vector<9xf32>
    %606 = vector.multi_reduction <add>, %605, %cst_229 [1] : vector<9x64xf32> to vector<9xf32>
    %607 = vector.shape_cast %606 : vector<9xf32> to vector<9x1xf32>
    %cst_230 = arith.constant 6.400000e+01 : f32
    %608 = vector.broadcast %cst_230 : f32 to vector<9x1xf32>
    %609 = arith.divf %607, %608 : vector<9x1xf32>
    %610 = vector.broadcast %602 : vector<9x1xf32> to vector<9x64xf32>
    %611 = arith.subf %596, %610 : vector<9x64xf32>
    %cst_231 = arith.constant 9.99999974E-6 : f32
    %612 = vector.broadcast %cst_231 : f32 to vector<9x1xf32>
    %613 = arith.addf %609, %612 : vector<9x1xf32>
    %614 = math.rsqrt %613 : vector<9x1xf32>
    %615 = vector.broadcast %614 : vector<9x1xf32> to vector<9x64xf32>
    %616 = arith.mulf %611, %615 : vector<9x64xf32>
    %617 = vector.broadcast %597 : vector<1x64xf32> to vector<9x64xf32>
    %618 = arith.mulf %616, %617 : vector<9x64xf32>
    %619 = vector.broadcast %598 : vector<1x64xf32> to vector<9x64xf32>
    %620 = arith.addf %618, %619 : vector<9x64xf32>
    %621 = arith.truncf %620 : vector<9x64xf32> to vector<9x64xbf16>
    %c0_232 = arith.constant 0 : index
    %c0_233 = arith.constant 0 : index
    %c0_234 = arith.constant 0 : index
    %622 = vector.load %arg13[%c0_232, %c0_233, %c0_234] : memref<4x64x64xbf16, #tpu.memory_space<vmem>>, vector<1x64x64xbf16>
    %623 = vector.shape_cast %622 : vector<1x64x64xbf16> to vector<64x64xbf16>
    %cst_235 = arith.constant dense<0.000000e+00> : vector<9x64xf32>
    %624 = tpu.matmul %621, %623, %cst_235 {dimension_numbers = #tpu.dot_dimension_numbers<[1], [0], [0], [1], [0, 0, 1, 1], [], []>} : vector<9x64xbf16>, vector<64x64xbf16>, vector<9x64xf32> -> vector<9x64xf32>
    %625 = arith.truncf %435 : vector<9x64xf32> to vector<9x64xbf16>
    %c2_236 = arith.constant 2 : index
    %c0_237 = arith.constant 0 : index
    %c0_238 = arith.constant 0 : index
    %626 = vector.load %arg13[%c2_236, %c0_237, %c0_238] : memref<4x64x64xbf16, #tpu.memory_space<vmem>>, vector<1x64x64xbf16>
    %627 = vector.shape_cast %626 : vector<1x64x64xbf16> to vector<64x64xbf16>
    %cst_239 = arith.constant dense<0.000000e+00> : vector<9x64xf32>
    %628 = tpu.matmul %625, %627, %cst_239 {dimension_numbers = #tpu.dot_dimension_numbers<[1], [0], [0], [1], [0, 0, 1, 1], [], []>} : vector<9x64xbf16>, vector<64x64xbf16>, vector<9x64xf32> -> vector<9x64xf32>
    %629 = arith.addf %624, %628 : vector<9x64xf32>
    %c0_240 = arith.constant 0 : index
    %c0_241 = arith.constant 0 : index
    %630 = vector.load %arg14[%c0_240, %c0_241] : memref<2x64xf32, #tpu.memory_space<vmem>>, vector<1x64xf32>
    %631 = vector.broadcast %630 : vector<1x64xf32> to vector<9x64xf32>
    %632 = arith.addf %629, %631 : vector<9x64xf32>
    %633 = arith.truncf %632 : vector<9x64xf32> to vector<9x64xbf16>
    %c3 = arith.constant 3 : index
    %c0_242 = arith.constant 0 : index
    %c0_243 = arith.constant 0 : index
    %634 = vector.load %arg8[%c3, %c0_242, %c0_243] : memref<20x64x64xbf16, #tpu.memory_space<vmem>>, vector<1x64x64xbf16>
    %635 = vector.shape_cast %634 : vector<1x64x64xbf16> to vector<64x64xbf16>
    %cst_244 = arith.constant dense<0.000000e+00> : vector<9x64xf32>
    %636 = tpu.matmul %633, %635, %cst_244 {dimension_numbers = #tpu.dot_dimension_numbers<[1], [0], [0], [1], [0, 0, 1, 1], [], []>} : vector<9x64xbf16>, vector<64x64xbf16>, vector<9x64xf32> -> vector<9x64xf32>
    %c3_245 = arith.constant 3 : index
    %c0_246 = arith.constant 0 : index
    %637 = vector.load %arg9[%c3_245, %c0_246] : memref<45x64xf32, #tpu.memory_space<vmem>>, vector<1x64xf32>
    %638 = vector.broadcast %637 : vector<1x64xf32> to vector<9x64xf32>
    %639 = arith.addf %636, %638 : vector<9x64xf32>
    %c8 = arith.constant 8 : index
    %c0_247 = arith.constant 0 : index
    %c0_248 = arith.constant 0 : index
    %640 = vector.load %arg8[%c8, %c0_247, %c0_248] : memref<20x64x64xbf16, #tpu.memory_space<vmem>>, vector<1x64x64xbf16>
    %641 = vector.shape_cast %640 : vector<1x64x64xbf16> to vector<64x64xbf16>
    %cst_249 = arith.constant dense<0.000000e+00> : vector<9x64xf32>
    %642 = tpu.matmul %633, %641, %cst_249 {dimension_numbers = #tpu.dot_dimension_numbers<[1], [0], [0], [1], [0, 0, 1, 1], [], []>} : vector<9x64xbf16>, vector<64x64xbf16>, vector<9x64xf32> -> vector<9x64xf32>
    %c8_250 = arith.constant 8 : index
    %c0_251 = arith.constant 0 : index
    %643 = vector.load %arg9[%c8_250, %c0_251] : memref<45x64xf32, #tpu.memory_space<vmem>>, vector<1x64xf32>
    %644 = vector.broadcast %643 : vector<1x64xf32> to vector<9x64xf32>
    %645 = arith.addf %642, %644 : vector<9x64xf32>
    %c13 = arith.constant 13 : index
    %c0_252 = arith.constant 0 : index
    %c0_253 = arith.constant 0 : index
    %646 = vector.load %arg8[%c13, %c0_252, %c0_253] : memref<20x64x64xbf16, #tpu.memory_space<vmem>>, vector<1x64x64xbf16>
    %647 = vector.shape_cast %646 : vector<1x64x64xbf16> to vector<64x64xbf16>
    %cst_254 = arith.constant dense<0.000000e+00> : vector<9x64xf32>
    %648 = tpu.matmul %633, %647, %cst_254 {dimension_numbers = #tpu.dot_dimension_numbers<[1], [0], [0], [1], [0, 0, 1, 1], [], []>} : vector<9x64xbf16>, vector<64x64xbf16>, vector<9x64xf32> -> vector<9x64xf32>
    %c13_255 = arith.constant 13 : index
    %c0_256 = arith.constant 0 : index
    %649 = vector.load %arg9[%c13_255, %c0_256] : memref<45x64xf32, #tpu.memory_space<vmem>>, vector<1x64xf32>
    %650 = vector.broadcast %649 : vector<1x64xf32> to vector<9x64xf32>
    %651 = arith.addf %648, %650 : vector<9x64xf32>
    %652 = arith.truncf %645 : vector<9x64xf32> to vector<9x64xbf16>
    %cst_257 = arith.constant 0.000000e+00 : f32
    %653 = vector.broadcast %cst_257 : f32 to vector<9x64xf32>
    %654 = vector.broadcast %41 : vector<1x64xf32> to vector<9x64xf32>
    %655 = arith.mulf %639, %654 : vector<9x64xf32>
    %656 = arith.truncf %655 : vector<9x64xf32> to vector<9x64xbf16>
    %cst_258 = arith.constant dense<0.000000e+00> : vector<9x9xf32>
    %657 = tpu.matmul %656, %652, %cst_258 {dimension_numbers = #tpu.dot_dimension_numbers<[1], [1], [0], [0], [0, 0, 1, 0], [], []>} : vector<9x64xbf16>, vector<9x64xbf16>, vector<9x9xf32> -> vector<9x9xf32>
    %cst_259 = arith.constant dense<0xFF800000> : vector<9xf32>
    %658 = vector.multi_reduction <maximumf>, %657, %cst_259 [1] : vector<9x9xf32> to vector<9xf32>
    %659 = vector.shape_cast %658 : vector<9xf32> to vector<9x1xf32>
    %660 = vector.broadcast %659 : vector<9x1xf32> to vector<9x9xf32>
    %661 = arith.subf %657, %660 : vector<9x9xf32>
    %662 = math.exp %661 : vector<9x9xf32>
    %cst_260 = arith.constant dense<0.000000e+00> : vector<9xf32>
    %663 = vector.multi_reduction <add>, %662, %cst_260 [1] : vector<9x9xf32> to vector<9xf32>
    %664 = vector.shape_cast %663 : vector<9xf32> to vector<9x1xf32>
    %665 = tpu.reciprocal %664 {approx = true} : vector<9x1xf32> -> vector<9x1xf32>
    %666 = vector.broadcast %665 : vector<9x1xf32> to vector<9x9xf32>
    %667 = arith.mulf %662, %666 : vector<9x9xf32>
    %668 = vector.broadcast %41 : vector<1x64xf32> to vector<9x64xf32>
    %669 = arith.mulf %651, %668 : vector<9x64xf32>
    %670 = arith.truncf %669 : vector<9x64xf32> to vector<9x64xbf16>
    %671 = arith.truncf %667 : vector<9x9xf32> to vector<9x9xbf16>
    %cst_261 = arith.constant dense<0.000000e+00> : vector<9x64xf32>
    %672 = tpu.matmul %671, %670, %cst_261 {dimension_numbers = #tpu.dot_dimension_numbers<[1], [0], [0], [1], [0, 0, 1, 1], [], []>} : vector<9x9xbf16>, vector<9x64xbf16>, vector<9x64xf32> -> vector<9x64xf32>
    %673 = arith.addf %653, %672 : vector<9x64xf32>
    %674 = vector.broadcast %49 : vector<1x64xf32> to vector<9x64xf32>
    %675 = arith.mulf %639, %674 : vector<9x64xf32>
    %676 = arith.truncf %675 : vector<9x64xf32> to vector<9x64xbf16>
    %cst_262 = arith.constant dense<0.000000e+00> : vector<9x9xf32>
    %677 = tpu.matmul %676, %652, %cst_262 {dimension_numbers = #tpu.dot_dimension_numbers<[1], [1], [0], [0], [0, 0, 1, 0], [], []>} : vector<9x64xbf16>, vector<9x64xbf16>, vector<9x9xf32> -> vector<9x9xf32>
    %cst_263 = arith.constant dense<0xFF800000> : vector<9xf32>
    %678 = vector.multi_reduction <maximumf>, %677, %cst_263 [1] : vector<9x9xf32> to vector<9xf32>
    %679 = vector.shape_cast %678 : vector<9xf32> to vector<9x1xf32>
    %680 = vector.broadcast %679 : vector<9x1xf32> to vector<9x9xf32>
    %681 = arith.subf %677, %680 : vector<9x9xf32>
    %682 = math.exp %681 : vector<9x9xf32>
    %cst_264 = arith.constant dense<0.000000e+00> : vector<9xf32>
    %683 = vector.multi_reduction <add>, %682, %cst_264 [1] : vector<9x9xf32> to vector<9xf32>
    %684 = vector.shape_cast %683 : vector<9xf32> to vector<9x1xf32>
    %685 = tpu.reciprocal %684 {approx = true} : vector<9x1xf32> -> vector<9x1xf32>
    %686 = vector.broadcast %685 : vector<9x1xf32> to vector<9x9xf32>
    %687 = arith.mulf %682, %686 : vector<9x9xf32>
    %688 = vector.broadcast %49 : vector<1x64xf32> to vector<9x64xf32>
    %689 = arith.mulf %651, %688 : vector<9x64xf32>
    %690 = arith.truncf %689 : vector<9x64xf32> to vector<9x64xbf16>
    %691 = arith.truncf %687 : vector<9x9xf32> to vector<9x9xbf16>
    %cst_265 = arith.constant dense<0.000000e+00> : vector<9x64xf32>
    %692 = tpu.matmul %691, %690, %cst_265 {dimension_numbers = #tpu.dot_dimension_numbers<[1], [0], [0], [1], [0, 0, 1, 1], [], []>} : vector<9x9xbf16>, vector<9x64xbf16>, vector<9x64xf32> -> vector<9x64xf32>
    %693 = arith.addf %673, %692 : vector<9x64xf32>
    %694 = vector.broadcast %57 : vector<1x64xf32> to vector<9x64xf32>
    %695 = arith.mulf %639, %694 : vector<9x64xf32>
    %696 = arith.truncf %695 : vector<9x64xf32> to vector<9x64xbf16>
    %cst_266 = arith.constant dense<0.000000e+00> : vector<9x9xf32>
    %697 = tpu.matmul %696, %652, %cst_266 {dimension_numbers = #tpu.dot_dimension_numbers<[1], [1], [0], [0], [0, 0, 1, 0], [], []>} : vector<9x64xbf16>, vector<9x64xbf16>, vector<9x9xf32> -> vector<9x9xf32>
    %cst_267 = arith.constant dense<0xFF800000> : vector<9xf32>
    %698 = vector.multi_reduction <maximumf>, %697, %cst_267 [1] : vector<9x9xf32> to vector<9xf32>
    %699 = vector.shape_cast %698 : vector<9xf32> to vector<9x1xf32>
    %700 = vector.broadcast %699 : vector<9x1xf32> to vector<9x9xf32>
    %701 = arith.subf %697, %700 : vector<9x9xf32>
    %702 = math.exp %701 : vector<9x9xf32>
    %cst_268 = arith.constant dense<0.000000e+00> : vector<9xf32>
    %703 = vector.multi_reduction <add>, %702, %cst_268 [1] : vector<9x9xf32> to vector<9xf32>
    %704 = vector.shape_cast %703 : vector<9xf32> to vector<9x1xf32>
    %705 = tpu.reciprocal %704 {approx = true} : vector<9x1xf32> -> vector<9x1xf32>
    %706 = vector.broadcast %705 : vector<9x1xf32> to vector<9x9xf32>
    %707 = arith.mulf %702, %706 : vector<9x9xf32>
    %708 = vector.broadcast %57 : vector<1x64xf32> to vector<9x64xf32>
    %709 = arith.mulf %651, %708 : vector<9x64xf32>
    %710 = arith.truncf %709 : vector<9x64xf32> to vector<9x64xbf16>
    %711 = arith.truncf %707 : vector<9x9xf32> to vector<9x9xbf16>
    %cst_269 = arith.constant dense<0.000000e+00> : vector<9x64xf32>
    %712 = tpu.matmul %711, %710, %cst_269 {dimension_numbers = #tpu.dot_dimension_numbers<[1], [0], [0], [1], [0, 0, 1, 1], [], []>} : vector<9x9xbf16>, vector<9x64xbf16>, vector<9x64xf32> -> vector<9x64xf32>
    %713 = arith.addf %693, %712 : vector<9x64xf32>
    %714 = vector.broadcast %65 : vector<1x64xf32> to vector<9x64xf32>
    %715 = arith.mulf %639, %714 : vector<9x64xf32>
    %716 = arith.truncf %715 : vector<9x64xf32> to vector<9x64xbf16>
    %cst_270 = arith.constant dense<0.000000e+00> : vector<9x9xf32>
    %717 = tpu.matmul %716, %652, %cst_270 {dimension_numbers = #tpu.dot_dimension_numbers<[1], [1], [0], [0], [0, 0, 1, 0], [], []>} : vector<9x64xbf16>, vector<9x64xbf16>, vector<9x9xf32> -> vector<9x9xf32>
    %cst_271 = arith.constant dense<0xFF800000> : vector<9xf32>
    %718 = vector.multi_reduction <maximumf>, %717, %cst_271 [1] : vector<9x9xf32> to vector<9xf32>
    %719 = vector.shape_cast %718 : vector<9xf32> to vector<9x1xf32>
    %720 = vector.broadcast %719 : vector<9x1xf32> to vector<9x9xf32>
    %721 = arith.subf %717, %720 : vector<9x9xf32>
    %722 = math.exp %721 : vector<9x9xf32>
    %cst_272 = arith.constant dense<0.000000e+00> : vector<9xf32>
    %723 = vector.multi_reduction <add>, %722, %cst_272 [1] : vector<9x9xf32> to vector<9xf32>
    %724 = vector.shape_cast %723 : vector<9xf32> to vector<9x1xf32>
    %725 = tpu.reciprocal %724 {approx = true} : vector<9x1xf32> -> vector<9x1xf32>
    %726 = vector.broadcast %725 : vector<9x1xf32> to vector<9x9xf32>
    %727 = arith.mulf %722, %726 : vector<9x9xf32>
    %728 = vector.broadcast %65 : vector<1x64xf32> to vector<9x64xf32>
    %729 = arith.mulf %651, %728 : vector<9x64xf32>
    %730 = arith.truncf %729 : vector<9x64xf32> to vector<9x64xbf16>
    %731 = arith.truncf %727 : vector<9x9xf32> to vector<9x9xbf16>
    %cst_273 = arith.constant dense<0.000000e+00> : vector<9x64xf32>
    %732 = tpu.matmul %731, %730, %cst_273 {dimension_numbers = #tpu.dot_dimension_numbers<[1], [0], [0], [1], [0, 0, 1, 1], [], []>} : vector<9x9xbf16>, vector<9x64xbf16>, vector<9x64xf32> -> vector<9x64xf32>
    %733 = arith.addf %713, %732 : vector<9x64xf32>
    %734 = arith.truncf %733 : vector<9x64xf32> to vector<9x64xbf16>
    %c18 = arith.constant 18 : index
    %c0_274 = arith.constant 0 : index
    %c0_275 = arith.constant 0 : index
    %735 = vector.load %arg8[%c18, %c0_274, %c0_275] : memref<20x64x64xbf16, #tpu.memory_space<vmem>>, vector<1x64x64xbf16>
    %736 = vector.shape_cast %735 : vector<1x64x64xbf16> to vector<64x64xbf16>
    %cst_276 = arith.constant dense<0.000000e+00> : vector<9x64xf32>
    %737 = tpu.matmul %734, %736, %cst_276 {dimension_numbers = #tpu.dot_dimension_numbers<[1], [0], [0], [1], [0, 0, 1, 1], [], []>} : vector<9x64xbf16>, vector<64x64xbf16>, vector<9x64xf32> -> vector<9x64xf32>
    %c18_277 = arith.constant 18 : index
    %c0_278 = arith.constant 0 : index
    %738 = vector.load %arg9[%c18_277, %c0_278] : memref<45x64xf32, #tpu.memory_space<vmem>>, vector<1x64xf32>
    %739 = vector.broadcast %738 : vector<1x64xf32> to vector<9x64xf32>
    %740 = arith.addf %737, %739 : vector<9x64xf32>
    %741 = arith.addf %632, %740 : vector<9x64xf32>
    %c23 = arith.constant 23 : index
    %c0_279 = arith.constant 0 : index
    %742 = vector.load %arg9[%c23, %c0_279] : memref<45x64xf32, #tpu.memory_space<vmem>>, vector<1x64xf32>
    %c28 = arith.constant 28 : index
    %c0_280 = arith.constant 0 : index
    %743 = vector.load %arg9[%c28, %c0_280] : memref<45x64xf32, #tpu.memory_space<vmem>>, vector<1x64xf32>
    %cst_281 = arith.constant dense<0.000000e+00> : vector<9xf32>
    %744 = vector.multi_reduction <add>, %741, %cst_281 [1] : vector<9x64xf32> to vector<9xf32>
    %745 = vector.shape_cast %744 : vector<9xf32> to vector<9x1xf32>
    %cst_282 = arith.constant 6.400000e+01 : f32
    %746 = vector.broadcast %cst_282 : f32 to vector<9x1xf32>
    %747 = arith.divf %745, %746 : vector<9x1xf32>
    %748 = vector.broadcast %747 : vector<9x1xf32> to vector<9x64xf32>
    %749 = arith.subf %741, %748 : vector<9x64xf32>
    %750 = arith.mulf %749, %749 : vector<9x64xf32>
    %cst_283 = arith.constant dense<0.000000e+00> : vector<9xf32>
    %751 = vector.multi_reduction <add>, %750, %cst_283 [1] : vector<9x64xf32> to vector<9xf32>
    %752 = vector.shape_cast %751 : vector<9xf32> to vector<9x1xf32>
    %cst_284 = arith.constant 6.400000e+01 : f32
    %753 = vector.broadcast %cst_284 : f32 to vector<9x1xf32>
    %754 = arith.divf %752, %753 : vector<9x1xf32>
    %755 = vector.broadcast %747 : vector<9x1xf32> to vector<9x64xf32>
    %756 = arith.subf %741, %755 : vector<9x64xf32>
    %cst_285 = arith.constant 9.99999974E-6 : f32
    %757 = vector.broadcast %cst_285 : f32 to vector<9x1xf32>
    %758 = arith.addf %754, %757 : vector<9x1xf32>
    %759 = math.rsqrt %758 : vector<9x1xf32>
    %760 = vector.broadcast %759 : vector<9x1xf32> to vector<9x64xf32>
    %761 = arith.mulf %756, %760 : vector<9x64xf32>
    %762 = vector.broadcast %742 : vector<1x64xf32> to vector<9x64xf32>
    %763 = arith.mulf %761, %762 : vector<9x64xf32>
    %764 = vector.broadcast %743 : vector<1x64xf32> to vector<9x64xf32>
    %765 = arith.addf %763, %764 : vector<9x64xf32>
    %766 = arith.truncf %765 : vector<9x64xf32> to vector<9x64xbf16>
    %c3_286 = arith.constant 3 : index
    %c0_287 = arith.constant 0 : index
    %c0_288 = arith.constant 0 : index
    %767 = vector.load %arg10[%c3_286, %c0_287, %c0_288] : memref<5x64x128xbf16, #tpu.memory_space<vmem>>, vector<1x64x128xbf16>
    %768 = vector.shape_cast %767 : vector<1x64x128xbf16> to vector<64x128xbf16>
    %cst_289 = arith.constant dense<0.000000e+00> : vector<9x128xf32>
    %769 = tpu.matmul %766, %768, %cst_289 {dimension_numbers = #tpu.dot_dimension_numbers<[1], [0], [0], [1], [0, 0, 1, 1], [], []>} : vector<9x64xbf16>, vector<64x128xbf16>, vector<9x128xf32> -> vector<9x128xf32>
    %c3_290 = arith.constant 3 : index
    %c0_291 = arith.constant 0 : index
    %770 = vector.load %arg11[%c3_290, %c0_291] : memref<5x128xf32, #tpu.memory_space<vmem>>, vector<1x128xf32>
    %771 = vector.broadcast %770 : vector<1x128xf32> to vector<9x128xf32>
    %772 = arith.addf %769, %771 : vector<9x128xf32>
    %cst_292 = arith.constant 5.000000e-01 : f32
    %773 = vector.broadcast %cst_292 : f32 to vector<9x128xf32>
    %774 = arith.mulf %773, %772 : vector<9x128xf32>
    %cst_293 = arith.constant 4.471500e-02 : f32
    %775 = vector.broadcast %cst_293 : f32 to vector<9x128xf32>
    %776 = arith.mulf %775, %772 : vector<9x128xf32>
    %777 = arith.mulf %776, %772 : vector<9x128xf32>
    %778 = arith.mulf %777, %772 : vector<9x128xf32>
    %779 = arith.addf %772, %778 : vector<9x128xf32>
    %cst_294 = arith.constant 0.797884583 : f32
    %780 = vector.broadcast %cst_294 : f32 to vector<9x128xf32>
    %781 = arith.mulf %780, %779 : vector<9x128xf32>
    %782 = math.tanh %781 : vector<9x128xf32>
    %cst_295 = arith.constant 1.000000e+00 : f32
    %783 = vector.broadcast %cst_295 : f32 to vector<9x128xf32>
    %784 = arith.addf %783, %782 : vector<9x128xf32>
    %785 = arith.mulf %774, %784 : vector<9x128xf32>
    %786 = arith.truncf %785 : vector<9x128xf32> to vector<9x128xbf16>
    %c3_296 = arith.constant 3 : index
    %c0_297 = arith.constant 0 : index
    %c0_298 = arith.constant 0 : index
    %787 = vector.load %arg12[%c3_296, %c0_297, %c0_298] : memref<5x128x64xbf16, #tpu.memory_space<vmem>>, vector<1x128x64xbf16>
    %788 = vector.shape_cast %787 : vector<1x128x64xbf16> to vector<128x64xbf16>
    %cst_299 = arith.constant dense<0.000000e+00> : vector<9x64xf32>
    %789 = tpu.matmul %786, %788, %cst_299 {dimension_numbers = #tpu.dot_dimension_numbers<[1], [0], [0], [1], [0, 0, 1, 1], [], []>} : vector<9x128xbf16>, vector<128x64xbf16>, vector<9x64xf32> -> vector<9x64xf32>
    %c33 = arith.constant 33 : index
    %c0_300 = arith.constant 0 : index
    %790 = vector.load %arg9[%c33, %c0_300] : memref<45x64xf32, #tpu.memory_space<vmem>>, vector<1x64xf32>
    %791 = vector.broadcast %790 : vector<1x64xf32> to vector<9x64xf32>
    %792 = arith.addf %789, %791 : vector<9x64xf32>
    %793 = arith.addf %765, %792 : vector<9x64xf32>
    %c38 = arith.constant 38 : index
    %c0_301 = arith.constant 0 : index
    %794 = vector.load %arg9[%c38, %c0_301] : memref<45x64xf32, #tpu.memory_space<vmem>>, vector<1x64xf32>
    %c43 = arith.constant 43 : index
    %c0_302 = arith.constant 0 : index
    %795 = vector.load %arg9[%c43, %c0_302] : memref<45x64xf32, #tpu.memory_space<vmem>>, vector<1x64xf32>
    %cst_303 = arith.constant dense<0.000000e+00> : vector<9xf32>
    %796 = vector.multi_reduction <add>, %793, %cst_303 [1] : vector<9x64xf32> to vector<9xf32>
    %797 = vector.shape_cast %796 : vector<9xf32> to vector<9x1xf32>
    %cst_304 = arith.constant 6.400000e+01 : f32
    %798 = vector.broadcast %cst_304 : f32 to vector<9x1xf32>
    %799 = arith.divf %797, %798 : vector<9x1xf32>
    %800 = vector.broadcast %799 : vector<9x1xf32> to vector<9x64xf32>
    %801 = arith.subf %793, %800 : vector<9x64xf32>
    %802 = arith.mulf %801, %801 : vector<9x64xf32>
    %cst_305 = arith.constant dense<0.000000e+00> : vector<9xf32>
    %803 = vector.multi_reduction <add>, %802, %cst_305 [1] : vector<9x64xf32> to vector<9xf32>
    %804 = vector.shape_cast %803 : vector<9xf32> to vector<9x1xf32>
    %cst_306 = arith.constant 6.400000e+01 : f32
    %805 = vector.broadcast %cst_306 : f32 to vector<9x1xf32>
    %806 = arith.divf %804, %805 : vector<9x1xf32>
    %807 = vector.broadcast %799 : vector<9x1xf32> to vector<9x64xf32>
    %808 = arith.subf %793, %807 : vector<9x64xf32>
    %cst_307 = arith.constant 9.99999974E-6 : f32
    %809 = vector.broadcast %cst_307 : f32 to vector<9x1xf32>
    %810 = arith.addf %806, %809 : vector<9x1xf32>
    %811 = math.rsqrt %810 : vector<9x1xf32>
    %812 = vector.broadcast %811 : vector<9x1xf32> to vector<9x64xf32>
    %813 = arith.mulf %808, %812 : vector<9x64xf32>
    %814 = vector.broadcast %794 : vector<1x64xf32> to vector<9x64xf32>
    %815 = arith.mulf %813, %814 : vector<9x64xf32>
    %816 = vector.broadcast %795 : vector<1x64xf32> to vector<9x64xf32>
    %817 = arith.addf %815, %816 : vector<9x64xf32>
    %818 = arith.truncf %817 : vector<9x64xf32> to vector<9x64xbf16>
    %c1_308 = arith.constant 1 : index
    %c0_309 = arith.constant 0 : index
    %c0_310 = arith.constant 0 : index
    %819 = vector.load %arg13[%c1_308, %c0_309, %c0_310] : memref<4x64x64xbf16, #tpu.memory_space<vmem>>, vector<1x64x64xbf16>
    %820 = vector.shape_cast %819 : vector<1x64x64xbf16> to vector<64x64xbf16>
    %cst_311 = arith.constant dense<0.000000e+00> : vector<9x64xf32>
    %821 = tpu.matmul %818, %820, %cst_311 {dimension_numbers = #tpu.dot_dimension_numbers<[1], [0], [0], [1], [0, 0, 1, 1], [], []>} : vector<9x64xbf16>, vector<64x64xbf16>, vector<9x64xf32> -> vector<9x64xf32>
    %822 = arith.truncf %250 : vector<9x64xf32> to vector<9x64xbf16>
    %c3_312 = arith.constant 3 : index
    %c0_313 = arith.constant 0 : index
    %c0_314 = arith.constant 0 : index
    %823 = vector.load %arg13[%c3_312, %c0_313, %c0_314] : memref<4x64x64xbf16, #tpu.memory_space<vmem>>, vector<1x64x64xbf16>
    %824 = vector.shape_cast %823 : vector<1x64x64xbf16> to vector<64x64xbf16>
    %cst_315 = arith.constant dense<0.000000e+00> : vector<9x64xf32>
    %825 = tpu.matmul %822, %824, %cst_315 {dimension_numbers = #tpu.dot_dimension_numbers<[1], [0], [0], [1], [0, 0, 1, 1], [], []>} : vector<9x64xbf16>, vector<64x64xbf16>, vector<9x64xf32> -> vector<9x64xf32>
    %826 = arith.addf %821, %825 : vector<9x64xf32>
    %c1_316 = arith.constant 1 : index
    %c0_317 = arith.constant 0 : index
    %827 = vector.load %arg14[%c1_316, %c0_317] : memref<2x64xf32, #tpu.memory_space<vmem>>, vector<1x64xf32>
    %828 = vector.broadcast %827 : vector<1x64xf32> to vector<9x64xf32>
    %829 = arith.addf %826, %828 : vector<9x64xf32>
    %830 = arith.truncf %829 : vector<9x64xf32> to vector<9x64xbf16>
    %c4 = arith.constant 4 : index
    %c0_318 = arith.constant 0 : index
    %c0_319 = arith.constant 0 : index
    %831 = vector.load %arg8[%c4, %c0_318, %c0_319] : memref<20x64x64xbf16, #tpu.memory_space<vmem>>, vector<1x64x64xbf16>
    %832 = vector.shape_cast %831 : vector<1x64x64xbf16> to vector<64x64xbf16>
    %cst_320 = arith.constant dense<0.000000e+00> : vector<9x64xf32>
    %833 = tpu.matmul %830, %832, %cst_320 {dimension_numbers = #tpu.dot_dimension_numbers<[1], [0], [0], [1], [0, 0, 1, 1], [], []>} : vector<9x64xbf16>, vector<64x64xbf16>, vector<9x64xf32> -> vector<9x64xf32>
    %c4_321 = arith.constant 4 : index
    %c0_322 = arith.constant 0 : index
    %834 = vector.load %arg9[%c4_321, %c0_322] : memref<45x64xf32, #tpu.memory_space<vmem>>, vector<1x64xf32>
    %835 = vector.broadcast %834 : vector<1x64xf32> to vector<9x64xf32>
    %836 = arith.addf %833, %835 : vector<9x64xf32>
    %c9 = arith.constant 9 : index
    %c0_323 = arith.constant 0 : index
    %c0_324 = arith.constant 0 : index
    %837 = vector.load %arg8[%c9, %c0_323, %c0_324] : memref<20x64x64xbf16, #tpu.memory_space<vmem>>, vector<1x64x64xbf16>
    %838 = vector.shape_cast %837 : vector<1x64x64xbf16> to vector<64x64xbf16>
    %cst_325 = arith.constant dense<0.000000e+00> : vector<9x64xf32>
    %839 = tpu.matmul %830, %838, %cst_325 {dimension_numbers = #tpu.dot_dimension_numbers<[1], [0], [0], [1], [0, 0, 1, 1], [], []>} : vector<9x64xbf16>, vector<64x64xbf16>, vector<9x64xf32> -> vector<9x64xf32>
    %c9_326 = arith.constant 9 : index
    %c0_327 = arith.constant 0 : index
    %840 = vector.load %arg9[%c9_326, %c0_327] : memref<45x64xf32, #tpu.memory_space<vmem>>, vector<1x64xf32>
    %841 = vector.broadcast %840 : vector<1x64xf32> to vector<9x64xf32>
    %842 = arith.addf %839, %841 : vector<9x64xf32>
    %c14 = arith.constant 14 : index
    %c0_328 = arith.constant 0 : index
    %c0_329 = arith.constant 0 : index
    %843 = vector.load %arg8[%c14, %c0_328, %c0_329] : memref<20x64x64xbf16, #tpu.memory_space<vmem>>, vector<1x64x64xbf16>
    %844 = vector.shape_cast %843 : vector<1x64x64xbf16> to vector<64x64xbf16>
    %cst_330 = arith.constant dense<0.000000e+00> : vector<9x64xf32>
    %845 = tpu.matmul %830, %844, %cst_330 {dimension_numbers = #tpu.dot_dimension_numbers<[1], [0], [0], [1], [0, 0, 1, 1], [], []>} : vector<9x64xbf16>, vector<64x64xbf16>, vector<9x64xf32> -> vector<9x64xf32>
    %c14_331 = arith.constant 14 : index
    %c0_332 = arith.constant 0 : index
    %846 = vector.load %arg9[%c14_331, %c0_332] : memref<45x64xf32, #tpu.memory_space<vmem>>, vector<1x64xf32>
    %847 = vector.broadcast %846 : vector<1x64xf32> to vector<9x64xf32>
    %848 = arith.addf %845, %847 : vector<9x64xf32>
    %849 = arith.truncf %842 : vector<9x64xf32> to vector<9x64xbf16>
    %cst_333 = arith.constant 0.000000e+00 : f32
    %850 = vector.broadcast %cst_333 : f32 to vector<9x64xf32>
    %851 = vector.broadcast %41 : vector<1x64xf32> to vector<9x64xf32>
    %852 = arith.mulf %836, %851 : vector<9x64xf32>
    %853 = arith.truncf %852 : vector<9x64xf32> to vector<9x64xbf16>
    %cst_334 = arith.constant dense<0.000000e+00> : vector<9x9xf32>
    %854 = tpu.matmul %853, %849, %cst_334 {dimension_numbers = #tpu.dot_dimension_numbers<[1], [1], [0], [0], [0, 0, 1, 0], [], []>} : vector<9x64xbf16>, vector<9x64xbf16>, vector<9x9xf32> -> vector<9x9xf32>
    %cst_335 = arith.constant dense<0xFF800000> : vector<9xf32>
    %855 = vector.multi_reduction <maximumf>, %854, %cst_335 [1] : vector<9x9xf32> to vector<9xf32>
    %856 = vector.shape_cast %855 : vector<9xf32> to vector<9x1xf32>
    %857 = vector.broadcast %856 : vector<9x1xf32> to vector<9x9xf32>
    %858 = arith.subf %854, %857 : vector<9x9xf32>
    %859 = math.exp %858 : vector<9x9xf32>
    %cst_336 = arith.constant dense<0.000000e+00> : vector<9xf32>
    %860 = vector.multi_reduction <add>, %859, %cst_336 [1] : vector<9x9xf32> to vector<9xf32>
    %861 = vector.shape_cast %860 : vector<9xf32> to vector<9x1xf32>
    %862 = tpu.reciprocal %861 {approx = true} : vector<9x1xf32> -> vector<9x1xf32>
    %863 = vector.broadcast %862 : vector<9x1xf32> to vector<9x9xf32>
    %864 = arith.mulf %859, %863 : vector<9x9xf32>
    %865 = vector.broadcast %41 : vector<1x64xf32> to vector<9x64xf32>
    %866 = arith.mulf %848, %865 : vector<9x64xf32>
    %867 = arith.truncf %866 : vector<9x64xf32> to vector<9x64xbf16>
    %868 = arith.truncf %864 : vector<9x9xf32> to vector<9x9xbf16>
    %cst_337 = arith.constant dense<0.000000e+00> : vector<9x64xf32>
    %869 = tpu.matmul %868, %867, %cst_337 {dimension_numbers = #tpu.dot_dimension_numbers<[1], [0], [0], [1], [0, 0, 1, 1], [], []>} : vector<9x9xbf16>, vector<9x64xbf16>, vector<9x64xf32> -> vector<9x64xf32>
    %870 = arith.addf %850, %869 : vector<9x64xf32>
    %871 = vector.broadcast %49 : vector<1x64xf32> to vector<9x64xf32>
    %872 = arith.mulf %836, %871 : vector<9x64xf32>
    %873 = arith.truncf %872 : vector<9x64xf32> to vector<9x64xbf16>
    %cst_338 = arith.constant dense<0.000000e+00> : vector<9x9xf32>
    %874 = tpu.matmul %873, %849, %cst_338 {dimension_numbers = #tpu.dot_dimension_numbers<[1], [1], [0], [0], [0, 0, 1, 0], [], []>} : vector<9x64xbf16>, vector<9x64xbf16>, vector<9x9xf32> -> vector<9x9xf32>
    %cst_339 = arith.constant dense<0xFF800000> : vector<9xf32>
    %875 = vector.multi_reduction <maximumf>, %874, %cst_339 [1] : vector<9x9xf32> to vector<9xf32>
    %876 = vector.shape_cast %875 : vector<9xf32> to vector<9x1xf32>
    %877 = vector.broadcast %876 : vector<9x1xf32> to vector<9x9xf32>
    %878 = arith.subf %874, %877 : vector<9x9xf32>
    %879 = math.exp %878 : vector<9x9xf32>
    %cst_340 = arith.constant dense<0.000000e+00> : vector<9xf32>
    %880 = vector.multi_reduction <add>, %879, %cst_340 [1] : vector<9x9xf32> to vector<9xf32>
    %881 = vector.shape_cast %880 : vector<9xf32> to vector<9x1xf32>
    %882 = tpu.reciprocal %881 {approx = true} : vector<9x1xf32> -> vector<9x1xf32>
    %883 = vector.broadcast %882 : vector<9x1xf32> to vector<9x9xf32>
    %884 = arith.mulf %879, %883 : vector<9x9xf32>
    %885 = vector.broadcast %49 : vector<1x64xf32> to vector<9x64xf32>
    %886 = arith.mulf %848, %885 : vector<9x64xf32>
    %887 = arith.truncf %886 : vector<9x64xf32> to vector<9x64xbf16>
    %888 = arith.truncf %884 : vector<9x9xf32> to vector<9x9xbf16>
    %cst_341 = arith.constant dense<0.000000e+00> : vector<9x64xf32>
    %889 = tpu.matmul %888, %887, %cst_341 {dimension_numbers = #tpu.dot_dimension_numbers<[1], [0], [0], [1], [0, 0, 1, 1], [], []>} : vector<9x9xbf16>, vector<9x64xbf16>, vector<9x64xf32> -> vector<9x64xf32>
    %890 = arith.addf %870, %889 : vector<9x64xf32>
    %891 = vector.broadcast %57 : vector<1x64xf32> to vector<9x64xf32>
    %892 = arith.mulf %836, %891 : vector<9x64xf32>
    %893 = arith.truncf %892 : vector<9x64xf32> to vector<9x64xbf16>
    %cst_342 = arith.constant dense<0.000000e+00> : vector<9x9xf32>
    %894 = tpu.matmul %893, %849, %cst_342 {dimension_numbers = #tpu.dot_dimension_numbers<[1], [1], [0], [0], [0, 0, 1, 0], [], []>} : vector<9x64xbf16>, vector<9x64xbf16>, vector<9x9xf32> -> vector<9x9xf32>
    %cst_343 = arith.constant dense<0xFF800000> : vector<9xf32>
    %895 = vector.multi_reduction <maximumf>, %894, %cst_343 [1] : vector<9x9xf32> to vector<9xf32>
    %896 = vector.shape_cast %895 : vector<9xf32> to vector<9x1xf32>
    %897 = vector.broadcast %896 : vector<9x1xf32> to vector<9x9xf32>
    %898 = arith.subf %894, %897 : vector<9x9xf32>
    %899 = math.exp %898 : vector<9x9xf32>
    %cst_344 = arith.constant dense<0.000000e+00> : vector<9xf32>
    %900 = vector.multi_reduction <add>, %899, %cst_344 [1] : vector<9x9xf32> to vector<9xf32>
    %901 = vector.shape_cast %900 : vector<9xf32> to vector<9x1xf32>
    %902 = tpu.reciprocal %901 {approx = true} : vector<9x1xf32> -> vector<9x1xf32>
    %903 = vector.broadcast %902 : vector<9x1xf32> to vector<9x9xf32>
    %904 = arith.mulf %899, %903 : vector<9x9xf32>
    %905 = vector.broadcast %57 : vector<1x64xf32> to vector<9x64xf32>
    %906 = arith.mulf %848, %905 : vector<9x64xf32>
    %907 = arith.truncf %906 : vector<9x64xf32> to vector<9x64xbf16>
    %908 = arith.truncf %904 : vector<9x9xf32> to vector<9x9xbf16>
    %cst_345 = arith.constant dense<0.000000e+00> : vector<9x64xf32>
    %909 = tpu.matmul %908, %907, %cst_345 {dimension_numbers = #tpu.dot_dimension_numbers<[1], [0], [0], [1], [0, 0, 1, 1], [], []>} : vector<9x9xbf16>, vector<9x64xbf16>, vector<9x64xf32> -> vector<9x64xf32>
    %910 = arith.addf %890, %909 : vector<9x64xf32>
    %911 = vector.broadcast %65 : vector<1x64xf32> to vector<9x64xf32>
    %912 = arith.mulf %836, %911 : vector<9x64xf32>
    %913 = arith.truncf %912 : vector<9x64xf32> to vector<9x64xbf16>
    %cst_346 = arith.constant dense<0.000000e+00> : vector<9x9xf32>
    %914 = tpu.matmul %913, %849, %cst_346 {dimension_numbers = #tpu.dot_dimension_numbers<[1], [1], [0], [0], [0, 0, 1, 0], [], []>} : vector<9x64xbf16>, vector<9x64xbf16>, vector<9x9xf32> -> vector<9x9xf32>
    %cst_347 = arith.constant dense<0xFF800000> : vector<9xf32>
    %915 = vector.multi_reduction <maximumf>, %914, %cst_347 [1] : vector<9x9xf32> to vector<9xf32>
    %916 = vector.shape_cast %915 : vector<9xf32> to vector<9x1xf32>
    %917 = vector.broadcast %916 : vector<9x1xf32> to vector<9x9xf32>
    %918 = arith.subf %914, %917 : vector<9x9xf32>
    %919 = math.exp %918 : vector<9x9xf32>
    %cst_348 = arith.constant dense<0.000000e+00> : vector<9xf32>
    %920 = vector.multi_reduction <add>, %919, %cst_348 [1] : vector<9x9xf32> to vector<9xf32>
    %921 = vector.shape_cast %920 : vector<9xf32> to vector<9x1xf32>
    %922 = tpu.reciprocal %921 {approx = true} : vector<9x1xf32> -> vector<9x1xf32>
    %923 = vector.broadcast %922 : vector<9x1xf32> to vector<9x9xf32>
    %924 = arith.mulf %919, %923 : vector<9x9xf32>
    %925 = vector.broadcast %65 : vector<1x64xf32> to vector<9x64xf32>
    %926 = arith.mulf %848, %925 : vector<9x64xf32>
    %927 = arith.truncf %926 : vector<9x64xf32> to vector<9x64xbf16>
    %928 = arith.truncf %924 : vector<9x9xf32> to vector<9x9xbf16>
    %cst_349 = arith.constant dense<0.000000e+00> : vector<9x64xf32>
    %929 = tpu.matmul %928, %927, %cst_349 {dimension_numbers = #tpu.dot_dimension_numbers<[1], [0], [0], [1], [0, 0, 1, 1], [], []>} : vector<9x9xbf16>, vector<9x64xbf16>, vector<9x64xf32> -> vector<9x64xf32>
    %930 = arith.addf %910, %929 : vector<9x64xf32>
    %931 = arith.truncf %930 : vector<9x64xf32> to vector<9x64xbf16>
    %c19 = arith.constant 19 : index
    %c0_350 = arith.constant 0 : index
    %c0_351 = arith.constant 0 : index
    %932 = vector.load %arg8[%c19, %c0_350, %c0_351] : memref<20x64x64xbf16, #tpu.memory_space<vmem>>, vector<1x64x64xbf16>
    %933 = vector.shape_cast %932 : vector<1x64x64xbf16> to vector<64x64xbf16>
    %cst_352 = arith.constant dense<0.000000e+00> : vector<9x64xf32>
    %934 = tpu.matmul %931, %933, %cst_352 {dimension_numbers = #tpu.dot_dimension_numbers<[1], [0], [0], [1], [0, 0, 1, 1], [], []>} : vector<9x64xbf16>, vector<64x64xbf16>, vector<9x64xf32> -> vector<9x64xf32>
    %c19_353 = arith.constant 19 : index
    %c0_354 = arith.constant 0 : index
    %935 = vector.load %arg9[%c19_353, %c0_354] : memref<45x64xf32, #tpu.memory_space<vmem>>, vector<1x64xf32>
    %936 = vector.broadcast %935 : vector<1x64xf32> to vector<9x64xf32>
    %937 = arith.addf %934, %936 : vector<9x64xf32>
    %938 = arith.addf %829, %937 : vector<9x64xf32>
    %c24 = arith.constant 24 : index
    %c0_355 = arith.constant 0 : index
    %939 = vector.load %arg9[%c24, %c0_355] : memref<45x64xf32, #tpu.memory_space<vmem>>, vector<1x64xf32>
    %c29 = arith.constant 29 : index
    %c0_356 = arith.constant 0 : index
    %940 = vector.load %arg9[%c29, %c0_356] : memref<45x64xf32, #tpu.memory_space<vmem>>, vector<1x64xf32>
    %cst_357 = arith.constant dense<0.000000e+00> : vector<9xf32>
    %941 = vector.multi_reduction <add>, %938, %cst_357 [1] : vector<9x64xf32> to vector<9xf32>
    %942 = vector.shape_cast %941 : vector<9xf32> to vector<9x1xf32>
    %cst_358 = arith.constant 6.400000e+01 : f32
    %943 = vector.broadcast %cst_358 : f32 to vector<9x1xf32>
    %944 = arith.divf %942, %943 : vector<9x1xf32>
    %945 = vector.broadcast %944 : vector<9x1xf32> to vector<9x64xf32>
    %946 = arith.subf %938, %945 : vector<9x64xf32>
    %947 = arith.mulf %946, %946 : vector<9x64xf32>
    %cst_359 = arith.constant dense<0.000000e+00> : vector<9xf32>
    %948 = vector.multi_reduction <add>, %947, %cst_359 [1] : vector<9x64xf32> to vector<9xf32>
    %949 = vector.shape_cast %948 : vector<9xf32> to vector<9x1xf32>
    %cst_360 = arith.constant 6.400000e+01 : f32
    %950 = vector.broadcast %cst_360 : f32 to vector<9x1xf32>
    %951 = arith.divf %949, %950 : vector<9x1xf32>
    %952 = vector.broadcast %944 : vector<9x1xf32> to vector<9x64xf32>
    %953 = arith.subf %938, %952 : vector<9x64xf32>
    %cst_361 = arith.constant 9.99999974E-6 : f32
    %954 = vector.broadcast %cst_361 : f32 to vector<9x1xf32>
    %955 = arith.addf %951, %954 : vector<9x1xf32>
    %956 = math.rsqrt %955 : vector<9x1xf32>
    %957 = vector.broadcast %956 : vector<9x1xf32> to vector<9x64xf32>
    %958 = arith.mulf %953, %957 : vector<9x64xf32>
    %959 = vector.broadcast %939 : vector<1x64xf32> to vector<9x64xf32>
    %960 = arith.mulf %958, %959 : vector<9x64xf32>
    %961 = vector.broadcast %940 : vector<1x64xf32> to vector<9x64xf32>
    %962 = arith.addf %960, %961 : vector<9x64xf32>
    %963 = arith.truncf %962 : vector<9x64xf32> to vector<9x64xbf16>
    %c4_362 = arith.constant 4 : index
    %c0_363 = arith.constant 0 : index
    %c0_364 = arith.constant 0 : index
    %964 = vector.load %arg10[%c4_362, %c0_363, %c0_364] : memref<5x64x128xbf16, #tpu.memory_space<vmem>>, vector<1x64x128xbf16>
    %965 = vector.shape_cast %964 : vector<1x64x128xbf16> to vector<64x128xbf16>
    %cst_365 = arith.constant dense<0.000000e+00> : vector<9x128xf32>
    %966 = tpu.matmul %963, %965, %cst_365 {dimension_numbers = #tpu.dot_dimension_numbers<[1], [0], [0], [1], [0, 0, 1, 1], [], []>} : vector<9x64xbf16>, vector<64x128xbf16>, vector<9x128xf32> -> vector<9x128xf32>
    %c4_366 = arith.constant 4 : index
    %c0_367 = arith.constant 0 : index
    %967 = vector.load %arg11[%c4_366, %c0_367] : memref<5x128xf32, #tpu.memory_space<vmem>>, vector<1x128xf32>
    %968 = vector.broadcast %967 : vector<1x128xf32> to vector<9x128xf32>
    %969 = arith.addf %966, %968 : vector<9x128xf32>
    %cst_368 = arith.constant 5.000000e-01 : f32
    %970 = vector.broadcast %cst_368 : f32 to vector<9x128xf32>
    %971 = arith.mulf %970, %969 : vector<9x128xf32>
    %cst_369 = arith.constant 4.471500e-02 : f32
    %972 = vector.broadcast %cst_369 : f32 to vector<9x128xf32>
    %973 = arith.mulf %972, %969 : vector<9x128xf32>
    %974 = arith.mulf %973, %969 : vector<9x128xf32>
    %975 = arith.mulf %974, %969 : vector<9x128xf32>
    %976 = arith.addf %969, %975 : vector<9x128xf32>
    %cst_370 = arith.constant 0.797884583 : f32
    %977 = vector.broadcast %cst_370 : f32 to vector<9x128xf32>
    %978 = arith.mulf %977, %976 : vector<9x128xf32>
    %979 = math.tanh %978 : vector<9x128xf32>
    %cst_371 = arith.constant 1.000000e+00 : f32
    %980 = vector.broadcast %cst_371 : f32 to vector<9x128xf32>
    %981 = arith.addf %980, %979 : vector<9x128xf32>
    %982 = arith.mulf %971, %981 : vector<9x128xf32>
    %983 = arith.truncf %982 : vector<9x128xf32> to vector<9x128xbf16>
    %c4_372 = arith.constant 4 : index
    %c0_373 = arith.constant 0 : index
    %c0_374 = arith.constant 0 : index
    %984 = vector.load %arg12[%c4_372, %c0_373, %c0_374] : memref<5x128x64xbf16, #tpu.memory_space<vmem>>, vector<1x128x64xbf16>
    %985 = vector.shape_cast %984 : vector<1x128x64xbf16> to vector<128x64xbf16>
    %cst_375 = arith.constant dense<0.000000e+00> : vector<9x64xf32>
    %986 = tpu.matmul %983, %985, %cst_375 {dimension_numbers = #tpu.dot_dimension_numbers<[1], [0], [0], [1], [0, 0, 1, 1], [], []>} : vector<9x128xbf16>, vector<128x64xbf16>, vector<9x64xf32> -> vector<9x64xf32>
    %c34 = arith.constant 34 : index
    %c0_376 = arith.constant 0 : index
    %987 = vector.load %arg9[%c34, %c0_376] : memref<45x64xf32, #tpu.memory_space<vmem>>, vector<1x64xf32>
    %988 = vector.broadcast %987 : vector<1x64xf32> to vector<9x64xf32>
    %989 = arith.addf %986, %988 : vector<9x64xf32>
    %990 = arith.addf %962, %989 : vector<9x64xf32>
    %c39 = arith.constant 39 : index
    %c0_377 = arith.constant 0 : index
    %991 = vector.load %arg9[%c39, %c0_377] : memref<45x64xf32, #tpu.memory_space<vmem>>, vector<1x64xf32>
    %c44 = arith.constant 44 : index
    %c0_378 = arith.constant 0 : index
    %992 = vector.load %arg9[%c44, %c0_378] : memref<45x64xf32, #tpu.memory_space<vmem>>, vector<1x64xf32>
    %cst_379 = arith.constant dense<0.000000e+00> : vector<9xf32>
    %993 = vector.multi_reduction <add>, %990, %cst_379 [1] : vector<9x64xf32> to vector<9xf32>
    %994 = vector.shape_cast %993 : vector<9xf32> to vector<9x1xf32>
    %cst_380 = arith.constant 6.400000e+01 : f32
    %995 = vector.broadcast %cst_380 : f32 to vector<9x1xf32>
    %996 = arith.divf %994, %995 : vector<9x1xf32>
    %997 = vector.broadcast %996 : vector<9x1xf32> to vector<9x64xf32>
    %998 = arith.subf %990, %997 : vector<9x64xf32>
    %999 = arith.mulf %998, %998 : vector<9x64xf32>
    %cst_381 = arith.constant dense<0.000000e+00> : vector<9xf32>
    %1000 = vector.multi_reduction <add>, %999, %cst_381 [1] : vector<9x64xf32> to vector<9xf32>
    %1001 = vector.shape_cast %1000 : vector<9xf32> to vector<9x1xf32>
    %cst_382 = arith.constant 6.400000e+01 : f32
    %1002 = vector.broadcast %cst_382 : f32 to vector<9x1xf32>
    %1003 = arith.divf %1001, %1002 : vector<9x1xf32>
    %1004 = vector.broadcast %996 : vector<9x1xf32> to vector<9x64xf32>
    %1005 = arith.subf %990, %1004 : vector<9x64xf32>
    %cst_383 = arith.constant 9.99999974E-6 : f32
    %1006 = vector.broadcast %cst_383 : f32 to vector<9x1xf32>
    %1007 = arith.addf %1003, %1006 : vector<9x1xf32>
    %1008 = math.rsqrt %1007 : vector<9x1xf32>
    %1009 = vector.broadcast %1008 : vector<9x1xf32> to vector<9x64xf32>
    %1010 = arith.mulf %1005, %1009 : vector<9x64xf32>
    %1011 = vector.broadcast %991 : vector<1x64xf32> to vector<9x64xf32>
    %1012 = arith.mulf %1010, %1011 : vector<9x64xf32>
    %1013 = vector.broadcast %992 : vector<1x64xf32> to vector<9x64xf32>
    %1014 = arith.addf %1012, %1013 : vector<9x64xf32>
    %1015 = vector.extract_strided_slice %1014 {offsets = [0, 0], sizes = [4, 64], strides = [1, 1]} : vector<9x64xf32> to vector<4x64xf32>
    %c0_384 = arith.constant 0 : index
    %c0_385 = arith.constant 0 : index
    %c0_386 = arith.constant 0 : index
    %1016 = vector.load %arg15[%c0_384, %c0_385, %c0_386] : memref<1x4x64xf32, #tpu.memory_space<vmem>>, vector<1x4x64xf32>
    %1017 = vector.shape_cast %1016 : vector<1x4x64xf32> to vector<4x64xf32>
    %1018 = vector.shape_cast %1015 : vector<4x64xf32> to vector<1x4x64xf32>
    tpu.vector_store %arg15[%c0_384, %c0_385, %c0_386], %1018 {strides = array<i32>} : memref<1x4x64xf32, #tpu.memory_space<vmem>>, vector<1x4x64xf32>,
    return
  }
  func.func @transform_0(%arg0: i32) -> (i32, i32) {
    %c0_i32 = arith.constant 0 : i32
    %c0_i32_0 = arith.constant 0 : i32
    %c0_i32_1 = arith.constant 0 : i32
    return %c0_i32, %c0_i32_0 : i32, i32
  }
  func.func @transform_1(%arg0: i32) -> (i32, i32, i32) {
    %c0_i32 = arith.constant 0 : i32
    %c0_i32_0 = arith.constant 0 : i32
    %c0_i32_1 = arith.constant 0 : i32
    return %arg0, %c0_i32, %c0_i32_0 : i32, i32, i32
  }
  func.func @transform_2(%arg0: i32) -> (i32, i32, i32) {
    %c0_i32 = arith.constant 0 : i32
    %c0_i32_0 = arith.constant 0 : i32
    %c0_i32_1 = arith.constant 0 : i32
    return %arg0, %c0_i32, %c0_i32_0 : i32, i32, i32
  }
  func.func @transform_3(%arg0: i32) -> (i32, i32) {
    %c0_i32 = arith.constant 0 : i32
    %c0_i32_0 = arith.constant 0 : i32
    %c0_i32_1 = arith.constant 0 : i32
    return %c0_i32, %c0_i32_0 : i32, i32
  }
  func.func @transform_4(%arg0: i32) -> (i32, i32) {
    %c0_i32 = arith.constant 0 : i32
    %c0_i32_0 = arith.constant 0 : i32
    %c0_i32_1 = arith.constant 0 : i32
    return %c0_i32, %c0_i32_0 : i32, i32
  }
  func.func @transform_5(%arg0: i32) -> (i32, i32) {
    %c0_i32 = arith.constant 0 : i32
    %c0_i32_0 = arith.constant 0 : i32
    %c0_i32_1 = arith.constant 0 : i32
    return %c0_i32, %c0_i32_0 : i32, i32
  }
  func.func @transform_6(%arg0: i32) -> (i32, i32) {
    %c0_i32 = arith.constant 0 : i32
    %c0_i32_0 = arith.constant 0 : i32
    %c0_i32_1 = arith.constant 0 : i32
    return %c0_i32, %c0_i32_0 : i32, i32
  }
  func.func @transform_7(%arg0: i32) -> (i32, i32, i32) {
    %c0_i32 = arith.constant 0 : i32
    %c0_i32_0 = arith.constant 0 : i32
    %c0_i32_1 = arith.constant 0 : i32
    %c0_i32_2 = arith.constant 0 : i32
    return %c0_i32, %c0_i32_0, %c0_i32_1 : i32, i32, i32
  }
  func.func @transform_8(%arg0: i32) -> (i32, i32) {
    %c0_i32 = arith.constant 0 : i32
    %c0_i32_0 = arith.constant 0 : i32
    %c0_i32_1 = arith.constant 0 : i32
    return %c0_i32, %c0_i32_0 : i32, i32
  }
  func.func @transform_9(%arg0: i32) -> (i32, i32, i32) {
    %c0_i32 = arith.constant 0 : i32
    %c0_i32_0 = arith.constant 0 : i32
    %c0_i32_1 = arith.constant 0 : i32
    %c0_i32_2 = arith.constant 0 : i32
    return %c0_i32, %c0_i32_0, %c0_i32_1 : i32, i32, i32
  }
  func.func @transform_10(%arg0: i32) -> (i32, i32) {
    %c0_i32 = arith.constant 0 : i32
    %c0_i32_0 = arith.constant 0 : i32
    %c0_i32_1 = arith.constant 0 : i32
    return %c0_i32, %c0_i32_0 : i32, i32
  }
  func.func @transform_11(%arg0: i32) -> (i32, i32, i32) {
    %c0_i32 = arith.constant 0 : i32
    %c0_i32_0 = arith.constant 0 : i32
    %c0_i32_1 = arith.constant 0 : i32
    %c0_i32_2 = arith.constant 0 : i32
    return %c0_i32, %c0_i32_0, %c0_i32_1 : i32, i32, i32
  }
  func.func @transform_12(%arg0: i32) -> (i32, i32, i32) {
    %c0_i32 = arith.constant 0 : i32
    %c0_i32_0 = arith.constant 0 : i32
    %c0_i32_1 = arith.constant 0 : i32
    %c0_i32_2 = arith.constant 0 : i32
    return %c0_i32, %c0_i32_0, %c0_i32_1 : i32, i32, i32
  }
  func.func @transform_13(%arg0: i32) -> (i32, i32) {
    %c0_i32 = arith.constant 0 : i32
    %c0_i32_0 = arith.constant 0 : i32
    %c0_i32_1 = arith.constant 0 : i32
    return %c0_i32, %c0_i32_0 : i32, i32
  }
  func.func @transform_14(%arg0: i32) -> (i32, i32, i32) {
    %c0_i32 = arith.constant 0 : i32
    %c0_i32_0 = arith.constant 0 : i32
    %c0_i32_1 = arith.constant 0 : i32
    return %arg0, %c0_i32, %c0_i32_0 : i32, i32, i32
  }
}

</mosaic_0001>

<bundles_post_ra>
// kernel: denoiser_forward.1
= control target key start
LH: loop header
LB: loop body
LE: loop exit
PB: predicated region body
PF: predicated region fallthrough
CT: control target
= control target key end

     0   :  { %s10471_s0 = inlined_call_operand.vmem [shape: f32[1,64], index: 0, kind: input, shape index: {}]   ;;  %s10472_s1 = inlined_call_operand.vmem [shape: f32[2,4,64], index: 1, kind: input, shape index: {}]   ;;  %s10473_s2 = inlined_call_operand.vmem [shape: f32[2,4,16], index: 2, kind: input, shape index: {}]   ;;  %s10474_s3 = inlined_call_operand.vmem [shape: f32[9,64], index: 3, kind: input, shape index: {}]   ;;  %s10475_s4 = inlined_call_operand.vmem [shape: bf16[16,64], index: 4, kind: input, shape index: {}]   ;;  %s10476_s5 = inlined_call_operand.vmem [shape: f32[2,64], index: 5, kind: input, shape index: {}]   ;;  %s10477_s6 = inlined_call_operand.vmem [shape: bf16[64,64], index: 6, kind: input, shape index: {}]   ;;  %s10478_s7 = inlined_call_operand.vmem [shape: bf16[20,64,64], index: 7, kind: input, shape index: {}]   ;;  %s10479_s8 = inlined_call_operand.vmem [shape: f32[45,64], index: 8, kind: input, shape index: {}]   ;;  %s10480_s9 = inlined_call_operand.vmem [shape: bf16[5,64,128], index: 9, kind: input, shape index: {}]   ;;  %s10481_s10 = inlined_call_operand.vmem [shape: f32[5,128], index: 10, kind: input, shape index: {}]   ;;  %s10482_s11 = inlined_call_operand.vmem [shape: bf16[5,128,64], index: 11, kind: input, shape index: {}]   ;;  %s10483_s12 = inlined_call_operand.vmem [shape: bf16[4,64,64], index: 12, kind: input, shape index: {}]   ;;  %s10484_s13 = inlined_call_operand.vmem [shape: f32[2,64], index: 13, kind: input, shape index: {}]   ;;  %s10485_s14 = inlined_call_operand.hbm [shape: f32[2,4,64], index: 14, kind: output, shape index: {}]  }
   0x1   :  { %10487 = sst [smem:[#allocation7_spill]] %s10471_s0 }
   0x2   :  { %10488 = sst [smem:[#allocation8_spill]] %s10473_s2 }
   0x3   :  { %10489 = sst [smem:[#allocation9_spill]] %s10475_s4 }
   0x4   :  { %19 = vsyncpa [#allocation3], 0 }
   0x5   :  { %21 = vsyncpa [#allocation3 + $0x1], 0  ;;  %s8720_s29 = smov 0   ;;  %s8722_s30 = smov 0  }
   0x6   :  { %s8724_s15 = smov 0   ;;  %s8726_s16 = smov 0  }
   0x7 LB: > { %10490 = sst [smem:[#allocation5_spill]] %s8635_s15  ;;  %s8741_s17 = sadd.s32 4294967295, %s8639_s16   ;;  %s8639_s16 = sphi %s8726_s16, %s10501_s16   ;;  %s8635_s15 = sphi %s8724_s15, %s10498_s15   ;;  %s8631_s30 = sphi %s8722_s30, %s10500_s30   ;;  %s8627_s29 = sphi %s8720_s29, %s10499_s29  }
   0x8   : > { %s6603_s18 = sadd.s32 4294967294, %s8639_s16   ;;  %s8745_s19 = sadd.s32 1, %s8639_s16  }
   0x9   : > { %s338_s20 = sadd.s32 1, %s8635_s15  ;;  %s335_s21 = ssub.s32 %s8639_s16, %s8745_s19 }
   0xa   : > { %p348_p0 = scmp.ne.s32.totalorder %s8635_s15, %s8631_s30  ;;  %p336_p1 = scmp.eq.s32.totalorder %s335_s21, 0 }
   0xb   : > { %p349_p2 = scmp.eq.s32.totalorder %s8741_s17, 1  ;;  %p354_p3 = scmp.ne.s32.totalorder %s8631_s30, %s8627_s29 }
   0xc   : > { %p355_p4 = scmp.eq.s32.totalorder %s6603_s18, 1  ;;  %p6606_p7 = scmp.ge.s32.totalorder %s8639_s16, 1 }
   0xd   : > { %s8756_s22 = scalar_select %p336_p1, %s8635_s15, %s338_s20  }
   0xe   : > { %p8758_p5 = por %p349_p2, %p348_p0  ;;  %p8762_p6 = por %p355_p4, %p354_p3 }
   0xf   : > { %10491 = sst [smem:[#allocation6_spill]] %s8756_s22  ;;  %p423_p8 = scmp.lt.s32.totalorder %s8639_s16, 3 }
  0x11   : > { %p424_p9 = pnand %p6606_p7, %p423_p8 }
  0x12   : > { %s10494_s4 = sld [smem:[#allocation9_spill]] (!%p424_p9)  ;;  %p472_p10 = scmp.lt.s32.totalorder (!%p424_p9), %s8741_s17, 1 }
  0x13   : > { %427 = sbr.rel (%p424_p9) target bundleno = 14430 (0x385e), region = 76  ;;  %s10495_s2 = sld [smem:[#allocation8_spill]] (!%p424_p9) }
  0x14   : > { %s10496_s0 = sld [smem:[#allocation7_spill]] (!%p424_p9)  ;;  %s8644_s18 = smov (!%p424_p9), [#allocation2]  }
  0x15   : > { %s8583_s20 = sshll.u32 (!%p424_p9), %s8644_s18, 4  ;;  %s8584_s20 = int_to_ptr.vmem [resolvable:$false] %s8583_s20 }
  0x18   : > { %v8198_v0 = vld [vmem:[%s10494_s4] sm:$0xff]   ;;  %v8641_v1 = vmov 0.0   ;;  %vm8642_vm0 = vmmov 0   ;;  %s8777_s27 = scalar_select %p472_p10, %s8741_s17, 1  ;;  %vm496_vm1 = vcmask 130048   ;;  %v8199_v4 = vld [vmem:[%s10477_s6 + $0x18] sm:$0xff]   ;;  %v650_v52 = vlaneseq }
  0x19   : > { %7450 = vmatprep.subr.bf16.mxu0 %v8641_v1  ;;  %7480 = vmatprep.subr.bf16.mxu1 %v8641_v1  ;;  %v8200_v5 = vld [vmem:[%s10477_s6 + $0x10] sm:$0xff]   ;;  %v8201_v6 = vld [vmem:[%s10477_s6 + $0x8] sm:$0xff]   ;;  %v8202_v7 = vld [vmem:[%s10477_s6] sm:$0xff]   ;;  %vm587_vm2 = vcmask 523264   ;;  %vm644_vm3 = vcmask 1043456   ;;  %vm646_vm4 = vcmask 1044480  }
  0x1a   : > { %7451 = vmatpush3.bf16.msra.mxu0 %v8198_v0  ;;  %7452 = vmatprep.mubr.msk.bf16.mxu0 %vm8642_vm0, %v8641_v1  ;;  %s6608_s28 = sshll.u32 %s8777_s27, 2  ;;  %v8204_v8 = vld [vmem:[%s10478_s7 + $0xb8] sm:$0xff]   ;;  %v8206_v9 = vld [vmem:[%s10478_s7 + $0xb0] sm:$0xff]   ;;  %v6610_v10 = vld [vmem:[%s10476_s5] ss:$0 sm:$0xff]  ;;  %v651_v53 = vand.u32 127, %v650_v52 }
  0x1b   : > { %7456 = vmatprep.subr.bf16.mxu0 %v8641_v1  ;;  %7488 = vmatprep.mubr.msk.bf16.mxu1 %vm8642_vm0, %v8641_v1  ;;  %s479_s21 = scalar_lea.vmem %s10495_s2, %s6608_s28  ;;  %v8203_v25 = vld [vmem:[%s10478_s7 + $0x18] sm:$0xff]   ;;  %v8205_v27 = vld [vmem:[%s10478_s7 + $0x10] sm:$0xff]   ;;  %v8207_v28 = vld [vmem:[%s10478_s7 + $0x8] sm:$0xff]   ;;  %s475_s26 = scalar_lea.vmem %s10472_s1, %s6608_s28  ;;  %vm959_vm15 = vcmask 72704  }
  0x1c   : > { %v481_v2 = vld [vmem:[%s479_s21] sm:$0xf]  ;;  %7481 = vmatpush3.bf16.msra.mxu1 %v8204_v8  ;;  %v8208_v29 = vld [vmem:[%s10478_s7 + $0xa8] sm:$0xff]   ;;  %v8211_v47 = vld [vmem:[%s10478_s7 + $0x158] sm:$0xff]   ;;  %vm660_vm5 = vcmp.ge.s32.totalorder %v651_v53, 32  ;;  %vm661_vm6 = vcmp.lt.s32.totalorder %v651_v53, 48 }
  0x1d   : > { %v482_v3 = vpack.c.bf16 %v481_v2, %v481_v2  ;;  %7482 = vmatprep.subr.bf16.mxu1 %v8641_v1  ;;  %v8209_v30 = vld [vmem:[%s10478_s7] sm:$0xff]   ;;  %v633_v37 = vld [vmem:[%s10474_s3 + $0x8] sm:$0x1]  ;;  %v8212_v49 = vld [vmem:[%s10478_s7 + $0x150] sm:$0xff]   ;;  %vm664_vm7 = vcmp.ge.s32.totalorder %v651_v53, 48  ;;  %vm665_vm8 = vcmp.lt.s32.totalorder %v651_v53, 64 }
  0x1e   : > { %v8210_v31 = vld [vmem:[%s10478_s7 + $0xa0] sm:$0xff]   ;;  %v8213_v50 = vld [vmem:[%s10478_s7 + $0x148] sm:$0xff]   ;;  %vm662_vm9 = vmand %vm660_vm5, %vm661_vm6  ;;  %vm656_vm11 = vcmp.ge.s32.totalorder %v651_v53, 16  ;;  %vm657_vm12 = vcmp.lt.s32.totalorder %v651_v53, 32  ;;  %vm653_vm13 = vcmp.lt.s32.totalorder %v651_v53, 16  ;;  %s469_s2 = sand.u32 1, %s8631_s30  }
  0x1f   : > { %7453 = vmatmul.mubr.msk.bf16.vlgmr.msra.gmra.mxu0 %vm496_vm1, %v482_v3  ;;  %v6613_v32 = vld [vmem:[%s10476_s5 + $0x1] ss:$0 sm:$0xff]  ;;  %v6619_v33 = vld [vmem:[%s10496_s0] ss:$0 sm:$0xff]  ;;  %vm666_vm10 = vmand %vm664_vm7, %vm665_vm8  ;;  %v8901_v61 = vsel %vm662_vm9, 1.0, %v8641_v1  ;;  %vm963_vm1 = vcmask 65536  }
  0x20   : > { %7464 = vmatprep.mubr.msk.bf16.mxu0 %vm8642_vm0, %v8641_v1  ;;  %7457 = vmatpush3.bf16.msra.mxu0 %v8199_v4  ;;  %v634_v34 = vld [vmem:[%s475_s26] sm:$0xf]  ;;  %v6634_v60 = vld [vmem:[%s10479_s8 + $0x5] ss:$0 sm:$0xff]  ;;  %v8904_v62 = vsel %vm666_vm10, 1.0, %v8641_v1  ;;  %vm658_vm14 = vmand %vm656_vm11, %vm657_vm12  ;;  %s6607_s15 = sshll.u32 %s469_s2, 2 }
  0x21   : > { %7458 = vmatprep.subr.bf16.mxu0 %v8641_v1  ;;  %7483 = vmatpush3.bf16.msra.mxu1 %v8206_v9  ;;  %v645_v38 = vsel %vm644_vm3, %v634_v34, %v6619_v33  ;;  %v632_v40 = vld [vmem:[%s10474_s3] sm:$0xff]  ;;  %s7170_s21 = sshll.u32 %s8741_s17, 6  ;;  %s471_s4 = scalar_lea.vmem [#allocation2], %s6607_s15 }
  0x22   : > { %7484 = vmatprep.subr.bf16.mxu1 %v8641_v1  ;;  %v8214_v51 = vld [vmem:[%s10478_s7 + $0x140] sm:$0xff]   ;;  %s6532_s22 = sshll.u32 %s471_s4, 4  ;;  %s6530_s0 = scalar_lea.hbm %s10485_s14, %s7170_s21  ;;  %s6533_s22 = int_to_ptr.vmem [resolvable:$true] %s6532_s22 }
  0x23   : > { %v6620_v54 = vld [vmem:[%s10479_s8] ss:$0 sm:$0xff]  ;;  %s6519_s25 = scalar_lea.sflag [#allocation3], %s469_s2  ;;  %s8579_s26 = scalar_lea.vmem %s6533_s22, 64 }
  0x24   : > { %7459 = vmatpush3.bf16.msra.mxu0 %v8200_v5  ;;  %p8580_p11 = scmp.ne.s32.totalorder %s6533_s22, %s8579_s26  ;;  %s8585_s17 = scalar_lea.vmem %s8584_s20, 128 }
  0x25   : > { %7460 = vmatprep.subr.bf16.mxu0 %v8641_v1  ;;  %7485 = vmatpush3.bf16.msra.mxu1 %v8208_v29  ;;  %p8586_p0 = scmp.lt.s32.totalorder %s6533_s22, %s8584_s20  ;;  %p8587_p1 = scmp.lt.s32.totalorder %s8585_s17, %s8579_s26 }
  0x26   : > { %7486 = vmatprep.subr.bf16.mxu1 %v8641_v1  ;;  %p8581_p12 = pnand %p8580_p11, %p8758_p5 }
  0x27   : > { %p8588_p2 = por %p8587_p1, %p8586_p0 }
  0x28   : > { %7461 = vmatpush3.bf16.msra.mxu0 %v8201_v6  ;;  %p8582_p13 = pneg %p8581_p12 }
  0x29   : > { %7462 = vmatprep.subr.bf16.mxu0 %v8641_v1  ;;  %7487 = vmatpush3.bf16.msra.mxu1 %v8210_v31 }
  0x2a   : > { %7504 = vmatprep.subr.bf16.mxu1 %v8641_v1  ;;  %p8589_p3 = pnand %p8588_p2, %p8582_p13 }
  0x2c   : > { %7463 = vmatpush3.bf16.msra.mxu0 %v8202_v7 }
  0x2d   : > { %7468 = vmatprep.subr.bf16.mxu0 %v8641_v1 }
  0xdf   : > { %v534_v11 = vpop.f32.mrf.mxu0 }
  0xe0   : > { %v535_v12 = vadd.f32 %v6610_v10, %v534_v11 }
  0xe1   : > { %v7454_v13 = vpop.f32.mrf.mxu0 }
  0xe2   : > { %v541_v14 = vmul.f32 0.044715, %v535_v12  ;;  %v540_v22 = vmul.f32 0.5, %v535_v12 }
  0xe3   : > { %v537_v15 = vpop.f32.mrf.mxu0 }
  0xe4   : > { %v542_v16 = vmul.f32 %v541_v14, %v535_v12  ;;  %v8926_v15 = vsel %vm653_vm13, 1.0, %v8641_v1 }
  0xe5   : > { %v7455_v17 = vpop.f32.mrf.mxu0 }
  0xe6   : > { %v543_v18 = vmul.f32 %v542_v16, %v535_v12  ;;  %v8929_v16 = vsel %vm658_vm14, 1.0, %v8641_v1 }
  0xe8   : > { %v544_v19 = vadd.f32 %v543_v18, %v535_v12 }
  0xea   : > { %v545_v20 = vmul.f32 0.7978846, %v544_v19 }
  0xec   : > { %8359 = vtanh.f32 %v545_v20 }
  0xf9   : > { %v8360_v21 = vpop.eup %8359 }
  0xfa   : > { %v547_v23 = vadd.f32 1.0, %v8360_v21  ;;  %v6648_v21 = vld [vmem:[%s10479_s8 + $0xa] ss:$0 sm:$0xff] }
  0xfc   : > { %v548_v24 = vmul.f32 %v547_v23, %v540_v22 }
  0xfe   : > { %v549_v26 = vpack.c.bf16 %v548_v24, %v548_v24 }
 0x100   : > { %7465 = vmatmul.mubr.msk.bf16.vlgmr.msra.gmra.mxu0 %vm587_vm2, %v549_v26 }
 0x101   : > { %7469 = vmatpush3.bf16.msra.mxu0 %v8203_v25  ;;  %7476 = vmatprep.mubr.msk.bf16.mxu0 %vm8642_vm0, %v8641_v1 }
 0x102   : > { %7470 = vmatprep.subr.bf16.mxu0 %v8641_v1 }
 0x105   : > { %7471 = vmatpush3.bf16.msra.mxu0 %v8205_v27 }
 0x106   : > { %7472 = vmatprep.subr.bf16.mxu0 %v8641_v1 }
 0x109   : > { %7473 = vmatpush3.bf16.msra.mxu0 %v8207_v28  ;;  %v8643_v28 = vmov 65535  }
 0x10a   : > { %7474 = vmatprep.subr.bf16.mxu0 %v8641_v1  ;;  %v1063_v29 = vsel %vm644_vm3, 4294967295, %v8643_v28  ;;  %vm1490_vm3 = vcmask 516096  }
 0x10d   : > { %7475 = vmatpush3.bf16.msra.mxu0 %v8209_v30 }
 0x10e   : > { %7492 = vmatprep.subr.bf16.mxu0 %v8641_v1 }
 0x1c0   : > { %v625_v35 = vpop.f32.mrf.mxu0 }
 0x1c1   : > { %v626_v36 = vadd.f32 %v6613_v32, %v625_v35 }
 0x1c2   : > { %v7466_v39 = vpop.f32.mrf.mxu0 }
 0x1c3   : > { %v642_v41 = vrot.slane %v626_v36, 3 }
 0x1c4   : > { %v628_v42 = vpop.f32.mrf.mxu0 }
 0x1c5   : > { %v647_v43 = vsel %vm646_vm4, %v645_v38, %v642_v41  ;;  %v8863_v44 = vadd.f32 %v642_v41, %v633_v37 }
 0x1c6   : > { %v8865_v45 = vadd.f32 %v647_v43, %v632_v40  ;;  %v7467_v46 = vpop.f32.mrf.mxu0  ;;  %v8966_v40 = vsel %vm646_vm4, %v1063_v29, 0 }
 0x1c8   : > { %v668_v48 = vpack.c.bf16 %v8863_v44, %v8865_v45 }
 0x1ca   : > { %7477 = vmatmul.mubr.msk.bf16.vlgmr.msra.gmra.mxu0 %vm587_vm2, %v668_v48  ;;  %7489 = vmatmul.mubr.msk.bf16.vlgmr.msra.gmra.mxu1 %vm587_vm2, %v668_v48 }
 0x1cb   : > { %7493 = vmatpush3.bf16.msra.mxu0 %v8211_v47  ;;  %7500 = vmatprep.mubr.msk.bf16.mxu0 %vm8642_vm0, %v8641_v1 }
 0x1cc   : > { %7494 = vmatprep.subr.bf16.mxu0 %v8641_v1  ;;  %7506 = vmatprep.mubr.msk.bf16.mxu1 %vm8642_vm0, %v8641_v1 }
 0x1cf   : > { %7495 = vmatpush3.bf16.msra.mxu0 %v8212_v49 }
 0x1d0   : > { %7496 = vmatprep.subr.bf16.mxu0 %v8641_v1 }
 0x1d3   : > { %7497 = vmatpush3.bf16.msra.mxu0 %v8213_v50 }
 0x1d4   : > { %7498 = vmatprep.subr.bf16.mxu0 %v8641_v1 }
 0x1d7   : > { %7499 = vmatpush3.bf16.msra.mxu0 %v8214_v51 }
 0x1d8   : > { %7510 = vmatprep.subr.bf16.mxu0 %v8641_v1 }
 0x1da   : > { %7501 = vmatmul.mubr.msk.bf16.vlgmr.msra.gmra.mxu0 %vm587_vm2, %v668_v48 }
 0x1db   : > { %7512 = vmatprep.mubr.msk.bf16.mxu0 %vm8642_vm0, %v8641_v1 }
 0x28a   : > { %v743_v55 = vpop.f32.mrf.mxu0  ;;  %v822_v56 = vpop.f32.mrf.mxu1 }
 0x28b   : > { %v744_v59 = vadd.f32 %v6620_v54, %v743_v55  ;;  %v823_v4 = vadd.f32 %v6634_v60, %v822_v56 }
 0x28c   : > { %v7478_v57 = vpop.f32.mrf.mxu0  ;;  %v7490_v58 = vpop.f32.mrf.mxu1 }
 0x28d   : > { %v8907_v7 = vmul.f32 %v744_v59, %v8901_v61  ;;  %v8910_v8 = vmul.f32 %v744_v59, %v8904_v62  ;;  %v909_v19 = vmul.f32 %v744_v59, %v8926_v15  ;;  %v987_v20 = vmul.f32 %v744_v59, %v8929_v16 }
 0x28e   : > { %v746_v63 = vpop.f32.mrf.mxu0  ;;  %v825_v0 = vpop.f32.mrf.mxu1 }
 0x28f   : > { %v747_v2 = vadd.f32 %v6620_v54, %v746_v63  ;;  %v826_v3 = vadd.f32 %v6634_v60, %v825_v0 }
 0x290   : > { %v7479_v5 = vpop.f32.mrf.mxu0  ;;  %v7491_v6 = vpop.f32.mrf.mxu1 }
 0x291   : > { %v8913_v9 = vmul.f32 %v747_v2, %v8901_v61  ;;  %v8916_v10 = vmul.f32 %v747_v2, %v8904_v62  ;;  %v908_v11 = vpack.c.bf16 %v826_v3, %v823_v4  ;;  %v910_v17 = vmul.f32 %v747_v2, %v8926_v15 }
 0x292   : > { %v988_v18 = vmul.f32 %v747_v2, %v8929_v16 }
 0x293   : > { %v1158_v12 = vpack.c.bf16 %v8913_v9, %v8907_v7  ;;  %v1280_v13 = vpack.c.bf16 %v8916_v10, %v8910_v8  ;;  %v8923_v14 = vsel %vm587_vm2, %v908_v11, 0  ;;  %v911_v22 = vpack.c.bf16 %v910_v17, %v909_v19 }
 0x294   : > { %7505 = vmatpush3.bf16.xpose.msra.mxu1 %v8923_v14  ;;  %7511 = vmatpush3.bf16.xpose.msra.mxu0 %v8923_v14  ;;  %v989_v23 = vpack.c.bf16 %v988_v18, %v987_v20 }
 0x295   : > { %7516 = vmatprep.subr.bf16.mxu1 %v8641_v1  ;;  %7522 = vmatprep.subr.bf16.mxu0 %v8641_v1 }
 0x29a   : > { %v901_v24 = vpop.f32.mrf.mxu0 }
 0x29b   : > { %v902_v25 = vadd.f32 %v6648_v21, %v901_v24  ;;  %7507 = vmatmul.mubr.msk.bf16.vlgmr.msra.gmra.mxu1 %vm587_vm2, %v911_v22  ;;  %7513 = vmatmul.mubr.msk.bf16.vlgmr.msra.gmra.mxu0 %vm587_vm2, %v989_v23 }
 0x29c   : > { %v7502_v26 = vpop.f32.mrf.mxu0  ;;  %7518 = vmatprep.mubr.msk.bf16.mxu1 %vm8642_vm0, %v8641_v1  ;;  %7524 = vmatprep.mubr.msk.bf16.mxu0 %vm8642_vm0, %v8641_v1 }
 0x29d   : > { %v983_v31 = vmul.f32 %v902_v25, %v8926_v15  ;;  %v1056_v32 = vmul.f32 %v902_v25, %v8929_v16  ;;  %v8952_v33 = vmul.f32 %v902_v25, %v8901_v61  ;;  %v8955_v34 = vmul.f32 %v902_v25, %v8904_v62 }
 0x29e   : > { %v904_v27 = vpop.f32.mrf.mxu0 }
 0x29f   : > { %v905_v30 = vadd.f32 %v6648_v21, %v904_v27 }
 0x2a0   : > { %v7503_v35 = vpop.f32.mrf.mxu0 }
 0x2a1   : > { %v984_v36 = vmul.f32 %v905_v30, %v8926_v15  ;;  %v1057_v37 = vmul.f32 %v905_v30, %v8929_v16  ;;  %v8960_v38 = vmul.f32 %v905_v30, %v8901_v61  ;;  %v8963_v39 = vmul.f32 %v905_v30, %v8904_v62 }
 0x2a3   : > { %v1058_v41 = vpack.c.bf16 %v1057_v37, %v1056_v32  ;;  %v985_v42 = vpack.c.bf16 %v984_v36, %v983_v31  ;;  %v1227_v43 = vpack.c.bf16 %v8960_v38, %v8952_v33  ;;  %v1349_v46 = vpack.c.bf16 %v8963_v39, %v8955_v34 }
 0x2a5   : > { %v1066_v47 = vand.u32 %v8966_v40, %v1058_v41  ;;  %v1113_v48 = vand.u32 %v8966_v40, %v985_v42 }
 0x2a7   : > { %7517 = vmatpush3.bf16.msra.mxu1 %v1066_v47  ;;  %7523 = vmatpush3.bf16.msra.mxu0 %v1113_v48 }
 0x2a8   : > { %7528 = vmatprep.subr.bf16.mxu1 %v8641_v1  ;;  %7534 = vmatprep.subr.bf16.mxu0 %v8641_v1 }
 0x35b   : > { %v952_v49 = vpop.f32.mrf.mxu1  ;;  %v1027_v50 = vpop.f32.mrf.mxu0 }
 0x35c   : > { %v1034_v51 = vsel %vm959_vm15, %v1027_v50, -inf  ;;  %v960_v59 = vsel %vm959_vm15, %v952_v49, -inf }
 0x35d   : > { %v7508_v52 = vpop.f32.mrf.mxu1  ;;  %1035 = vmax.xlane.f32.xlu0 %v1034_v51  ;;  %v7514_v53 = vpop.f32.mrf.mxu0 }
 0x35f   : > { %v955_v54 = vpop.f32.mrf.mxu1  ;;  %v1030_v55 = vpop.f32.mrf.mxu0 }
 0x360   : > { %v1037_v56 = vsel %vm963_vm1, %v1030_v55, -inf  ;;  %v964_v18 = vsel %vm963_vm1, %v955_v54, -inf }
 0x361   : > { %v7509_v57 = vpop.f32.mrf.mxu1  ;;  %1038 = vmax.xlane.f32.xlu0 %v1037_v56  ;;  %v7515_v58 = vpop.f32.mrf.mxu0 }
 0x365   : > { %961 = vmax.xlane.f32.xlu0 %v960_v59 }
 0x3e6   : > { %v1036_v60 = vpop.xlane.xlu0 %1035 }
 0x3e7   : > { %v1040_v63 = vsub.f32 %v1027_v50, %v1036_v60 }
 0x3e9   : > { %v1042_v0 = vmul.f32 1.442695, %v1040_v63 }
 0x3ea   : > { %v1039_v2 = vpop.xlane.xlu0 %1038 }
 0x3eb   : > { %8361 = vpow2.f32 %v1042_v0  ;;  %v1041_v3 = vsub.f32 %v1030_v55, %v1039_v2 }
 0x3ed   : > { %v1044_v4 = vmul.f32 1.442695, %v1041_v3 }
 0x3ee   : > { %v962_v26 = vpop.xlane.xlu0 %961 }
 0x3ef   : > { %8363 = vpow2.f32 %v1044_v4  ;;  %v967_v27 = vsub.f32 %v952_v49, %v962_v26 }
 0x3f8   : > { %v8362_v5 = vpop.eup %8361 }
 0x3f9   : > { %v1046_v6 = vsel %vm959_vm15, %v8362_v5, 0.0 }
 0x3fa   : > { %1047 = vadd.xlane.f32.xlu1 %v1046_v6 }
 0x3fc   : > { %v8364_v11 = vpop.eup %8363 }
 0x3fd   : > { %v1049_v17 = vsel %vm963_vm1, %v8364_v11, 0.0 }
 0x3fe   : > { %1050 = vadd.xlane.f32.xlu1 %v1049_v17 }
 0x402   : > { %965 = vmax.xlane.f32.xlu1 %v964_v18 }
 0x483   : > { %v1048_v19 = vpop.xlane.xlu1 %1047 }
 0x484   : > { %8365 = vrcp.f32 %v1048_v19 }
 0x487   : > { %v1051_v20 = vpop.xlane.xlu1 %1050 }
 0x488   : > { %8367 = vrcp.f32 %v1051_v20 }
 0x48b   : > { %v966_v7 = vpop.xlane.xlu1 %965 }
 0x491   : > { %v8366_v21 = vpop.eup %8365 }
 0x492   : > { %v1054_v23 = vmul.f32 %v8366_v21, %v8362_v5 }
 0x495   : > { %v8368_v22 = vpop.eup %8367 }
 0x496   : > { %v1055_v24 = vmul.f32 %v8368_v22, %v8364_v11 }
 0x498   : > { %v1059_v25 = vpack.c.bf16 %v1055_v24, %v1054_v23 }
 0x49a   : > { %7519 = vmatmul.mubr.msk.bf16.vlgmr.msra.gmra.mxu1 %vm959_vm15, %v1059_v25 }
 0x49b   : > { %7529 = vmatpush3.bf16.xpose.msra.mxu1 %v8923_v14  ;;  %7530 = vmatprep.mubr.msk.bf16.mxu1 %vm8642_vm0, %v8641_v1 }
 0x49c   : > { %7540 = vmatprep.subr.bf16.mxu1 %v8641_v1 }
 0x4a2   : > { %7531 = vmatmul.mubr.msk.bf16.vlgmr.msra.gmra.mxu1 %vm587_vm2, %v1158_v12  ;;  %v969_v12 = vmul.f32 1.442695, %v967_v27 }
 0x4a3   : > { %7541 = vmatpush3.bf16.xpose.msra.mxu1 %v8923_v14  ;;  %7542 = vmatprep.mubr.msk.bf16.mxu1 %vm8642_vm0, %v8641_v1  ;;  %v968_v14 = vsub.f32 %v955_v54, %v966_v7 }
 0x4a4   : > { %7552 = vmatprep.subr.bf16.mxu1 %v8641_v1  ;;  %8369 = vpow2.f32 %v969_v12  ;;  %v1233_v12 = vand.u32 %v1227_v43, %v8966_v40 }
 0x4a5   : > { %v971_v30 = vmul.f32 1.442695, %v968_v14 }
 0x4a7   : > { %8371 = vpow2.f32 %v971_v30 }
 0x4aa   : > { %7543 = vmatmul.mubr.msk.bf16.vlgmr.msra.gmra.mxu1 %vm587_vm2, %v1280_v13 }
 0x4ab   : > { %7560 = vmatprep.mubr.msk.bf16.mxu1 %vm8642_vm0, %v8641_v1 }
 0x4b1   : > { %v8370_v42 = vpop.eup %8369 }
 0x4b2   : > { %v973_v50 = vsel %vm959_vm15, %v8370_v42, 0.0 }
 0x4b4   : > { %v8372_v51 = vpop.eup %8371 }
 0x4b5   : > { %v976_v53 = vsel %vm963_vm1, %v8372_v51, 0.0 }
 0x55a   : > { %v9001_v9 = vpop.f32.mrf.mxu1 }
 0x55c   : > { %v7520_v28 = vpop.f32.mrf.mxu1 }
 0x55e   : > { %v9003_v29 = vpop.f32.mrf.mxu1 }
 0x560   : > { %v7521_v31 = vpop.f32.mrf.mxu1 }
 0x562   : > { %v1196_v32 = vpop.f32.mrf.mxu1 }
 0x563   : > { %v1203_v8 = vsel %vm959_vm15, %v1196_v32, -inf }
 0x564   : > { %1204 = vmax.xlane.f32.xlu0 %v1203_v8  ;;  %v7532_v10 = vpop.f32.mrf.mxu1 }
 0x565   : > { %v1355_v10 = vand.u32 %v1349_v46, %v8966_v40 }
 0x566   : > { %v1199_v13 = vpop.f32.mrf.mxu1 }
 0x567   : > { %v1206_v35 = vsel %vm963_vm1, %v1199_v13, -inf }
 0x568   : > { %1207 = vmax.xlane.f32.xlu1 %v1206_v35  ;;  %v7533_v36 = vpop.f32.mrf.mxu1 }
 0x56a   : > { %v1318_v37 = vpop.f32.mrf.mxu1 }
 0x56b   : > { %v1325_v41 = vsel %vm959_vm15, %v1318_v37, -inf }
 0x56c   : > { %1326 = vmax.xlane.f32.xlu0 %v1325_v41  ;;  %v7544_v47 = vpop.f32.mrf.mxu1 }
 0x56d   : > { %v8215_v47 = vld [vmem:[%s10478_s7 + $0x1f8] sm:$0xff]  }
 0x56e   : > { %v1321_v48 = vpop.f32.mrf.mxu1  ;;  %7553 = vmatpush3.bf16.msra.mxu1 %v8215_v47 }
 0x56f   : > { %v1328_v49 = vsel %vm963_vm1, %v1321_v48, -inf  ;;  %7554 = vmatprep.subr.bf16.mxu1 %v8641_v1 }
 0x570   : > { %1329 = vmax.xlane.f32.xlu1 %v1328_v49  ;;  %v7545_v52 = vpop.f32.mrf.mxu1  ;;  %974 = vadd.xlane.f32.xlu0 %v973_v50  ;;  %v8217_v49 = vld [vmem:[%s10478_s7 + $0x1e8] sm:$0xff]   ;;  %v8218_v50 = vld [vmem:[%s10478_s7 + $0x1e0] sm:$0xff]  }
 0x574   : > { %977 = vadd.xlane.f32.xlu1 %v976_v53 }
 0x5ed   : > { %v1205_v54 = vpop.xlane.xlu0 %1204 }
 0x5ee   : > { %v1209_v55 = vsub.f32 %v1196_v32, %v1205_v54 }
 0x5f0   : > { %v1211_v56 = vmul.f32 1.442695, %v1209_v55 }
 0x5f1   : > { %v1208_v57 = vpop.xlane.xlu1 %1207 }
 0x5f2   : > { %8373 = vpow2.f32 %v1211_v56  ;;  %v1210_v58 = vsub.f32 %v1199_v13, %v1208_v57 }
 0x5f4   : > { %v1213_v59 = vmul.f32 1.442695, %v1210_v58 }
 0x5f5   : > { %v1327_v60 = vpop.xlane.xlu0 %1326 }
 0x5f6   : > { %8375 = vpow2.f32 %v1213_v59  ;;  %v1331_v63 = vsub.f32 %v1318_v37, %v1327_v60 }
 0x5f8   : > { %v1333_v0 = vmul.f32 1.442695, %v1331_v63 }
 0x5f9   : > { %v1330_v2 = vpop.xlane.xlu1 %1329  ;;  %v975_v4 = vpop.xlane.xlu0 %974 }
 0x5fa   : > { %8377 = vpow2.f32 %v1333_v0  ;;  %v1332_v3 = vsub.f32 %v1321_v48, %v1330_v2  ;;  %v8216_v48 = vld [vmem:[%s10478_s7 + $0x1f0] sm:$0xff]  }
 0x5fb   : > { %8379 = vrcp.f32 %v975_v4  ;;  %7555 = vmatpush3.bf16.msra.mxu1 %v8216_v48 }
 0x5fc   : > { %v1335_v5 = vmul.f32 1.442695, %v1332_v3  ;;  %7556 = vmatprep.subr.bf16.mxu1 %v8641_v1 }
 0x5fd   : > { %v978_v6 = vpop.xlane.xlu1 %977 }
 0x5fe   : > { %8381 = vpow2.f32 %v1335_v5  ;;  %v6670_v5 = vld [vmem:[%s10479_s8 + $0xf] ss:$0 sm:$0xff] }
 0x5ff   : > { %v8374_v11 = vpop.eup %8373  ;;  %8383 = vrcp.f32 %v978_v6  ;;  %7557 = vmatpush3.bf16.msra.mxu1 %v8217_v49 }
 0x600   : > { %v1215_v17 = vsel %vm959_vm15, %v8374_v11, 0.0  ;;  %7558 = vmatprep.subr.bf16.mxu1 %v8641_v1 }
 0x601   : > { %1216 = vadd.xlane.f32.xlu0 %v1215_v17 }
 0x603   : > { %v8376_v18 = vpop.eup %8375  ;;  %7559 = vmatpush3.bf16.msra.mxu1 %v8218_v50  ;;  %v8223_v50 = vld [vmem:[%s10482_s11 + $0x38] sm:$0xff]  }
 0x604   : > { %v1218_v19 = vsel %vm963_vm1, %v8376_v18, 0.0  ;;  %7576 = vmatprep.subr.bf16.mxu1 %v8641_v1 }
 0x605   : > { %1219 = vadd.xlane.f32.xlu1 %v1218_v19 }
 0x607   : > { %v8378_v20 = vpop.eup %8377 }
 0x608   : > { %v1337_v21 = vsel %vm959_vm15, %v8378_v20, 0.0  ;;  %v8380_v22 = vpop.eup %8379 }
 0x609   : > { %1338 = vadd.xlane.f32.xlu0 %v1337_v21  ;;  %v981_v26 = vmul.f32 %v8380_v22, %v8370_v42 }
 0x60b   : > { %v8382_v23 = vpop.eup %8381 }
 0x60c   : > { %v8384_v24 = vpop.eup %8383  ;;  %v1340_v25 = vsel %vm963_vm1, %v8382_v23, 0.0 }
 0x60d   : > { %1341 = vadd.xlane.f32.xlu1 %v1340_v25  ;;  %v982_v27 = vmul.f32 %v8384_v24, %v8372_v51 }
 0x60f   : > { %v986_v7 = vpack.c.bf16 %v982_v27, %v981_v26 }
 0x611   : > { %7525 = vmatmul.mubr.msk.bf16.vlgmr.msra.gmra.mxu0 %vm959_vm15, %v986_v7 }
 0x612   : > { %7535 = vmatpush3.bf16.msra.mxu0 %v1233_v12  ;;  %7536 = vmatprep.mubr.msk.bf16.mxu0 %vm8642_vm0, %v8641_v1 }
 0x613   : > { %7546 = vmatprep.subr.bf16.mxu0 %v8641_v1 }
 0x68a   : > { %v1217_v14 = vpop.xlane.xlu0 %1216 }
 0x68b   : > { %8385 = vrcp.f32 %v1217_v14 }
 0x68e   : > { %v1220_v28 = vpop.xlane.xlu1 %1219 }
 0x68f   : > { %8387 = vrcp.f32 %v1220_v28 }
 0x692   : > { %v1339_v30 = vpop.xlane.xlu0 %1338 }
 0x693   : > { %8389 = vrcp.f32 %v1339_v30  ;;  %v8220_v30 = vld [vmem:[%s10480_s9 + $0x10] sm:$0xff]  }
 0x696   : > { %v1342_v31 = vpop.xlane.xlu1 %1341 }
 0x697   : > { %8391 = vrcp.f32 %v1342_v31  ;;  %v8221_v31 = vld [vmem:[%s10480_s9 + $0x8] sm:$0xff]  }
 0x698   : > { %v8386_v32 = vpop.eup %8385 }
 0x699   : > { %v1223_v33 = vmul.f32 %v8386_v32, %v8374_v11  ;;  %v8222_v32 = vld [vmem:[%s10480_s9] sm:$0xff]  }
 0x69c   : > { %v8388_v8 = vpop.eup %8387 }
 0x69d   : > { %v1224_v38 = vmul.f32 %v8388_v8, %v8376_v18 }
 0x69f   : > { %v1228_v43 = vpack.c.bf16 %v1224_v38, %v1223_v33 }
 0x6a0   : > { %v8390_v13 = vpop.eup %8389 }
 0x6a1   : > { %7537 = vmatmul.mubr.msk.bf16.vlgmr.msra.gmra.mxu0 %vm959_vm15, %v1228_v43  ;;  %v1345_v36 = vmul.f32 %v8390_v13, %v8378_v20 }
 0x6a2   : > { %7547 = vmatpush3.bf16.msra.mxu0 %v1355_v10  ;;  %7548 = vmatprep.mubr.msk.bf16.mxu0 %vm8642_vm0, %v8641_v1 }
 0x6a3   : > { %7564 = vmatprep.subr.bf16.mxu0 %v8641_v1 }
 0x6a4   : > { %v8392_v35 = vpop.eup %8391 }
 0x6a5   : > { %v1346_v37 = vmul.f32 %v8392_v35, %v8382_v23 }
 0x6a7   : > { %v1350_v41 = vpack.c.bf16 %v1346_v37, %v1345_v36  ;;  %v6676_v37 = vld [vmem:[%s10479_s8 + $0x14] ss:$0 sm:$0xff] }
 0x6a9   : > { %7549 = vmatmul.mubr.msk.bf16.vlgmr.msra.gmra.mxu0 %vm959_vm15, %v1350_v41 }
 0x6aa   : > { %7572 = vmatprep.mubr.msk.bf16.mxu0 %vm8642_vm0, %v8641_v1 }
 0x6d1   : > { %v1149_v34 = vpop.f32.mrf.mxu0 }
 0x6d2   : > { %v1150_v56 = vadd.f32 %v1149_v34, %v9001_v9 }
 0x6d3   : > { %v7526_v39 = vpop.f32.mrf.mxu0 }
 0x6d5   : > { %v1152_v46 = vpop.f32.mrf.mxu0 }
 0x6d6   : > { %v1153_v57 = vadd.f32 %v1152_v46, %v9003_v29  ;;  %v6677_v46 = vld [vmem:[%s10479_s8 + $0x19] ss:$0 sm:$0xff] }
 0x6d7   : > { %v7527_v42 = vpop.f32.mrf.mxu0 }
 0x761   : > { %v1269_v51 = vpop.f32.mrf.mxu0 }
 0x762   : > { %v1276_v59 = vadd.f32 %v1269_v51, %v1150_v56  ;;  %v8224_v51 = vld [vmem:[%s10482_s11 + $0x30] sm:$0xff]   ;;  %v8229_v56 = vld [vmem:[%s10482_s11 + $0x8] sm:$0xff]  }
 0x763   : > { %v7538_v52 = vpop.f32.mrf.mxu0 }
 0x764   : > { %v8225_v52 = vld [vmem:[%s10482_s11 + $0x28] sm:$0xff]  }
 0x765   : > { %v1272_v53 = vpop.f32.mrf.mxu0 }
 0x766   : > { %v1277_v60 = vadd.f32 %v1272_v53, %v1153_v57  ;;  %v8226_v53 = vld [vmem:[%s10482_s11 + $0x20] sm:$0xff]  }
 0x767   : > { %v7539_v54 = vpop.f32.mrf.mxu0  ;;  %v8230_v57 = vld [vmem:[%s10482_s11] sm:$0xff]  }
 0x768   : > { %v8227_v54 = vld [vmem:[%s10482_s11 + $0x18] sm:$0xff]  }
 0x769   : > { %v1391_v55 = vpop.f32.mrf.mxu0 }
 0x76a   : > { %v1398_v0 = vadd.f32 %v1391_v55, %v1276_v59  ;;  %v8228_v55 = vld [vmem:[%s10482_s11 + $0x10] sm:$0xff]  }
 0x76b   : > { %v7550_v58 = vpop.f32.mrf.mxu0 }
 0x76c   : > { %v6678_v58 = vld [vmem:[%s10481_s10] ss:$0 sm:$0xff] }
 0x76d   : > { %v1394_v63 = vpop.f32.mrf.mxu0 }
 0x76e   : > { %v1399_v2 = vadd.f32 %v1394_v63, %v1277_v60 }
 0x76f   : > { %v7551_v3 = vpop.f32.mrf.mxu0 }
 0x770   : > { %v1400_v4 = vpack.c.bf16 %v1399_v2, %v1398_v0 }
 0x772   : > { %7561 = vmatmul.mubr.msk.bf16.vlgmr.msra.gmra.mxu1 %vm587_vm2, %v1400_v4 }
 0x773   : > { %7592 = vmatprep.mubr.msk.bf16.mxu1 %vm8642_vm0, %v8641_v1  ;;  %7577 = vmatpush3.bf16.msra.mxu1 %v8223_v50  ;;  %v8234_v50 = vld [vmem:[%s10478_s7 + $0x170] sm:$0xff]  }
 0x774   : > { %7578 = vmatprep.subr.bf16.mxu1 %v8641_v1 }
 0x777   : > { %7579 = vmatpush3.bf16.msra.mxu1 %v8224_v51  ;;  %v8235_v51 = vld [vmem:[%s10478_s7 + $0x28] sm:$0xff]  }
 0x778   : > { %7580 = vmatprep.subr.bf16.mxu1 %v8641_v1 }
 0x77b   : > { %7581 = vmatpush3.bf16.msra.mxu1 %v8225_v52  ;;  %v8236_v52 = vld [vmem:[%s10478_s7 + $0x168] sm:$0xff]  }
 0x77c   : > { %7582 = vmatprep.subr.bf16.mxu1 %v8641_v1 }
 0x77f   : > { %7583 = vmatpush3.bf16.msra.mxu1 %v8226_v53  ;;  %v8237_v53 = vld [vmem:[%s10478_s7 + $0x20] sm:$0xff]  }
 0x780   : > { %7584 = vmatprep.subr.bf16.mxu1 %v8641_v1 }
 0x783   : > { %7585 = vmatpush3.bf16.msra.mxu1 %v8227_v54  ;;  %v8238_v54 = vld [vmem:[%s10478_s7 + $0x160] sm:$0xff]  }
 0x784   : > { %7586 = vmatprep.subr.bf16.mxu1 %v8641_v1 }
 0x787   : > { %7587 = vmatpush3.bf16.msra.mxu1 %v8228_v55 }
 0x788   : > { %7588 = vmatprep.subr.bf16.mxu1 %v8641_v1 }
 0x78b   : > { %7589 = vmatpush3.bf16.msra.mxu1 %v8229_v56 }
 0x78c   : > { %7590 = vmatprep.subr.bf16.mxu1 %v8641_v1 }
 0x78f   : > { %7591 = vmatpush3.bf16.msra.mxu1 %v8230_v57 }
 0x790   : > { %7620 = vmatprep.subr.bf16.mxu1 %v8641_v1 }
 0x832   : > { %v1476_v9 = vpop.f32.mrf.mxu1 }
 0x833   : > { %v1477_v6 = vadd.f32 %v6670_v5, %v1476_v9 }
 0x834   : > { %v7562_v29 = vpop.f32.mrf.mxu1 }
 0x835   : > { %v1483_v11 = vadd.f32 %v1477_v6, %v8865_v45 }
 0x836   : > { %v1479_v17 = vpop.f32.mrf.mxu1 }
 0x837   : > { %v1480_v18 = vadd.f32 %v6670_v5, %v1479_v17  ;;  %v1487_v19 = vsel %vm587_vm2, %v1483_v11, 0.0 }
 0x838   : > { %1488 = vadd.xlane.f32.xlu0 %v1487_v19  ;;  %v7563_v20 = vpop.f32.mrf.mxu1 }
 0x839   : > { %v1484_v21 = vadd.f32 %v1480_v18, %v8863_v44  ;;  %v8219_v44 = vld [vmem:[%s10480_s9 + $0x18] sm:$0xff]  }
 0x83a   : > { %7565 = vmatpush3.bf16.msra.mxu0 %v8219_v44 }
 0x83b   : > { %v1491_v22 = vsel %vm1490_vm3, %v1484_v21, 0.0  ;;  %7566 = vmatprep.subr.bf16.mxu0 %v8641_v1 }
 0x83c   : > { %1492 = vadd.xlane.f32.xlu1 %v1491_v22 }
 0x83e   : > { %7567 = vmatpush3.bf16.msra.mxu0 %v8220_v30 }
 0x83f   : > { %7568 = vmatprep.subr.bf16.mxu0 %v8641_v1 }
 0x842   : > { %7569 = vmatpush3.bf16.msra.mxu0 %v8221_v31 }
 0x843   : > { %7570 = vmatprep.subr.bf16.mxu0 %v8641_v1 }
 0x846   : > { %7571 = vmatpush3.bf16.msra.mxu0 %v8222_v32 }
 0x847   : > { %7596 = vmatprep.subr.bf16.mxu0 %v8641_v1 }
 0x8c1   : > { %v1489_v23 = vpop.xlane.xlu0 %1488 }
 0x8c2   : > { %v1495_v24 = vmul.f32 0.015625, %v1489_v23 }
 0x8c4   : > { %v1497_v25 = vsub.f32 %v1483_v11, %v1495_v24 }
 0x8c5   : > { %v1493_v26 = vpop.xlane.xlu1 %1492 }
 0x8c6   : > { %v1496_v27 = vmul.f32 0.015625, %v1493_v26  ;;  %v1499_v7 = vmul.f32 %v1497_v25, %v1497_v25 }
 0x8c8   : > { %v1498_v12 = vsub.f32 %v1484_v21, %v1496_v27  ;;  %v1501_v45 = vsel %vm587_vm2, %v1499_v7, 0.0 }
 0x8c9   : > { %1502 = vadd.xlane.f32.xlu0 %v1501_v45  ;;  %v6684_v45 = vld [vmem:[%s10479_s8 + $0x1e] ss:$0 sm:$0xff] }
 0x8ca   : > { %v1500_v14 = vmul.f32 %v1498_v12, %v1498_v12 }
 0x8cc   : > { %v1504_v28 = vsel %vm1490_vm3, %v1500_v14, 0.0 }
 0x8cd   : > { %1505 = vadd.xlane.f32.xlu1 %v1504_v28 }
 0x952   : > { %v1503_v8 = vpop.xlane.xlu0 %1502 }
 0x953   : > { %v1507_v33 = vmul.f32 0.015625, %v1503_v8 }
 0x955   : > { %v1509_v38 = vadd.f32 1e-05, %v1507_v33 }
 0x956   : > { %v1506_v43 = vpop.xlane.xlu1 %1505 }
 0x957   : > { %8393 = vrsqrt.f32 %v1509_v38  ;;  %v1508_v10 = vmul.f32 0.015625, %v1506_v43 }
 0x959   : > { %v1510_v13 = vadd.f32 1e-05, %v1508_v10 }
 0x95b   : > { %8395 = vrsqrt.f32 %v1510_v13 }
 0x964   : > { %v8394_v35 = vpop.eup %8393 }
 0x965   : > { %v1513_v36 = vmul.f32 %v8394_v35, %v1497_v25 }
 0x967   : > { %v1519_v39 = vmul.f32 %v6676_v37, %v1513_v36 }
 0x968   : > { %v8396_v41 = vpop.eup %8395 }
 0x969   : > { %v1514_v34 = vmul.f32 %v8396_v41, %v1498_v12  ;;  %v9086_v47 = vadd.f32 %v6677_v46, %v1519_v39 }
 0x96b   : > { %v1520_v42 = vmul.f32 %v6676_v37, %v1514_v34 }
 0x96d   : > { %v9088_v48 = vadd.f32 %v6677_v46, %v1520_v42 }
 0x96f   : > { %v1527_v49 = vpack.c.bf16 %v9088_v48, %v9086_v47 }
 0x971   : > { %7573 = vmatmul.mubr.msk.bf16.vlgmr.msra.gmra.mxu0 %vm587_vm2, %v1527_v49  ;;  %v8233_v49 = vld [vmem:[%s10478_s7 + $0x30] sm:$0xff]  }
 0x972   : > { %7604 = vmatprep.mubr.msk.bf16.mxu0 %vm8642_vm0, %v8641_v1 }
 0xa31   : > { %v1602_v59 = vpop.f32.mrf.mxu0 }
 0xa32   : > { %v1603_v60 = vadd.f32 %v6678_v58, %v1602_v59 }
 0xa33   : > { %v7574_v63 = vpop.f32.mrf.mxu0 }
 0xa34   : > { %v1611_v0 = vmul.f32 0.044715, %v1603_v60  ;;  %v1609_v24 = vmul.f32 0.5, %v1603_v60 }
 0xa35   : > { %v1605_v2 = vpop.f32.mrf.mxu0 }
 0xa36   : > { %v1613_v3 = vmul.f32 %v1611_v0, %v1603_v60  ;;  %v1606_v4 = vadd.f32 %v6678_v58, %v1605_v2  ;;  %v6693_v2 = vld [vmem:[%s10479_s8 + $0x23] ss:$0 sm:$0xff] }
 0xa37   : > { %v7575_v5 = vpop.f32.mrf.mxu0 }
 0xa38   : > { %v1615_v9 = vmul.f32 %v1613_v3, %v1603_v60  ;;  %v1612_v6 = vmul.f32 0.044715, %v1606_v4  ;;  %v1610_v25 = vmul.f32 0.5, %v1606_v4 }
 0xa3a   : > { %v1617_v29 = vadd.f32 %v1615_v9, %v1603_v60  ;;  %v1614_v11 = vmul.f32 %v1612_v6, %v1606_v4  ;;  %v6694_v9 = vld [vmem:[%s10479_s8 + $0x28] ss:$0 sm:$0xff] }
 0xa3c   : > { %v1619_v17 = vmul.f32 0.7978846, %v1617_v29  ;;  %v1616_v18 = vmul.f32 %v1614_v11, %v1606_v4 }
 0xa3e   : > { %8397 = vtanh.f32 %v1619_v17  ;;  %v1618_v19 = vadd.f32 %v1616_v18, %v1606_v4  ;;  %v8239_v17 = vld [vmem:[%s10478_s7 + $0xd8] sm:$0xff]  }
 0xa40   : > { %v1620_v20 = vmul.f32 0.7978846, %v1618_v19  ;;  %v8240_v19 = vld [vmem:[%s10478_s7 + $0xd0] sm:$0xff]  }
 0xa42   : > { %8399 = vtanh.f32 %v1620_v20  ;;  %v8241_v20 = vld [vmem:[%s10478_s7 + $0xc8] sm:$0xff]  }
 0xa4b   : > { %v8398_v21 = vpop.eup %8397 }
 0xa4c   : > { %v1623_v22 = vadd.f32 1.0, %v8398_v21  ;;  %v8242_v21 = vld [vmem:[%s10478_s7 + $0xc0] sm:$0xff]  }
 0xa4e   : > { %v1625_v27 = vmul.f32 %v1623_v22, %v1609_v24  ;;  %v6703_v22 = vld [vmem:[%s10479_s8 + $0x1] ss:$0 sm:$0xff]  ;;  %v6731_v24 = vld [vmem:[%s10479_s8 + $0xb] ss:$0 sm:$0xff] }
 0xa4f   : > { %v8400_v23 = vpop.eup %8399 }
 0xa50   : > { %v1624_v26 = vadd.f32 1.0, %v8400_v23 }
 0xa52   : > { %v1626_v7 = vmul.f32 %v1624_v26, %v1610_v25 }
 0xa54   : > { %v1627_v12 = vpack.c.bf16 %v1626_v7, %v1625_v27 }
 0xa56   : > { %7593 = vmatmul.mubr.bf16.vlgmr.msra.gmra.mxu1 %v1627_v12 }
 0xa57   : > { %7628 = vmatprep.mubr.msk.bf16.mxu1 %vm8642_vm0, %v8641_v1 }
 0xb16   : > { %v1731_v14 = vpop.f32.mrf.mxu1 }
 0xb17   : > { %v1732_v28 = vadd.f32 %v6684_v45, %v1731_v14 }
 0xb18   : > { %v7594_v44 = vpop.f32.mrf.mxu1 }
 0xb19   : > { %v1738_v30 = vadd.f32 %v1732_v28, %v9086_v47  ;;  %v8231_v47 = vld [vmem:[%s10478_s7 + $0x38] sm:$0xff]  }
 0xb1a   : > { %v1734_v31 = vpop.f32.mrf.mxu1  ;;  %7597 = vmatpush3.bf16.msra.mxu0 %v8231_v47 }
 0xb1b   : > { %v1735_v32 = vadd.f32 %v6684_v45, %v1734_v31  ;;  %v1742_v8 = vsel %vm587_vm2, %v1738_v30, 0.0  ;;  %7598 = vmatprep.subr.bf16.mxu0 %v8641_v1 }
 0xb1c   : > { %1743 = vadd.xlane.f32.xlu0 %v1742_v8  ;;  %v7595_v33 = vpop.f32.mrf.mxu1 }
 0xb1d   : > { %v1739_v38 = vadd.f32 %v1735_v32, %v9088_v48  ;;  %v8232_v48 = vld [vmem:[%s10478_s7 + $0x178] sm:$0xff]  }
 0xb1e   : > { %7621 = vmatpush3.bf16.msra.mxu1 %v8232_v48  ;;  %7599 = vmatpush3.bf16.msra.mxu0 %v8233_v49  ;;  %v6717_v49 = vld [vmem:[%s10479_s8 + $0x6] ss:$0 sm:$0xff] }
 0xb1f   : > { %v1745_v43 = vsel %vm1490_vm3, %v1739_v38, 0.0  ;;  %7622 = vmatprep.subr.bf16.mxu1 %v8641_v1  ;;  %7600 = vmatprep.subr.bf16.mxu0 %v8641_v1 }
 0xb20   : > { %1746 = vadd.xlane.f32.xlu1 %v1745_v43 }
 0xb22   : > { %7623 = vmatpush3.bf16.msra.mxu1 %v8234_v50  ;;  %7601 = vmatpush3.bf16.msra.mxu0 %v8235_v51 }
 0xb23   : > { %7624 = vmatprep.subr.bf16.mxu1 %v8641_v1  ;;  %7602 = vmatprep.subr.bf16.mxu0 %v8641_v1 }
 0xb26   : > { %7625 = vmatpush3.bf16.msra.mxu1 %v8236_v52  ;;  %7603 = vmatpush3.bf16.msra.mxu0 %v8237_v53 }
 0xb27   : > { %7626 = vmatprep.subr.bf16.mxu1 %v8641_v1  ;;  %7608 = vmatprep.subr.bf16.mxu0 %v8641_v1 }
 0xb2a   : > { %7627 = vmatpush3.bf16.msra.mxu1 %v8238_v54 }
 0xb2b   : > { %7644 = vmatprep.subr.bf16.mxu1 %v8641_v1 }
 0xba5   : > { %v1744_v10 = vpop.xlane.xlu0 %1743 }
 0xba6   : > { %v1748_v13 = vmul.f32 0.015625, %v1744_v10 }
 0xba8   : > { %v1750_v35 = vsub.f32 %v1738_v30, %v1748_v13 }
 0xba9   : > { %v1747_v36 = vpop.xlane.xlu1 %1746 }
 0xbaa   : > { %v1749_v37 = vmul.f32 0.015625, %v1747_v36  ;;  %v1752_v41 = vmul.f32 %v1750_v35, %v1750_v35 }
 0xbac   : > { %v1751_v34 = vsub.f32 %v1739_v38, %v1749_v37  ;;  %v1754_v39 = vsel %vm587_vm2, %v1752_v41, 0.0 }
 0xbad   : > { %1755 = vadd.xlane.f32.xlu0 %v1754_v39 }
 0xbae   : > { %v1753_v46 = vmul.f32 %v1751_v34, %v1751_v34 }
 0xbb0   : > { %v1757_v42 = vsel %vm1490_vm3, %v1753_v46, 0.0 }
 0xbb1   : > { %1758 = vadd.xlane.f32.xlu1 %v1757_v42 }
 0xc36   : > { %v1756_v55 = vpop.xlane.xlu0 %1755 }
 0xc37   : > { %v1760_v56 = vmul.f32 0.015625, %v1756_v55 }
 0xc39   : > { %v1762_v57 = vadd.f32 1e-05, %v1760_v56 }
 0xc3a   : > { %v1759_v58 = vpop.xlane.xlu1 %1758 }
 0xc3b   : > { %8401 = vrsqrt.f32 %v1762_v57  ;;  %v1761_v59 = vmul.f32 0.015625, %v1759_v58 }
 0xc3d   : > { %v1763_v60 = vadd.f32 1e-05, %v1761_v59 }
 0xc3f   : > { %8403 = vrsqrt.f32 %v1763_v60 }
 0xc48   : > { %v8402_v63 = vpop.eup %8401 }
 0xc49   : > { %v1766_v0 = vmul.f32 %v8402_v63, %v1750_v35 }
 0xc4b   : > { %v1772_v5 = vmul.f32 %v6693_v2, %v1766_v0 }
 0xc4c   : > { %v8404_v3 = vpop.eup %8403 }
 0xc4d   : > { %v1767_v4 = vmul.f32 %v8404_v3, %v1751_v34  ;;  %v9179_v29 = vadd.f32 %v6694_v9, %v1772_v5 }
 0xc4f   : > { %v1773_v6 = vmul.f32 %v6693_v2, %v1767_v4 }
 0xc51   : > { %v9181_v11 = vadd.f32 %v6694_v9, %v1773_v6 }
 0xc53   : > { %v9188_v18 = vpack.c.bf16 %v9181_v11, %v9179_v29 }
 0xc55   : > { %7605 = vmatmul.mubr.msk.bf16.vlgmr.msra.gmra.mxu0 %vm587_vm2, %v9188_v18  ;;  %7629 = vmatmul.mubr.msk.bf16.vlgmr.msra.gmra.mxu1 %vm587_vm2, %v9188_v18 }
 0xc56   : > { %7609 = vmatpush3.bf16.msra.mxu0 %v8239_v17  ;;  %7616 = vmatprep.mubr.msk.bf16.mxu0 %vm8642_vm0, %v8641_v1 }
 0xc57   : > { %7610 = vmatprep.subr.bf16.mxu0 %v8641_v1  ;;  %7646 = vmatprep.mubr.msk.bf16.mxu1 %vm8642_vm0, %v8641_v1 }
 0xc5a   : > { %7611 = vmatpush3.bf16.msra.mxu0 %v8240_v19 }
 0xc5b   : > { %7612 = vmatprep.subr.bf16.mxu0 %v8641_v1 }
 0xc5e   : > { %7613 = vmatpush3.bf16.msra.mxu0 %v8241_v20 }
 0xc5f   : > { %7614 = vmatprep.subr.bf16.mxu0 %v8641_v1 }
 0xc62   : > { %7615 = vmatpush3.bf16.msra.mxu0 %v8242_v21 }
 0xc63   : > { %7632 = vmatprep.subr.bf16.mxu0 %v8641_v1 }
 0xc65   : > { %7617 = vmatmul.mubr.msk.bf16.vlgmr.msra.gmra.mxu0 %vm587_vm2, %v9188_v18 }
 0xc66   : > { %7634 = vmatprep.mubr.msk.bf16.mxu0 %vm8642_vm0, %v8641_v1 }
 0xd15   : > { %v1856_v23 = vpop.f32.mrf.mxu0  ;;  %v2014_v25 = vpop.f32.mrf.mxu1 }
 0xd16   : > { %v1857_v26 = vadd.f32 %v6703_v22, %v1856_v23  ;;  %v2015_v12 = vadd.f32 %v6731_v24, %v2014_v25 }
 0xd17   : > { %v7606_v27 = vpop.f32.mrf.mxu0  ;;  %v7630_v7 = vpop.f32.mrf.mxu1 }
 0xd18   : > { %v9222_v30 = vmul.f32 %v1857_v26, %v8901_v61  ;;  %v9225_v31 = vmul.f32 %v1857_v26, %v8904_v62  ;;  %v2167_v33 = vmul.f32 %v2015_v12, %v8929_v16  ;;  %v9229_v38 = vmul.f32 %v2015_v12, %v8901_v61 }
 0xd19   : > { %v1859_v45 = vpop.f32.mrf.mxu0  ;;  %v2017_v14 = vpop.f32.mrf.mxu1  ;;  %v9238_v13 = vmul.f32 %v2015_v12, %v8904_v62  ;;  %v2022_v58 = vmul.f32 %v1857_v26, %v8926_v15  ;;  %v2094_v63 = vmul.f32 %v2015_v12, %v8926_v15  ;;  %v2098_v3 = vmul.f32 %v1857_v26, %v8929_v16 }
 0xd1a   : > { %v1860_v28 = vadd.f32 %v6703_v22, %v1859_v45  ;;  %v2018_v44 = vadd.f32 %v6731_v24, %v2017_v14 }
 0xd1b   : > { %v7607_v32 = vpop.f32.mrf.mxu0  ;;  %v7631_v8 = vpop.f32.mrf.mxu1 }
 0xd1c   : > { %v9232_v43 = vmul.f32 %v1860_v28, %v8901_v61  ;;  %v9235_v10 = vmul.f32 %v1860_v28, %v8904_v62  ;;  %v2168_v35 = vmul.f32 %v2018_v44, %v8929_v16  ;;  %v9242_v36 = vmul.f32 %v2018_v44, %v8901_v61 }
 0xd1d   : > { %v9245_v37 = vmul.f32 %v2018_v44, %v8904_v62  ;;  %v2023_v57 = vmul.f32 %v1860_v28, %v8926_v15  ;;  %v2095_v60 = vmul.f32 %v2018_v44, %v8926_v15  ;;  %v2099_v0 = vmul.f32 %v1860_v28, %v8929_v16 }
 0xd1e   : > { %v2267_v41 = vpack.c.bf16 %v9232_v43, %v9222_v30  ;;  %v2389_v34 = vpack.c.bf16 %v9235_v10, %v9225_v31  ;;  %v2169_v39 = vpack.c.bf16 %v2168_v35, %v2167_v33  ;;  %v2336_v46 = vpack.c.bf16 %v9242_v36, %v9229_v38 }
 0xd1f   : > { %v2458_v42 = vpack.c.bf16 %v9245_v37, %v9238_v13  ;;  %v2024_v59 = vpack.c.bf16 %v2023_v57, %v2022_v58  ;;  %v2096_v2 = vpack.c.bf16 %v2095_v60, %v2094_v63  ;;  %v2100_v4 = vpack.c.bf16 %v2099_v0, %v2098_v3 }
 0xd20   : > { %v2175_v47 = vand.u32 %v2169_v39, %v8966_v40 }
 0xd21   : > { %v2222_v5 = vand.u32 %v2096_v2, %v8966_v40 }
 0xd22   : > { %7645 = vmatpush3.bf16.msra.mxu1 %v2175_v47 }
 0xd23   : > { %7656 = vmatprep.subr.bf16.mxu1 %v8641_v1 }
 0xd25   : > { %v1935_v48 = vpop.f32.mrf.mxu0 }
 0xd26   : > { %v1936_v52 = vadd.f32 %v6717_v49, %v1935_v48 }
 0xd27   : > { %v7618_v50 = vpop.f32.mrf.mxu0 }
 0xd29   : > { %v1938_v51 = vpop.f32.mrf.mxu0 }
 0xd2a   : > { %v1939_v53 = vadd.f32 %v6717_v49, %v1938_v51 }
 0xd2b   : > { %v7619_v54 = vpop.f32.mrf.mxu0 }
 0xd2c   : > { %v2021_v55 = vpack.c.bf16 %v1939_v53, %v1936_v52 }
 0xd2e   : > { %v9261_v56 = vsel %vm587_vm2, %v2021_v55, 0 }
 0xd2f   : > { %7633 = vmatpush3.bf16.xpose.msra.mxu0 %v9261_v56 }
 0xd30   : > { %7638 = vmatprep.subr.bf16.mxu0 %v8641_v1 }
 0xd36   : > { %7635 = vmatmul.mubr.msk.bf16.vlgmr.msra.gmra.mxu0 %vm587_vm2, %v2024_v59 }
 0xd37   : > { %7639 = vmatpush3.bf16.xpose.msra.mxu0 %v9261_v56  ;;  %7640 = vmatprep.mubr.msk.bf16.mxu0 %vm8642_vm0, %v8641_v1 }
 0xd38   : > { %7650 = vmatprep.subr.bf16.mxu0 %v8641_v1 }
 0xd3e   : > { %7641 = vmatmul.mubr.msk.bf16.vlgmr.msra.gmra.mxu0 %vm587_vm2, %v2100_v4 }
 0xd3f   : > { %7651 = vmatpush3.bf16.msra.mxu0 %v2222_v5  ;;  %7652 = vmatprep.mubr.msk.bf16.mxu0 %vm8642_vm0, %v8641_v1 }
 0xd40   : > { %7662 = vmatprep.subr.bf16.mxu0 %v8641_v1 }
 0xdf6   : > { %v2065_v9 = vpop.f32.mrf.mxu0 }
 0xdf7   : > { %v2072_v8 = vsel %vm959_vm15, %v2065_v9, -inf }
 0xdf8   : > { %v7636_v6 = vpop.f32.mrf.mxu0 }
 0xdfa   : > { %v2068_v17 = vpop.f32.mrf.mxu0 }
 0xdfb   : > { %v2075_v35 = vsel %vm963_vm1, %v2068_v17, -inf }
 0xdfc   : > { %v7637_v19 = vpop.f32.mrf.mxu0 }
 0xdfe   : > { %v2138_v20 = vpop.f32.mrf.mxu0 }
 0xdff   : > { %v2145_v21 = vsel %vm959_vm15, %v2138_v20, -inf }
 0xe00   : > { %2146 = vmax.xlane.f32.xlu0 %v2145_v21  ;;  %v7642_v22 = vpop.f32.mrf.mxu0 }
 0xe02   : > { %v2141_v23 = vpop.f32.mrf.mxu0 }
 0xe03   : > { %v2148_v24 = vsel %vm963_vm1, %v2141_v23, -inf }
 0xe04   : > { %2149 = vmax.xlane.f32.xlu1 %v2148_v24  ;;  %v7643_v25 = vpop.f32.mrf.mxu0 }
 0xe89   : > { %v2147_v26 = vpop.xlane.xlu0 %2146 }
 0xe8a   : > { %v2151_v27 = vsub.f32 %v2138_v20, %v2147_v26 }
 0xe8c   : > { %v2153_v7 = vmul.f32 1.442695, %v2151_v27 }
 0xe8d   : > { %v2150_v12 = vpop.xlane.xlu1 %2149 }
 0xe8e   : > { %8405 = vpow2.f32 %v2153_v7  ;;  %v2152_v45 = vsub.f32 %v2141_v23, %v2150_v12 }
 0xe90   : > { %v2155_v14 = vmul.f32 1.442695, %v2152_v45 }
 0xe92   : > { %8407 = vpow2.f32 %v2155_v14 }
 0xe9b   : > { %v8406_v28 = vpop.eup %8405 }
 0xe9c   : > { %v2157_v44 = vsel %vm959_vm15, %v8406_v28, 0.0 }
 0xe9d   : > { %2158 = vadd.xlane.f32.xlu0 %v2157_v44 }
 0xe9f   : > { %v8408_v32 = vpop.eup %8407 }
 0xea0   : > { %v2160_v33 = vsel %vm963_vm1, %v8408_v32, 0.0 }
 0xea1   : > { %2073 = vmax.xlane.f32.xlu0 %v2072_v8  ;;  %2161 = vadd.xlane.f32.xlu1 %v2160_v33 }
 0xea5   : > { %2076 = vmax.xlane.f32.xlu1 %v2075_v35 }
 0xf26   : > { %v2159_v39 = vpop.xlane.xlu0 %2158 }
 0xf27   : > { %8409 = vrcp.f32 %v2159_v39 }
 0xf2a   : > { %v2162_v47 = vpop.xlane.xlu1 %2161  ;;  %v2074_v53 = vpop.xlane.xlu0 %2073 }
 0xf2b   : > { %8411 = vrcp.f32 %v2162_v47  ;;  %v2078_v54 = vsub.f32 %v2065_v9, %v2074_v53 }
 0xf2e   : > { %v2077_v30 = vpop.xlane.xlu1 %2076 }
 0xf2f   : > { %v2079_v55 = vsub.f32 %v2068_v17, %v2077_v30 }
 0xf31   : > { %v2082_v58 = vmul.f32 1.442695, %v2079_v55  ;;  %v2342_v55 = vand.u32 %v2336_v46, %v8966_v40 }
 0xf34   : > { %v8410_v48 = vpop.eup %8409 }
 0xf35   : > { %v2165_v50 = vmul.f32 %v8410_v48, %v8406_v28 }
 0xf38   : > { %v8412_v49 = vpop.eup %8411 }
 0xf39   : > { %v2166_v51 = vmul.f32 %v8412_v49, %v8408_v32 }
 0xf3b   : > { %v2170_v52 = vpack.c.bf16 %v2166_v51, %v2165_v50 }
 0xf3d   : > { %7647 = vmatmul.mubr.msk.bf16.vlgmr.msra.gmra.mxu1 %vm959_vm15, %v2170_v52 }
 0xf3e   : > { %7657 = vmatpush3.bf16.xpose.msra.mxu1 %v9261_v56  ;;  %7658 = vmatprep.mubr.msk.bf16.mxu1 %vm8642_vm0, %v8641_v1 }
 0xf3f   : > { %7668 = vmatprep.subr.bf16.mxu1 %v8641_v1 }
 0xf45   : > { %7659 = vmatmul.mubr.msk.bf16.vlgmr.msra.gmra.mxu1 %vm587_vm2, %v2267_v41  ;;  %v2080_v41 = vmul.f32 1.442695, %v2078_v54 }
 0xf46   : > { %7669 = vmatpush3.bf16.xpose.msra.mxu1 %v9261_v56  ;;  %7670 = vmatprep.mubr.msk.bf16.mxu1 %vm8642_vm0, %v8641_v1 }
 0xf47   : > { %7680 = vmatprep.subr.bf16.mxu1 %v8641_v1  ;;  %8413 = vpow2.f32 %v2080_v41 }
 0xf48   : > { %8415 = vpow2.f32 %v2082_v58 }
 0xf4d   : > { %7671 = vmatmul.mubr.msk.bf16.vlgmr.msra.gmra.mxu1 %vm587_vm2, %v2389_v34 }
 0xf4e   : > { %7688 = vmatprep.mubr.msk.bf16.mxu1 %vm8642_vm0, %v8641_v1 }
 0xf54   : > { %v8414_v4 = vpop.eup %8413 }
 0xf55   : > { %v2084_v6 = vsel %vm959_vm15, %v8414_v4, 0.0  ;;  %v8416_v19 = vpop.eup %8415 }
 0xf56   : > { %v2087_v21 = vsel %vm963_vm1, %v8416_v19, 0.0 }
 0xffd   : > { %v9306_v43 = vpop.f32.mrf.mxu1 }
 0xfff   : > { %v7648_v56 = vpop.f32.mrf.mxu1 }
0x1001   : > { %v9308_v57 = vpop.f32.mrf.mxu1 }
0x1003   : > { %v7649_v59 = vpop.f32.mrf.mxu1 }
0x1005   : > { %v2305_v60 = vpop.f32.mrf.mxu1 }
0x1006   : > { %v2312_v31 = vsel %vm959_vm15, %v2305_v60, -inf }
0x1007   : > { %2313 = vmax.xlane.f32.xlu0 %v2312_v31  ;;  %v7660_v10 = vpop.f32.mrf.mxu1 }
0x1009   : > { %v2308_v34 = vpop.f32.mrf.mxu1 }
0x100a   : > { %v2315_v63 = vsel %vm963_vm1, %v2308_v34, -inf }
0x100b   : > { %2316 = vmax.xlane.f32.xlu1 %v2315_v63  ;;  %v7661_v0 = vpop.f32.mrf.mxu1 }
0x100d   : > { %v2427_v2 = vpop.f32.mrf.mxu1 }
0x100e   : > { %v2434_v3 = vsel %vm959_vm15, %v2427_v2, -inf }
0x100f   : > { %2435 = vmax.xlane.f32.xlu0 %v2434_v3  ;;  %v7672_v5 = vpop.f32.mrf.mxu1 }
0x1011   : > { %v2430_v9 = vpop.f32.mrf.mxu1 }
0x1012   : > { %v2437_v17 = vsel %vm963_vm1, %v2430_v9, -inf }
0x1013   : > { %2085 = vadd.xlane.f32.xlu0 %v2084_v6  ;;  %2438 = vmax.xlane.f32.xlu1 %v2437_v17  ;;  %v7673_v20 = vpop.f32.mrf.mxu1  ;;  %v8244_v6 = vld [vmem:[%s10478_s7 + $0x210] sm:$0xff]   ;;  %v8245_v17 = vld [vmem:[%s10478_s7 + $0x208] sm:$0xff]  }
0x1017   : > { %2088 = vadd.xlane.f32.xlu1 %v2087_v21 }
0x1090   : > { %v2314_v22 = vpop.xlane.xlu0 %2313 }
0x1091   : > { %v2318_v23 = vsub.f32 %v2305_v60, %v2314_v22 }
0x1093   : > { %v2320_v24 = vmul.f32 1.442695, %v2318_v23 }
0x1094   : > { %v2317_v25 = vpop.xlane.xlu1 %2316 }
0x1095   : > { %8417 = vpow2.f32 %v2320_v24  ;;  %v2319_v26 = vsub.f32 %v2308_v34, %v2317_v25  ;;  %v2464_v34 = vand.u32 %v2458_v42, %v8966_v40 }
0x1097   : > { %v2322_v27 = vmul.f32 1.442695, %v2319_v26 }
0x1098   : > { %v2436_v7 = vpop.xlane.xlu0 %2435 }
0x1099   : > { %8419 = vpow2.f32 %v2322_v27  ;;  %v2440_v12 = vsub.f32 %v2427_v2, %v2436_v7 }
0x109b   : > { %v2442_v45 = vmul.f32 1.442695, %v2440_v12 }
0x109c   : > { %v2439_v14 = vpop.xlane.xlu1 %2438  ;;  %v2086_v28 = vpop.xlane.xlu0 %2085 }
0x109d   : > { %8421 = vpow2.f32 %v2442_v45  ;;  %v2441_v44 = vsub.f32 %v2430_v9, %v2439_v14  ;;  %v8243_v9 = vld [vmem:[%s10478_s7 + $0x218] sm:$0xff]  }
0x109e   : > { %8423 = vrcp.f32 %v2086_v28  ;;  %7681 = vmatpush3.bf16.msra.mxu1 %v8243_v9 }
0x109f   : > { %v2444_v32 = vmul.f32 1.442695, %v2441_v44  ;;  %7682 = vmatprep.subr.bf16.mxu1 %v8641_v1 }
0x10a0   : > { %v2089_v8 = vpop.xlane.xlu1 %2088 }
0x10a1   : > { %8425 = vpow2.f32 %v2444_v32 }
0x10a2   : > { %v8418_v33 = vpop.eup %8417  ;;  %8427 = vrcp.f32 %v2089_v8  ;;  %7683 = vmatpush3.bf16.msra.mxu1 %v8244_v6  ;;  %v6753_v8 = vld [vmem:[%s10479_s8 + $0x10] ss:$0 sm:$0xff] }
0x10a3   : > { %v2324_v35 = vsel %vm959_vm15, %v8418_v33, 0.0  ;;  %7684 = vmatprep.subr.bf16.mxu1 %v8641_v1 }
0x10a4   : > { %2325 = vadd.xlane.f32.xlu0 %v2324_v35 }
0x10a6   : > { %v8420_v39 = vpop.eup %8419  ;;  %7685 = vmatpush3.bf16.msra.mxu1 %v8245_v17 }
0x10a7   : > { %v2327_v47 = vsel %vm963_vm1, %v8420_v39, 0.0  ;;  %7686 = vmatprep.subr.bf16.mxu1 %v8641_v1 }
0x10a8   : > { %2328 = vadd.xlane.f32.xlu1 %v2327_v47 }
0x10aa   : > { %v8422_v48 = vpop.eup %8421 }
0x10ab   : > { %v2446_v49 = vsel %vm959_vm15, %v8422_v48, 0.0  ;;  %v8424_v50 = vpop.eup %8423 }
0x10ac   : > { %2447 = vadd.xlane.f32.xlu0 %v2446_v49  ;;  %v2092_v54 = vmul.f32 %v8424_v50, %v8414_v4 }
0x10ae   : > { %v8426_v51 = vpop.eup %8425 }
0x10af   : > { %v8428_v52 = vpop.eup %8427  ;;  %v2449_v53 = vsel %vm963_vm1, %v8426_v51, 0.0 }
0x10b0   : > { %2450 = vadd.xlane.f32.xlu1 %v2449_v53  ;;  %v2093_v30 = vmul.f32 %v8428_v52, %v8416_v19  ;;  %v8246_v19 = vld [vmem:[%s10478_s7 + $0x200] sm:$0xff]  }
0x10b1   : > { %7687 = vmatpush3.bf16.msra.mxu1 %v8246_v19 }
0x10b2   : > { %v2097_v41 = vpack.c.bf16 %v2093_v30, %v2092_v54  ;;  %7704 = vmatprep.subr.bf16.mxu1 %v8641_v1 }
0x10b4   : > { %7653 = vmatmul.mubr.msk.bf16.vlgmr.msra.gmra.mxu0 %vm959_vm15, %v2097_v41 }
0x10b5   : > { %7663 = vmatpush3.bf16.msra.mxu0 %v2342_v55  ;;  %7664 = vmatprep.mubr.msk.bf16.mxu0 %vm8642_vm0, %v8641_v1 }
0x10b6   : > { %7674 = vmatprep.subr.bf16.mxu0 %v8641_v1 }
0x112d   : > { %v2326_v56 = vpop.xlane.xlu0 %2325 }
0x112e   : > { %8429 = vrcp.f32 %v2326_v56 }
0x1131   : > { %v2329_v58 = vpop.xlane.xlu1 %2328 }
0x1132   : > { %8431 = vrcp.f32 %v2329_v58 }
0x1135   : > { %v2448_v59 = vpop.xlane.xlu0 %2447 }
0x1136   : > { %8433 = vrcp.f32 %v2448_v59 }
0x1139   : > { %v2451_v60 = vpop.xlane.xlu1 %2450 }
0x113a   : > { %8435 = vrcp.f32 %v2451_v60  ;;  %v8248_v60 = vld [vmem:[%s10480_s9 + $0x30] sm:$0xff]  }
0x113b   : > { %v8430_v31 = vpop.eup %8429 }
0x113c   : > { %v2332_v38 = vmul.f32 %v8430_v31, %v8418_v33  ;;  %v8249_v31 = vld [vmem:[%s10480_s9 + $0x28] sm:$0xff]  }
0x113f   : > { %v8432_v10 = vpop.eup %8431 }
0x1140   : > { %v2333_v36 = vmul.f32 %v8432_v10, %v8420_v39  ;;  %v8250_v10 = vld [vmem:[%s10480_s9 + $0x20] sm:$0xff]  }
0x1142   : > { %v2337_v46 = vpack.c.bf16 %v2333_v36, %v2332_v38 }
0x1143   : > { %v8434_v63 = vpop.eup %8433 }
0x1144   : > { %7665 = vmatmul.mubr.msk.bf16.vlgmr.msra.gmra.mxu0 %vm959_vm15, %v2337_v46  ;;  %v2454_v2 = vmul.f32 %v8434_v63, %v8422_v48 }
0x1145   : > { %7675 = vmatpush3.bf16.msra.mxu0 %v2464_v34  ;;  %7676 = vmatprep.mubr.msk.bf16.mxu0 %vm8642_vm0, %v8641_v1 }
0x1146   : > { %7692 = vmatprep.subr.bf16.mxu0 %v8641_v1 }
0x1147   : > { %v8436_v0 = vpop.eup %8435 }
0x1148   : > { %v2455_v3 = vmul.f32 %v8436_v0, %v8426_v51 }
0x114a   : > { %v2459_v4 = vpack.c.bf16 %v2455_v3, %v2454_v2 }
0x114c   : > { %7677 = vmatmul.mubr.msk.bf16.vlgmr.msra.gmra.mxu0 %vm959_vm15, %v2459_v4  ;;  %v6759_v4 = vld [vmem:[%s10479_s8 + $0x15] ss:$0 sm:$0xff] }
0x114d   : > { %7700 = vmatprep.mubr.msk.bf16.mxu0 %vm8642_vm0, %v8641_v1 }
0x1174   : > { %v2258_v13 = vpop.f32.mrf.mxu0 }
0x1175   : > { %v2259_v25 = vadd.f32 %v2258_v13, %v9306_v43 }
0x1176   : > { %v7654_v37 = vpop.f32.mrf.mxu0 }
0x1178   : > { %v2261_v42 = vpop.f32.mrf.mxu0 }
0x1179   : > { %v2262_v26 = vadd.f32 %v2261_v42, %v9308_v57 }
0x117a   : > { %v7655_v5 = vpop.f32.mrf.mxu0 }
0x117b   : > { %v6760_v5 = vld [vmem:[%s10479_s8 + $0x1a] ss:$0 sm:$0xff] }
0x1204   : > { %v2378_v20 = vpop.f32.mrf.mxu0 }
0x1205   : > { %v2385_v7 = vadd.f32 %v2378_v20, %v2259_v25  ;;  %v8251_v20 = vld [vmem:[%s10482_s11 + $0x78] sm:$0xff]   ;;  %v8256_v25 = vld [vmem:[%s10482_s11 + $0x50] sm:$0xff]  }
0x1206   : > { %v7666_v21 = vpop.f32.mrf.mxu0 }
0x1207   : > { %v8252_v21 = vld [vmem:[%s10482_s11 + $0x70] sm:$0xff]  }
0x1208   : > { %v2381_v22 = vpop.f32.mrf.mxu0 }
0x1209   : > { %v2386_v12 = vadd.f32 %v2381_v22, %v2262_v26  ;;  %v8253_v22 = vld [vmem:[%s10482_s11 + $0x68] sm:$0xff]  }
0x120a   : > { %v7667_v23 = vpop.f32.mrf.mxu0  ;;  %v8257_v26 = vld [vmem:[%s10482_s11 + $0x48] sm:$0xff]  }
0x120b   : > { %v8254_v23 = vld [vmem:[%s10482_s11 + $0x60] sm:$0xff]  }
0x120c   : > { %v2500_v24 = vpop.f32.mrf.mxu0 }
0x120d   : > { %v2507_v14 = vadd.f32 %v2500_v24, %v2385_v7  ;;  %v8255_v24 = vld [vmem:[%s10482_s11 + $0x58] sm:$0xff]   ;;  %v6769_v7 = vld [vmem:[%s10481_s10 + $0x1] ss:$0 sm:$0xff] }
0x120e   : > { %v7678_v27 = vpop.f32.mrf.mxu0 }
0x120f   : > { %v8258_v27 = vld [vmem:[%s10482_s11 + $0x40] sm:$0xff]  }
0x1210   : > { %v2503_v45 = vpop.f32.mrf.mxu0 }
0x1211   : > { %v2508_v28 = vadd.f32 %v2503_v45, %v2386_v12 }
0x1212   : > { %v7679_v44 = vpop.f32.mrf.mxu0 }
0x1213   : > { %v2509_v32 = vpack.c.bf16 %v2508_v28, %v2507_v14 }
0x1215   : > { %7689 = vmatmul.mubr.msk.bf16.vlgmr.msra.gmra.mxu1 %vm587_vm2, %v2509_v32 }
0x1216   : > { %7720 = vmatprep.mubr.msk.bf16.mxu1 %vm8642_vm0, %v8641_v1  ;;  %7705 = vmatpush3.bf16.msra.mxu1 %v8251_v20  ;;  %v8261_v20 = vld [vmem:[%s10478_s7 + $0x50] sm:$0xff]  }
0x1217   : > { %7706 = vmatprep.subr.bf16.mxu1 %v8641_v1 }
0x121a   : > { %7707 = vmatpush3.bf16.msra.mxu1 %v8252_v21  ;;  %v8262_v21 = vld [vmem:[%s10478_s7 + $0x190] sm:$0xff]  }
0x121b   : > { %7708 = vmatprep.subr.bf16.mxu1 %v8641_v1 }
0x121e   : > { %7709 = vmatpush3.bf16.msra.mxu1 %v8253_v22  ;;  %v8263_v22 = vld [vmem:[%s10478_s7 + $0x48] sm:$0xff]  }
0x121f   : > { %7710 = vmatprep.subr.bf16.mxu1 %v8641_v1 }
0x1222   : > { %7711 = vmatpush3.bf16.msra.mxu1 %v8254_v23  ;;  %v8264_v23 = vld [vmem:[%s10478_s7 + $0x188] sm:$0xff]  }
0x1223   : > { %7712 = vmatprep.subr.bf16.mxu1 %v8641_v1 }
0x1226   : > { %7713 = vmatpush3.bf16.msra.mxu1 %v8255_v24  ;;  %v8265_v24 = vld [vmem:[%s10478_s7 + $0x40] sm:$0xff]  }
0x1227   : > { %7714 = vmatprep.subr.bf16.mxu1 %v8641_v1 }
0x122a   : > { %7715 = vmatpush3.bf16.msra.mxu1 %v8256_v25  ;;  %v8266_v25 = vld [vmem:[%s10478_s7 + $0x180] sm:$0xff]  }
0x122b   : > { %7716 = vmatprep.subr.bf16.mxu1 %v8641_v1 }
0x122e   : > { %7717 = vmatpush3.bf16.msra.mxu1 %v8257_v26 }
0x122f   : > { %7718 = vmatprep.subr.bf16.mxu1 %v8641_v1 }
0x1232   : > { %7719 = vmatpush3.bf16.msra.mxu1 %v8258_v27 }
0x1233   : > { %7748 = vmatprep.subr.bf16.mxu1 %v8641_v1 }
0x12d5   : > { %v2585_v43 = vpop.f32.mrf.mxu1 }
0x12d6   : > { %v2586_v33 = vadd.f32 %v6753_v8, %v2585_v43 }
0x12d7   : > { %v7690_v57 = vpop.f32.mrf.mxu1 }
0x12d8   : > { %v2592_v35 = vadd.f32 %v2586_v33, %v9179_v29 }
0x12d9   : > { %v2588_v39 = vpop.f32.mrf.mxu1 }
0x12da   : > { %v2589_v47 = vadd.f32 %v6753_v8, %v2588_v39  ;;  %v2596_v48 = vsel %vm587_vm2, %v2592_v35, 0.0 }
0x12db   : > { %2597 = vadd.xlane.f32.xlu0 %v2596_v48  ;;  %v7691_v49 = vpop.f32.mrf.mxu1 }
0x12dc   : > { %v2593_v50 = vadd.f32 %v2589_v47, %v9181_v11  ;;  %v8247_v11 = vld [vmem:[%s10480_s9 + $0x38] sm:$0xff]  }
0x12dd   : > { %7693 = vmatpush3.bf16.msra.mxu0 %v8247_v11 }
0x12de   : > { %v2599_v51 = vsel %vm1490_vm3, %v2593_v50, 0.0  ;;  %7694 = vmatprep.subr.bf16.mxu0 %v8641_v1 }
0x12df   : > { %2600 = vadd.xlane.f32.xlu1 %v2599_v51 }
0x12e1   : > { %7695 = vmatpush3.bf16.msra.mxu0 %v8248_v60 }
0x12e2   : > { %7696 = vmatprep.subr.bf16.mxu0 %v8641_v1 }
0x12e5   : > { %7697 = vmatpush3.bf16.msra.mxu0 %v8249_v31 }
0x12e6   : > { %7698 = vmatprep.subr.bf16.mxu0 %v8641_v1 }
0x12e9   : > { %7699 = vmatpush3.bf16.msra.mxu0 %v8250_v10 }
0x12ea   : > { %7724 = vmatprep.subr.bf16.mxu0 %v8641_v1 }
0x1364   : > { %v2598_v52 = vpop.xlane.xlu0 %2597 }
0x1365   : > { %v2602_v53 = vmul.f32 0.015625, %v2598_v52 }
0x1367   : > { %v2604_v54 = vsub.f32 %v2592_v35, %v2602_v53 }
0x1368   : > { %v2601_v30 = vpop.xlane.xlu1 %2600 }
0x1369   : > { %v2603_v41 = vmul.f32 0.015625, %v2601_v30  ;;  %v2606_v55 = vmul.f32 %v2604_v54, %v2604_v54 }
0x136b   : > { %v2605_v56 = vsub.f32 %v2593_v50, %v2603_v41  ;;  %v2608_v29 = vsel %vm587_vm2, %v2606_v55, 0.0 }
0x136c   : > { %2609 = vadd.xlane.f32.xlu0 %v2608_v29 }
0x136d   : > { %v2607_v58 = vmul.f32 %v2605_v56, %v2605_v56 }
0x136f   : > { %v2611_v59 = vsel %vm1490_vm3, %v2607_v58, 0.0  ;;  %v6791_v58 = vld [vmem:[%s10479_s8 + $0x1f] ss:$0 sm:$0xff] }
0x1370   : > { %2612 = vadd.xlane.f32.xlu1 %v2611_v59 }
0x13f5   : > { %v2610_v38 = vpop.xlane.xlu0 %2609 }
0x13f6   : > { %v2614_v36 = vmul.f32 0.015625, %v2610_v38 }
0x13f8   : > { %v2616_v46 = vadd.f32 1e-05, %v2614_v36 }
0x13f9   : > { %v2613_v34 = vpop.xlane.xlu1 %2612 }
0x13fa   : > { %8437 = vrsqrt.f32 %v2616_v46  ;;  %v2615_v63 = vmul.f32 0.015625, %v2613_v34 }
0x13fc   : > { %v2617_v0 = vadd.f32 1e-05, %v2615_v63 }
0x13fe   : > { %8439 = vrsqrt.f32 %v2617_v0 }
0x1407   : > { %v8438_v2 = vpop.eup %8437 }
0x1408   : > { %v2620_v3 = vmul.f32 %v8438_v2, %v2604_v54 }
0x140a   : > { %v2626_v42 = vmul.f32 %v6759_v4, %v2620_v3 }
0x140b   : > { %v8440_v13 = vpop.eup %8439 }
0x140c   : > { %v2621_v37 = vmul.f32 %v8440_v13, %v2605_v56  ;;  %v9391_v6 = vadd.f32 %v6760_v5, %v2626_v42 }
0x140e   : > { %v2627_v9 = vmul.f32 %v6759_v4, %v2621_v37 }
0x1410   : > { %v9393_v17 = vadd.f32 %v6760_v5, %v2627_v9 }
0x1412   : > { %v2634_v19 = vpack.c.bf16 %v9393_v17, %v9391_v6 }
0x1414   : > { %7701 = vmatmul.mubr.msk.bf16.vlgmr.msra.gmra.mxu0 %vm587_vm2, %v2634_v19  ;;  %v8260_v19 = vld [vmem:[%s10478_s7 + $0x198] sm:$0xff]  }
0x1415   : > { %7732 = vmatprep.mubr.msk.bf16.mxu0 %vm8642_vm0, %v8641_v1 }
0x14d4   : > { %v2710_v12 = vpop.f32.mrf.mxu0 }
0x14d5   : > { %v2711_v45 = vadd.f32 %v6769_v7, %v2710_v12 }
0x14d6   : > { %v7702_v14 = vpop.f32.mrf.mxu0 }
0x14d7   : > { %v2719_v28 = vmul.f32 0.044715, %v2711_v45  ;;  %v2717_v54 = vmul.f32 0.5, %v2711_v45 }
0x14d8   : > { %v2713_v44 = vpop.f32.mrf.mxu0 }
0x14d9   : > { %v2721_v32 = vmul.f32 %v2719_v28, %v2711_v45  ;;  %v2714_v8 = vadd.f32 %v6769_v7, %v2713_v44 }
0x14da   : > { %v7703_v43 = vpop.f32.mrf.mxu0 }
0x14db   : > { %v2723_v33 = vmul.f32 %v2721_v32, %v2711_v45  ;;  %v2720_v57 = vmul.f32 0.044715, %v2714_v8  ;;  %v2718_v30 = vmul.f32 0.5, %v2714_v8  ;;  %v6800_v32 = vld [vmem:[%s10479_s8 + $0x24] ss:$0 sm:$0xff] }
0x14dd   : > { %v2725_v35 = vadd.f32 %v2723_v33, %v2711_v45  ;;  %v2722_v39 = vmul.f32 %v2720_v57, %v2714_v8  ;;  %v6801_v57 = vld [vmem:[%s10479_s8 + $0x29] ss:$0 sm:$0xff] }
0x14df   : > { %v2727_v47 = vmul.f32 0.7978846, %v2725_v35  ;;  %v2724_v48 = vmul.f32 %v2722_v39, %v2714_v8 }
0x14e1   : > { %8441 = vtanh.f32 %v2727_v47  ;;  %v2726_v49 = vadd.f32 %v2724_v48, %v2714_v8  ;;  %v8267_v48 = vld [vmem:[%s10478_s7 + $0xf8] sm:$0xff]  }
0x14e3   : > { %v2728_v50 = vmul.f32 0.7978846, %v2726_v49 }
0x14e5   : > { %8443 = vtanh.f32 %v2728_v50  ;;  %v8268_v50 = vld [vmem:[%s10478_s7 + $0xf0] sm:$0xff]  }
0x14ee   : > { %v8442_v51 = vpop.eup %8441 }
0x14ef   : > { %v2731_v52 = vadd.f32 1.0, %v8442_v51  ;;  %v8269_v51 = vld [vmem:[%s10478_s7 + $0xe8] sm:$0xff]  }
0x14f1   : > { %v2733_v55 = vmul.f32 %v2731_v52, %v2717_v54  ;;  %v8270_v52 = vld [vmem:[%s10478_s7 + $0xe0] sm:$0xff]  }
0x14f2   : > { %v8444_v53 = vpop.eup %8443 }
0x14f3   : > { %v2732_v41 = vadd.f32 1.0, %v8444_v53  ;;  %v6810_v53 = vld [vmem:[%s10479_s8 + $0x2] ss:$0 sm:$0xff] }
0x14f5   : > { %v2734_v56 = vmul.f32 %v2732_v41, %v2718_v30  ;;  %v6838_v30 = vld [vmem:[%s10479_s8 + $0xc] ss:$0 sm:$0xff] }
0x14f7   : > { %v2735_v29 = vpack.c.bf16 %v2734_v56, %v2733_v55 }
0x14f9   : > { %7721 = vmatmul.mubr.bf16.vlgmr.msra.gmra.mxu1 %v2735_v29 }
0x14fa   : > { %7756 = vmatprep.mubr.msk.bf16.mxu1 %vm8642_vm0, %v8641_v1  ;;  %7749 = vmatpush3.bf16.msra.mxu1 %v8260_v19 }
0x14fb   : > { %7750 = vmatprep.subr.bf16.mxu1 %v8641_v1 }
0x14fe   : > { %7751 = vmatpush3.bf16.msra.mxu1 %v8262_v21  ;;  %v6824_v21 = vld [vmem:[%s10479_s8 + $0x7] ss:$0 sm:$0xff] }
0x14ff   : > { %7752 = vmatprep.subr.bf16.mxu1 %v8641_v1 }
0x1502   : > { %7753 = vmatpush3.bf16.msra.mxu1 %v8264_v23 }
0x1503   : > { %7754 = vmatprep.subr.bf16.mxu1 %v8641_v1 }
0x1506   : > { %7755 = vmatpush3.bf16.msra.mxu1 %v8266_v25 }
0x1507   : > { %7772 = vmatprep.subr.bf16.mxu1 %v8641_v1 }
0x15b9   : > { %v2840_v59 = vpop.f32.mrf.mxu1 }
0x15ba   : > { %v2841_v11 = vadd.f32 %v6791_v58, %v2840_v59 }
0x15bb   : > { %v7722_v60 = vpop.f32.mrf.mxu1 }
0x15bc   : > { %v2847_v31 = vadd.f32 %v2841_v11, %v9391_v6 }
0x15bd   : > { %v2843_v10 = vpop.f32.mrf.mxu1 }
0x15be   : > { %v2844_v38 = vadd.f32 %v6791_v58, %v2843_v10  ;;  %v2851_v36 = vsel %vm587_vm2, %v2847_v31, 0.0 }
0x15bf   : > { %2852 = vadd.xlane.f32.xlu0 %v2851_v36  ;;  %v7723_v46 = vpop.f32.mrf.mxu1 }
0x15c0   : > { %v2848_v34 = vadd.f32 %v2844_v38, %v9393_v17  ;;  %v8259_v17 = vld [vmem:[%s10478_s7 + $0x58] sm:$0xff]  }
0x15c1   : > { %7725 = vmatpush3.bf16.msra.mxu0 %v8259_v17 }
0x15c2   : > { %v2854_v63 = vsel %vm1490_vm3, %v2848_v34, 0.0  ;;  %7726 = vmatprep.subr.bf16.mxu0 %v8641_v1 }
0x15c3   : > { %2855 = vadd.xlane.f32.xlu1 %v2854_v63 }
0x15c5   : > { %7727 = vmatpush3.bf16.msra.mxu0 %v8261_v20 }
0x15c6   : > { %7728 = vmatprep.subr.bf16.mxu0 %v8641_v1 }
0x15c9   : > { %7729 = vmatpush3.bf16.msra.mxu0 %v8263_v22 }
0x15ca   : > { %7730 = vmatprep.subr.bf16.mxu0 %v8641_v1 }
0x15cd   : > { %7731 = vmatpush3.bf16.msra.mxu0 %v8265_v24 }
0x15ce   : > { %7736 = vmatprep.subr.bf16.mxu0 %v8641_v1 }
0x1648   : > { %v2853_v0 = vpop.xlane.xlu0 %2852 }
0x1649   : > { %v2857_v2 = vmul.f32 0.015625, %v2853_v0 }
0x164b   : > { %v2859_v3 = vsub.f32 %v2847_v31, %v2857_v2 }
0x164c   : > { %v2856_v4 = vpop.xlane.xlu1 %2855 }
0x164d   : > { %v2858_v13 = vmul.f32 0.015625, %v2856_v4  ;;  %v2861_v37 = vmul.f32 %v2859_v3, %v2859_v3 }
0x164f   : > { %v2860_v42 = vsub.f32 %v2848_v34, %v2858_v13  ;;  %v2863_v5 = vsel %vm587_vm2, %v2861_v37, 0.0 }
0x1650   : > { %2864 = vadd.xlane.f32.xlu0 %v2863_v5 }
0x1651   : > { %v2862_v9 = vmul.f32 %v2860_v42, %v2860_v42 }
0x1653   : > { %v2866_v6 = vsel %vm1490_vm3, %v2862_v9, 0.0 }
0x1654   : > { %2867 = vadd.xlane.f32.xlu1 %v2866_v6 }
0x16d9   : > { %v2865_v26 = vpop.xlane.xlu0 %2864 }
0x16da   : > { %v2869_v27 = vmul.f32 0.015625, %v2865_v26 }
0x16dc   : > { %v2871_v7 = vadd.f32 1e-05, %v2869_v27 }
0x16dd   : > { %v2868_v12 = vpop.xlane.xlu1 %2867 }
0x16de   : > { %8445 = vrsqrt.f32 %v2871_v7  ;;  %v2870_v45 = vmul.f32 0.015625, %v2868_v12 }
0x16e0   : > { %v2872_v14 = vadd.f32 1e-05, %v2870_v45 }
0x16e2   : > { %8447 = vrsqrt.f32 %v2872_v14 }
0x16eb   : > { %v8446_v28 = vpop.eup %8445 }
0x16ec   : > { %v2875_v44 = vmul.f32 %v8446_v28, %v2859_v3 }
0x16ee   : > { %v2881_v33 = vmul.f32 %v6800_v32, %v2875_v44 }
0x16ef   : > { %v8448_v8 = vpop.eup %8447 }
0x16f0   : > { %v2876_v43 = vmul.f32 %v8448_v8, %v2860_v42  ;;  %v9484_v39 = vadd.f32 %v6801_v57, %v2881_v33 }
0x16f2   : > { %v2882_v35 = vmul.f32 %v6800_v32, %v2876_v43 }
0x16f4   : > { %v9486_v47 = vadd.f32 %v6801_v57, %v2882_v35 }
0x16f6   : > { %v9493_v49 = vpack.c.bf16 %v9486_v47, %v9484_v39 }
0x16f8   : > { %7733 = vmatmul.mubr.msk.bf16.vlgmr.msra.gmra.mxu0 %vm587_vm2, %v9493_v49  ;;  %7757 = vmatmul.mubr.msk.bf16.vlgmr.msra.gmra.mxu1 %vm587_vm2, %v9493_v49 }
0x16f9   : > { %7737 = vmatpush3.bf16.msra.mxu0 %v8267_v48  ;;  %7744 = vmatprep.mubr.msk.bf16.mxu0 %vm8642_vm0, %v8641_v1 }
0x16fa   : > { %7738 = vmatprep.subr.bf16.mxu0 %v8641_v1  ;;  %7774 = vmatprep.mubr.msk.bf16.mxu1 %vm8642_vm0, %v8641_v1 }
0x16fd   : > { %7739 = vmatpush3.bf16.msra.mxu0 %v8268_v50 }
0x16fe   : > { %7740 = vmatprep.subr.bf16.mxu0 %v8641_v1 }
0x1701   : > { %7741 = vmatpush3.bf16.msra.mxu0 %v8269_v51 }
0x1702   : > { %7742 = vmatprep.subr.bf16.mxu0 %v8641_v1 }
0x1705   : > { %7743 = vmatpush3.bf16.msra.mxu0 %v8270_v52 }
0x1706   : > { %7760 = vmatprep.subr.bf16.mxu0 %v8641_v1 }
0x1708   : > { %7745 = vmatmul.mubr.msk.bf16.vlgmr.msra.gmra.mxu0 %vm587_vm2, %v9493_v49 }
0x1709   : > { %7762 = vmatprep.mubr.msk.bf16.mxu0 %vm8642_vm0, %v8641_v1 }
0x17b8   : > { %v2965_v54 = vpop.f32.mrf.mxu0  ;;  %v3123_v41 = vpop.f32.mrf.mxu1 }
0x17b9   : > { %v2966_v55 = vadd.f32 %v6810_v53, %v2965_v54  ;;  %v3124_v58 = vadd.f32 %v6838_v30, %v3123_v41 }
0x17ba   : > { %v7734_v56 = vpop.f32.mrf.mxu0  ;;  %v7758_v29 = vpop.f32.mrf.mxu1 }
0x17bb   : > { %v9527_v10 = vmul.f32 %v2966_v55, %v8901_v61  ;;  %v9530_v38 = vmul.f32 %v2966_v55, %v8904_v62  ;;  %v3276_v34 = vmul.f32 %v3124_v58, %v8929_v16  ;;  %v9534_v63 = vmul.f32 %v3124_v58, %v8901_v61 }
0x17bc   : > { %v2968_v59 = vpop.f32.mrf.mxu0  ;;  %v3126_v11 = vpop.f32.mrf.mxu1  ;;  %v9543_v3 = vmul.f32 %v3124_v58, %v8904_v62  ;;  %v3131_v45 = vmul.f32 %v2966_v55, %v8926_v15  ;;  %v3203_v44 = vmul.f32 %v3124_v58, %v8926_v15  ;;  %v3207_v43 = vmul.f32 %v2966_v55, %v8929_v16 }
0x17bd   : > { %v2969_v60 = vadd.f32 %v6810_v53, %v2968_v59  ;;  %v3127_v31 = vadd.f32 %v6838_v30, %v3126_v11 }
0x17be   : > { %v7735_v36 = vpop.f32.mrf.mxu0  ;;  %v7759_v46 = vpop.f32.mrf.mxu1 }
0x17bf   : > { %v9537_v0 = vmul.f32 %v2969_v60, %v8901_v61  ;;  %v9540_v2 = vmul.f32 %v2969_v60, %v8904_v62  ;;  %v3277_v4 = vmul.f32 %v3127_v31, %v8929_v16  ;;  %v9547_v13 = vmul.f32 %v3127_v31, %v8901_v61 }
0x17c0   : > { %v9550_v37 = vmul.f32 %v3127_v31, %v8904_v62  ;;  %v3132_v12 = vmul.f32 %v2969_v60, %v8926_v15  ;;  %v3204_v28 = vmul.f32 %v3127_v31, %v8926_v15  ;;  %v3208_v32 = vmul.f32 %v2969_v60, %v8929_v16 }
0x17c1   : > { %v3376_v42 = vpack.c.bf16 %v9537_v0, %v9527_v10  ;;  %v3498_v5 = vpack.c.bf16 %v9540_v2, %v9530_v38  ;;  %v3278_v9 = vpack.c.bf16 %v3277_v4, %v3276_v34  ;;  %v3445_v6 = vpack.c.bf16 %v9547_v13, %v9534_v63 }
0x17c2   : > { %v3567_v17 = vpack.c.bf16 %v9550_v37, %v9543_v3  ;;  %v3133_v14 = vpack.c.bf16 %v3132_v12, %v3131_v45  ;;  %v3205_v8 = vpack.c.bf16 %v3204_v28, %v3203_v44  ;;  %v3209_v33 = vpack.c.bf16 %v3208_v32, %v3207_v43 }
0x17c3   : > { %v3284_v19 = vand.u32 %v3278_v9, %v8966_v40 }
0x17c4   : > { %v3331_v57 = vand.u32 %v3205_v8, %v8966_v40 }
0x17c5   : > { %7773 = vmatpush3.bf16.msra.mxu1 %v3284_v19 }
0x17c6   : > { %7784 = vmatprep.subr.bf16.mxu1 %v8641_v1 }
0x17c8   : > { %v3044_v20 = vpop.f32.mrf.mxu0 }
0x17c9   : > { %v3045_v24 = vadd.f32 %v6824_v21, %v3044_v20 }
0x17ca   : > { %v7746_v22 = vpop.f32.mrf.mxu0 }
0x17cc   : > { %v3047_v23 = vpop.f32.mrf.mxu0 }
0x17cd   : > { %v3048_v25 = vadd.f32 %v6824_v21, %v3047_v23 }
0x17ce   : > { %v7747_v26 = vpop.f32.mrf.mxu0 }
0x17cf   : > { %v3130_v27 = vpack.c.bf16 %v3048_v25, %v3045_v24 }
0x17d1   : > { %v9566_v7 = vsel %vm587_vm2, %v3130_v27, 0 }
0x17d2   : > { %7761 = vmatpush3.bf16.xpose.msra.mxu0 %v9566_v7 }
0x17d3   : > { %7766 = vmatprep.subr.bf16.mxu0 %v8641_v1 }
0x17d9   : > { %7763 = vmatmul.mubr.msk.bf16.vlgmr.msra.gmra.mxu0 %vm587_vm2, %v3133_v14 }
0x17da   : > { %7767 = vmatpush3.bf16.xpose.msra.mxu0 %v9566_v7  ;;  %7768 = vmatprep.mubr.msk.bf16.mxu0 %vm8642_vm0, %v8641_v1 }
0x17db   : > { %7778 = vmatprep.subr.bf16.mxu0 %v8641_v1 }
0x17e1   : > { %7769 = vmatmul.mubr.msk.bf16.vlgmr.msra.gmra.mxu0 %vm587_vm2, %v3209_v33 }
0x17e2   : > { %7779 = vmatpush3.bf16.msra.mxu0 %v3331_v57  ;;  %7780 = vmatprep.mubr.msk.bf16.mxu0 %vm8642_vm0, %v8641_v1 }
0x17e3   : > { %7790 = vmatprep.subr.bf16.mxu0 %v8641_v1 }
0x1899   : > { %v3174_v35 = vpop.f32.mrf.mxu0 }
0x189a   : > { %v3181_v34 = vsel %vm959_vm15, %v3174_v35, -inf }
0x189b   : > { %v7764_v48 = vpop.f32.mrf.mxu0 }
0x189d   : > { %v3177_v50 = vpop.f32.mrf.mxu0 }
0x189e   : > { %v3184_v9 = vsel %vm963_vm1, %v3177_v50, -inf }
0x189f   : > { %v7765_v51 = vpop.f32.mrf.mxu0 }
0x18a1   : > { %v3247_v52 = vpop.f32.mrf.mxu0 }
0x18a2   : > { %v3254_v53 = vsel %vm959_vm15, %v3247_v52, -inf }
0x18a3   : > { %3255 = vmax.xlane.f32.xlu0 %v3254_v53  ;;  %v7770_v54 = vpop.f32.mrf.mxu0 }
0x18a5   : > { %v3250_v30 = vpop.f32.mrf.mxu0 }
0x18a6   : > { %v3257_v41 = vsel %vm963_vm1, %v3250_v30, -inf }
0x18a7   : > { %3258 = vmax.xlane.f32.xlu1 %v3257_v41  ;;  %v7771_v55 = vpop.f32.mrf.mxu0 }
0x192c   : > { %v3256_v56 = vpop.xlane.xlu0 %3255 }
0x192d   : > { %v3260_v29 = vsub.f32 %v3247_v52, %v3256_v56 }
0x192f   : > { %v3262_v58 = vmul.f32 1.442695, %v3260_v29 }
0x1930   : > { %v3259_v59 = vpop.xlane.xlu1 %3258 }
0x1931   : > { %8449 = vpow2.f32 %v3262_v58  ;;  %v3261_v11 = vsub.f32 %v3250_v30, %v3259_v59 }
0x1933   : > { %v3264_v60 = vmul.f32 1.442695, %v3261_v11 }
0x1935   : > { %8451 = vpow2.f32 %v3264_v60 }
0x193e   : > { %v8450_v31 = vpop.eup %8449 }
0x193f   : > { %v3266_v36 = vsel %vm959_vm15, %v8450_v31, 0.0 }
0x1940   : > { %3267 = vadd.xlane.f32.xlu0 %v3266_v36 }
0x1942   : > { %v8452_v46 = vpop.eup %8451 }
0x1943   : > { %v3269_v4 = vsel %vm963_vm1, %v8452_v46, 0.0 }
0x1944   : > { %3182 = vmax.xlane.f32.xlu0 %v3181_v34  ;;  %3270 = vadd.xlane.f32.xlu1 %v3269_v4 }
0x1948   : > { %3185 = vmax.xlane.f32.xlu1 %v3184_v9 }
0x19c9   : > { %v3268_v19 = vpop.xlane.xlu0 %3267 }
0x19ca   : > { %8453 = vrcp.f32 %v3268_v19 }
0x19cd   : > { %v3271_v20 = vpop.xlane.xlu1 %3270  ;;  %v3183_v26 = vpop.xlane.xlu0 %3182 }
0x19ce   : > { %8455 = vrcp.f32 %v3271_v20  ;;  %v3187_v27 = vsub.f32 %v3174_v35, %v3183_v26 }
0x19d1   : > { %v3186_v10 = vpop.xlane.xlu1 %3185 }
0x19d7   : > { %v8454_v21 = vpop.eup %8453 }
0x19d8   : > { %v3274_v23 = vmul.f32 %v8454_v21, %v8450_v31 }
0x19db   : > { %v8456_v22 = vpop.eup %8455 }
0x19dc   : > { %v3275_v24 = vmul.f32 %v8456_v22, %v8452_v46 }
0x19de   : > { %v3279_v25 = vpack.c.bf16 %v3275_v24, %v3274_v23 }
0x19e0   : > { %7775 = vmatmul.mubr.msk.bf16.vlgmr.msra.gmra.mxu1 %vm959_vm15, %v3279_v25 }
0x19e1   : > { %7785 = vmatpush3.bf16.xpose.msra.mxu1 %v9566_v7  ;;  %7786 = vmatprep.mubr.msk.bf16.mxu1 %vm8642_vm0, %v8641_v1 }
0x19e2   : > { %7796 = vmatprep.subr.bf16.mxu1 %v8641_v1 }
0x19e8   : > { %7787 = vmatmul.mubr.msk.bf16.vlgmr.msra.gmra.mxu1 %vm587_vm2, %v3376_v42  ;;  %v3189_v42 = vmul.f32 1.442695, %v3187_v27 }
0x19e9   : > { %7797 = vmatpush3.bf16.xpose.msra.mxu1 %v9566_v7  ;;  %7798 = vmatprep.mubr.msk.bf16.mxu1 %vm8642_vm0, %v8641_v1  ;;  %v3188_v7 = vsub.f32 %v3177_v50, %v3186_v10 }
0x19ea   : > { %7808 = vmatprep.subr.bf16.mxu1 %v8641_v1  ;;  %8457 = vpow2.f32 %v3189_v42 }
0x19eb   : > { %v3191_v14 = vmul.f32 1.442695, %v3188_v7 }
0x19ed   : > { %8459 = vpow2.f32 %v3191_v14 }
0x19f0   : > { %7799 = vmatmul.mubr.msk.bf16.vlgmr.msra.gmra.mxu1 %vm587_vm2, %v3498_v5 }
0x19f1   : > { %7816 = vmatprep.mubr.msk.bf16.mxu1 %vm8642_vm0, %v8641_v1 }
0x19f7   : > { %v8458_v57 = vpop.eup %8457 }
0x19f8   : > { %v3193_v50 = vsel %vm959_vm15, %v8458_v57, 0.0 }
0x19fa   : > { %v8460_v52 = vpop.eup %8459 }
0x19fb   : > { %v3196_v54 = vsel %vm963_vm1, %v8460_v52, 0.0 }
0x1aa0   : > { %v9611_v0 = vpop.f32.mrf.mxu1 }
0x1aa2   : > { %v7776_v12 = vpop.f32.mrf.mxu1 }
0x1aa3   : > { %v3451_v12 = vand.u32 %v3445_v6, %v8966_v40 }
0x1aa4   : > { %v9613_v45 = vpop.f32.mrf.mxu1 }
0x1aa6   : > { %v7777_v28 = vpop.f32.mrf.mxu1 }
0x1aa8   : > { %v3414_v44 = vpop.f32.mrf.mxu1 }
0x1aa9   : > { %v3421_v38 = vsel %vm959_vm15, %v3414_v44, -inf }
0x1aaa   : > { %3422 = vmax.xlane.f32.xlu0 %v3421_v38  ;;  %v7788_v2 = vpop.f32.mrf.mxu1 }
0x1aac   : > { %v3417_v5 = vpop.f32.mrf.mxu1 }
0x1aad   : > { %v3424_v32 = vsel %vm963_vm1, %v3417_v5, -inf }
0x1aae   : > { %3425 = vmax.xlane.f32.xlu1 %v3424_v32  ;;  %v7789_v8 = vpop.f32.mrf.mxu1  ;;  %v3573_v32 = vand.u32 %v3567_v17, %v8966_v40 }
0x1ab0   : > { %v3536_v43 = vpop.f32.mrf.mxu1 }
0x1ab1   : > { %v3543_v33 = vsel %vm959_vm15, %v3536_v43, -inf }
0x1ab2   : > { %3544 = vmax.xlane.f32.xlu0 %v3543_v33  ;;  %v7800_v35 = vpop.f32.mrf.mxu1 }
0x1ab4   : > { %v3539_v48 = vpop.f32.mrf.mxu1 }
0x1ab5   : > { %v3546_v51 = vsel %vm963_vm1, %v3539_v48, -inf }
0x1ab6   : > { %3194 = vadd.xlane.f32.xlu0 %v3193_v50  ;;  %3547 = vmax.xlane.f32.xlu1 %v3546_v51  ;;  %v7801_v53 = vpop.f32.mrf.mxu1  ;;  %v8271_v50 = vld [vmem:[%s10478_s7 + $0x238] sm:$0xff]   ;;  %v8272_v51 = vld [vmem:[%s10478_s7 + $0x230] sm:$0xff]  }
0x1ab7   : > { %7809 = vmatpush3.bf16.msra.mxu1 %v8271_v50  ;;  %v8274_v53 = vld [vmem:[%s10478_s7 + $0x220] sm:$0xff]   ;;  %v6867_v50 = vld [vmem:[%s10479_s8 + $0x1b] ss:$0 sm:$0xff] }
0x1ab8   : > { %7810 = vmatprep.subr.bf16.mxu1 %v8641_v1 }
0x1aba   : > { %3197 = vadd.xlane.f32.xlu1 %v3196_v54 }
0x1abb   : > { %7811 = vmatpush3.bf16.msra.mxu1 %v8272_v51 }
0x1abc   : > { %7812 = vmatprep.subr.bf16.mxu1 %v8641_v1 }
0x1b33   : > { %v3423_v30 = vpop.xlane.xlu0 %3422 }
0x1b34   : > { %v3427_v41 = vsub.f32 %v3414_v44, %v3423_v30 }
0x1b36   : > { %v3429_v55 = vmul.f32 1.442695, %v3427_v41 }
0x1b37   : > { %v3426_v56 = vpop.xlane.xlu1 %3425 }
0x1b38   : > { %8461 = vpow2.f32 %v3429_v55  ;;  %v3428_v29 = vsub.f32 %v3417_v5, %v3426_v56 }
0x1b3a   : > { %v3431_v58 = vmul.f32 1.442695, %v3428_v29 }
0x1b3b   : > { %v3545_v59 = vpop.xlane.xlu0 %3544 }
0x1b3c   : > { %8463 = vpow2.f32 %v3431_v58  ;;  %v3549_v11 = vsub.f32 %v3536_v43, %v3545_v59 }
0x1b3e   : > { %v3551_v60 = vmul.f32 1.442695, %v3549_v11 }
0x1b3f   : > { %v3548_v31 = vpop.xlane.xlu1 %3547  ;;  %v3195_v36 = vpop.xlane.xlu0 %3194 }
0x1b40   : > { %8465 = vpow2.f32 %v3551_v60  ;;  %v3550_v46 = vsub.f32 %v3539_v48, %v3548_v31 }
0x1b41   : > { %8467 = vrcp.f32 %v3195_v36 }
0x1b42   : > { %v3553_v34 = vmul.f32 1.442695, %v3550_v46 }
0x1b43   : > { %v3198_v4 = vpop.xlane.xlu1 %3197 }
0x1b44   : > { %8469 = vpow2.f32 %v3553_v34 }
0x1b45   : > { %v8462_v9 = vpop.eup %8461  ;;  %8471 = vrcp.f32 %v3198_v4 }
0x1b46   : > { %v3433_v19 = vsel %vm959_vm15, %v8462_v9, 0.0 }
0x1b47   : > { %3434 = vadd.xlane.f32.xlu0 %v3433_v19 }
0x1b49   : > { %v8464_v20 = vpop.eup %8463 }
0x1b4a   : > { %v3436_v21 = vsel %vm963_vm1, %v8464_v20, 0.0 }
0x1b4b   : > { %3437 = vadd.xlane.f32.xlu1 %v3436_v21 }
0x1b4d   : > { %v8466_v22 = vpop.eup %8465 }
0x1b4e   : > { %v3555_v23 = vsel %vm959_vm15, %v8466_v22, 0.0  ;;  %v8468_v24 = vpop.eup %8467 }
0x1b4f   : > { %3556 = vadd.xlane.f32.xlu0 %v3555_v23  ;;  %v3201_v10 = vmul.f32 %v8468_v24, %v8458_v57 }
0x1b51   : > { %v8470_v25 = vpop.eup %8469 }
0x1b52   : > { %v8472_v26 = vpop.eup %8471  ;;  %v3558_v27 = vsel %vm963_vm1, %v8470_v25, 0.0 }
0x1b53   : > { %3559 = vadd.xlane.f32.xlu1 %v3558_v27  ;;  %v3202_v42 = vmul.f32 %v8472_v26, %v8460_v52  ;;  %v8273_v52 = vld [vmem:[%s10478_s7 + $0x228] sm:$0xff]  }
0x1b54   : > { %7813 = vmatpush3.bf16.msra.mxu1 %v8273_v52 }
0x1b55   : > { %v3206_v7 = vpack.c.bf16 %v3202_v42, %v3201_v10  ;;  %7814 = vmatprep.subr.bf16.mxu1 %v8641_v1 }
0x1b57   : > { %7781 = vmatmul.mubr.msk.bf16.vlgmr.msra.gmra.mxu0 %vm959_vm15, %v3206_v7 }
0x1b58   : > { %7791 = vmatpush3.bf16.msra.mxu0 %v3451_v12  ;;  %7792 = vmatprep.mubr.msk.bf16.mxu0 %vm8642_vm0, %v8641_v1 }
0x1b59   : > { %7802 = vmatprep.subr.bf16.mxu0 %v8641_v1  ;;  %7815 = vmatpush3.bf16.msra.mxu1 %v8274_v53 }
0x1b5a   : > { %7832 = vmatprep.subr.bf16.mxu1 %v8641_v1 }
0x1bd0   : > { %v3435_v14 = vpop.xlane.xlu0 %3434 }
0x1bd1   : > { %8473 = vrcp.f32 %v3435_v14 }
0x1bd4   : > { %v3438_v28 = vpop.xlane.xlu1 %3437 }
0x1bd5   : > { %8475 = vrcp.f32 %v3438_v28 }
0x1bd8   : > { %v3557_v44 = vpop.xlane.xlu0 %3556 }
0x1bd9   : > { %8477 = vrcp.f32 %v3557_v44 }
0x1bdc   : > { %v3560_v38 = vpop.xlane.xlu1 %3559 }
0x1bdd   : > { %8479 = vrcp.f32 %v3560_v38 }
0x1bde   : > { %v8474_v2 = vpop.eup %8473 }
0x1bdf   : > { %v3441_v63 = vmul.f32 %v8474_v2, %v8462_v9  ;;  %v6860_v9 = vld [vmem:[%s10479_s8 + $0x11] ss:$0 sm:$0xff] }
0x1be0   : > { %v8276_v2 = vld [vmem:[%s10480_s9 + $0x50] sm:$0xff]  }
0x1be2   : > { %v8476_v5 = vpop.eup %8475 }
0x1be3   : > { %v3442_v13 = vmul.f32 %v8476_v5, %v8464_v20  ;;  %v8277_v5 = vld [vmem:[%s10480_s9 + $0x48] sm:$0xff]  }
0x1be5   : > { %v3446_v6 = vpack.c.bf16 %v3442_v13, %v3441_v63  ;;  %v8278_v63 = vld [vmem:[%s10480_s9 + $0x40] sm:$0xff]  }
0x1be6   : > { %v8478_v8 = vpop.eup %8477 }
0x1be7   : > { %7793 = vmatmul.mubr.msk.bf16.vlgmr.msra.gmra.mxu0 %vm959_vm15, %v3446_v6  ;;  %v3563_v33 = vmul.f32 %v8478_v8, %v8466_v22 }
0x1be8   : > { %7803 = vmatpush3.bf16.msra.mxu0 %v3573_v32  ;;  %7804 = vmatprep.mubr.msk.bf16.mxu0 %vm8642_vm0, %v8641_v1 }
0x1be9   : > { %7820 = vmatprep.subr.bf16.mxu0 %v8641_v1 }
0x1bea   : > { %v8480_v43 = vpop.eup %8479 }
0x1beb   : > { %v3564_v57 = vmul.f32 %v8480_v43, %v8470_v25 }
0x1bed   : > { %v3568_v35 = vpack.c.bf16 %v3564_v57, %v3563_v33 }
0x1bef   : > { %7805 = vmatmul.mubr.msk.bf16.vlgmr.msra.gmra.mxu0 %vm959_vm15, %v3568_v35 }
0x1bf0   : > { %7828 = vmatprep.mubr.msk.bf16.mxu0 %vm8642_vm0, %v8641_v1 }
0x1c17   : > { %v3367_v3 = vpop.f32.mrf.mxu0 }
0x1c18   : > { %v3368_v29 = vadd.f32 %v3367_v3, %v9611_v0  ;;  %v6866_v3 = vld [vmem:[%s10479_s8 + $0x16] ss:$0 sm:$0xff] }
0x1c19   : > { %v7782_v37 = vpop.f32.mrf.mxu0 }
0x1c1b   : > { %v3370_v17 = vpop.f32.mrf.mxu0 }
0x1c1c   : > { %v3371_v58 = vadd.f32 %v3370_v17, %v9613_v45 }
0x1c1d   : > { %v7783_v48 = vpop.f32.mrf.mxu0 }
0x1ca7   : > { %v3487_v54 = vpop.f32.mrf.mxu0 }
0x1ca8   : > { %v3494_v11 = vadd.f32 %v3487_v54, %v3368_v29  ;;  %v8279_v54 = vld [vmem:[%s10483_s12 + $0x58] sm:$0xff]  }
0x1ca9   : > { %v7794_v30 = vpop.f32.mrf.mxu0  ;;  %v8283_v29 = vld [vmem:[%s10482_s11 + $0xb8] sm:$0xff]  }
0x1cab   : > { %v3490_v41 = vpop.f32.mrf.mxu0 }
0x1cac   : > { %v3495_v60 = vadd.f32 %v3490_v41, %v3371_v58  ;;  %v8280_v41 = vld [vmem:[%s10483_s12 + $0x50] sm:$0xff]  }
0x1cad   : > { %v7795_v55 = vpop.f32.mrf.mxu0  ;;  %v8284_v58 = vld [vmem:[%s10482_s11 + $0xb0] sm:$0xff]  }
0x1cae   : > { %v8281_v55 = vld [vmem:[%s10483_s12 + $0x48] sm:$0xff]  }
0x1caf   : > { %v3609_v56 = vpop.f32.mrf.mxu0 }
0x1cb0   : > { %v3616_v36 = vadd.f32 %v3609_v56, %v3494_v11  ;;  %v8282_v56 = vld [vmem:[%s10483_s12 + $0x40] sm:$0xff]   ;;  %v8287_v11 = vld [vmem:[%s10482_s11 + $0x98] sm:$0xff]  }
0x1cb1   : > { %v7806_v59 = vpop.f32.mrf.mxu0 }
0x1cb2   : > { %v8286_v59 = vld [vmem:[%s10482_s11 + $0xa0] sm:$0xff]  }
0x1cb3   : > { %v3612_v31 = vpop.f32.mrf.mxu0 }
0x1cb4   : > { %v3617_v46 = vadd.f32 %v3612_v31, %v3495_v60  ;;  %v8288_v60 = vld [vmem:[%s10482_s11 + $0x90] sm:$0xff]   ;;  %v8289_v31 = vld [vmem:[%s10482_s11 + $0x88] sm:$0xff]  }
0x1cb5   : > { %v7807_v34 = vpop.f32.mrf.mxu0 }
0x1cb6   : > { %v3618_v4 = vpack.c.bf16 %v3617_v46, %v3616_v36  ;;  %v8290_v36 = vld [vmem:[%s10482_s11 + $0x80] sm:$0xff]  }
0x1cb7   : > { %v6876_v46 = vld [vmem:[%s10481_s10 + $0x2] ss:$0 sm:$0xff] }
0x1cb8   : > { %7817 = vmatmul.mubr.msk.bf16.vlgmr.msra.gmra.mxu1 %vm587_vm2, %v3618_v4 }
0x1cb9   : > { %7848 = vmatprep.mubr.msk.bf16.mxu1 %vm8642_vm0, %v8641_v1  ;;  %7833 = vmatpush3.bf16.msra.mxu1 %v8283_v29 }
0x1cba   : > { %7834 = vmatprep.subr.bf16.mxu1 %v8641_v1 }
0x1cbd   : > { %7835 = vmatpush3.bf16.msra.mxu1 %v8284_v58 }
0x1cbe   : > { %7836 = vmatprep.subr.bf16.mxu1 %v8641_v1 }
0x1d78   : > { %v3694_v0 = vpop.f32.mrf.mxu1 }
0x1d79   : > { %v3695_v19 = vadd.f32 %v6860_v9, %v3694_v0 }
0x1d7a   : > { %v7818_v45 = vpop.f32.mrf.mxu1 }
0x1d7b   : > { %v3701_v20 = vadd.f32 %v3695_v19, %v9484_v39 }
0x1d7c   : > { %v3697_v21 = vpop.f32.mrf.mxu1 }
0x1d7d   : > { %v3698_v22 = vadd.f32 %v6860_v9, %v3697_v21  ;;  %v3705_v23 = vsel %vm587_vm2, %v3701_v20, 0.0 }
0x1d7e   : > { %3706 = vadd.xlane.f32.xlu0 %v3705_v23  ;;  %v7819_v24 = vpop.f32.mrf.mxu1 }
0x1d7f   : > { %v3702_v25 = vadd.f32 %v3698_v22, %v9486_v47  ;;  %v8275_v47 = vld [vmem:[%s10480_s9 + $0x58] sm:$0xff]  }
0x1d80   : > { %7821 = vmatpush3.bf16.msra.mxu0 %v8275_v47 }
0x1d81   : > { %v3708_v26 = vsel %vm1490_vm3, %v3702_v25, 0.0  ;;  %7822 = vmatprep.subr.bf16.mxu0 %v8641_v1 }
0x1d82   : > { %3709 = vadd.xlane.f32.xlu1 %v3708_v26 }
0x1d84   : > { %7823 = vmatpush3.bf16.msra.mxu0 %v8276_v2 }
0x1d85   : > { %7824 = vmatprep.subr.bf16.mxu0 %v8641_v1 }
0x1d88   : > { %7825 = vmatpush3.bf16.msra.mxu0 %v8277_v5 }
0x1d89   : > { %7826 = vmatprep.subr.bf16.mxu0 %v8641_v1 }
0x1d8c   : > { %7827 = vmatpush3.bf16.msra.mxu0 %v8278_v63 }
0x1d8d   : > { %7852 = vmatprep.subr.bf16.mxu0 %v8641_v1 }
0x1e07   : > { %v3707_v27 = vpop.xlane.xlu0 %3706 }
0x1e08   : > { %v3711_v10 = vmul.f32 0.015625, %v3707_v27 }
0x1e0a   : > { %v3713_v42 = vsub.f32 %v3701_v20, %v3711_v10 }
0x1e0b   : > { %v3710_v7 = vpop.xlane.xlu1 %3709 }
0x1e0c   : > { %v3712_v12 = vmul.f32 0.015625, %v3710_v7  ;;  %v3715_v14 = vmul.f32 %v3713_v42, %v3713_v42 }
0x1e0e   : > { %v3714_v28 = vsub.f32 %v3702_v25, %v3712_v12  ;;  %v3717_v39 = vsel %vm587_vm2, %v3715_v14, 0.0 }
0x1e0f   : > { %3718 = vadd.xlane.f32.xlu0 %v3717_v39 }
0x1e10   : > { %v3716_v44 = vmul.f32 %v3714_v28, %v3714_v28 }
0x1e12   : > { %v3720_v38 = vsel %vm1490_vm3, %v3716_v44, 0.0 }
0x1e13   : > { %3721 = vadd.xlane.f32.xlu1 %v3720_v38 }
0x1e98   : > { %v3719_v13 = vpop.xlane.xlu0 %3718 }
0x1e99   : > { %v3723_v6 = vmul.f32 0.015625, %v3719_v13 }
0x1e9b   : > { %v3725_v32 = vadd.f32 1e-05, %v3723_v6 }
0x1e9c   : > { %v3722_v8 = vpop.xlane.xlu1 %3721 }
0x1e9d   : > { %8481 = vrsqrt.f32 %v3725_v32  ;;  %v3724_v43 = vmul.f32 0.015625, %v3722_v8  ;;  %v6898_v32 = vld [vmem:[%s10479_s8 + $0x20] ss:$0 sm:$0xff] }
0x1e9f   : > { %v3726_v33 = vadd.f32 1e-05, %v3724_v43 }
0x1ea1   : > { %8483 = vrsqrt.f32 %v3726_v33 }
0x1eaa   : > { %v8482_v57 = vpop.eup %8481 }
0x1eab   : > { %v3729_v35 = vmul.f32 %v8482_v57, %v3713_v42 }
0x1ead   : > { %v3735_v48 = vmul.f32 %v6866_v3, %v3729_v35 }
0x1eae   : > { %v8484_v37 = vpop.eup %8483 }
0x1eaf   : > { %v3730_v17 = vmul.f32 %v8484_v37, %v3714_v28  ;;  %v9696_v52 = vadd.f32 %v6867_v50, %v3735_v48 }
0x1eb1   : > { %v3736_v51 = vmul.f32 %v6866_v3, %v3730_v17 }
0x1eb3   : > { %v9698_v53 = vadd.f32 %v6867_v50, %v3736_v51 }
0x1eb5   : > { %v3743_v30 = vpack.c.bf16 %v9698_v53, %v9696_v52 }
0x1eb7   : > { %7829 = vmatmul.mubr.msk.bf16.vlgmr.msra.gmra.mxu0 %vm587_vm2, %v3743_v30 }
0x1eb8   : > { %7853 = vmatpush3.bf16.msra.mxu0 %v8279_v54  ;;  %7860 = vmatprep.mubr.msk.bf16.mxu0 %vm8642_vm0, %v8641_v1 }
0x1eb9   : > { %7854 = vmatprep.subr.bf16.mxu0 %v8641_v1 }
0x1ebc   : > { %7855 = vmatpush3.bf16.msra.mxu0 %v8280_v41 }
0x1ebd   : > { %7856 = vmatprep.subr.bf16.mxu0 %v8641_v1 }
0x1ec0   : > { %7857 = vmatpush3.bf16.msra.mxu0 %v8281_v55 }
0x1ec1   : > { %7858 = vmatprep.subr.bf16.mxu0 %v8641_v1 }
0x1ec4   : > { %7859 = vmatpush3.bf16.msra.mxu0 %v8282_v56 }
0x1ec5   : > { %7864 = vmatprep.subr.bf16.mxu0 %v8641_v1 }
0x1ec7   : > { %7861 = vmatmul.mubr.msk.bf16.vlgmr.msra.gmra.mxu0 %vm587_vm2, %v9493_v49  ;;  %v8285_v49 = vld [vmem:[%s10482_s11 + $0xa8] sm:$0xff]  }
0x1ec8   : > { %7872 = vmatprep.mubr.msk.bf16.mxu0 %vm8642_vm0, %v8641_v1  ;;  %7837 = vmatpush3.bf16.msra.mxu1 %v8285_v49 }
0x1ec9   : > { %7838 = vmatprep.subr.bf16.mxu1 %v8641_v1 }
0x1ecc   : > { %7839 = vmatpush3.bf16.msra.mxu1 %v8286_v59  ;;  %v8292_v59 = vld [vmem:[%s10483_s12 + $0x10] sm:$0xff]  }
0x1ecd   : > { %7840 = vmatprep.subr.bf16.mxu1 %v8641_v1 }
0x1ed0   : > { %7841 = vmatpush3.bf16.msra.mxu1 %v8287_v11  ;;  %v8293_v11 = vld [vmem:[%s10483_s12 + $0x8] sm:$0xff]  }
0x1ed1   : > { %7842 = vmatprep.subr.bf16.mxu1 %v8641_v1 }
0x1ed4   : > { %7843 = vmatpush3.bf16.msra.mxu1 %v8288_v60  ;;  %v8294_v60 = vld [vmem:[%s10483_s12] sm:$0xff]  }
0x1ed5   : > { %7844 = vmatprep.subr.bf16.mxu1 %v8641_v1 }
0x1ed8   : > { %7845 = vmatpush3.bf16.msra.mxu1 %v8289_v31  ;;  %v8295_v31 = vld [vmem:[%s10478_s7 + $0x78] sm:$0xff]  }
0x1ed9   : > { %7846 = vmatprep.subr.bf16.mxu1 %v8641_v1 }
0x1edc   : > { %7847 = vmatpush3.bf16.msra.mxu1 %v8290_v36  ;;  %v8297_v36 = vld [vmem:[%s10478_s7 + $0x70] sm:$0xff]  }
0x1edd   : > { %7876 = vmatprep.subr.bf16.mxu1 %v8641_v1 }
0x1f77   : > { %v3819_v34 = vpop.f32.mrf.mxu0 }
0x1f78   : > { %v3820_v4 = vadd.f32 %v6876_v46, %v3819_v34 }
0x1f79   : > { %v7830_v9 = vpop.f32.mrf.mxu0 }
0x1f7a   : > { %v3828_v0 = vmul.f32 0.044715, %v3820_v4  ;;  %v3826_v47 = vmul.f32 0.5, %v3820_v4 }
0x1f7b   : > { %v3822_v19 = vpop.f32.mrf.mxu0 }
0x1f7c   : > { %v3830_v45 = vmul.f32 %v3828_v0, %v3820_v4  ;;  %v3823_v20 = vadd.f32 %v6876_v46, %v3822_v19 }
0x1f7d   : > { %v7831_v21 = vpop.f32.mrf.mxu0 }
0x1f7e   : > { %v3832_v22 = vmul.f32 %v3830_v45, %v3820_v4  ;;  %v3829_v23 = vmul.f32 0.044715, %v3823_v20  ;;  %v3827_v2 = vmul.f32 0.5, %v3823_v20  ;;  %v6907_v21 = vld [vmem:[%s10479_s8 + $0x25] ss:$0 sm:$0xff] }
0x1f80   : > { %v3834_v24 = vadd.f32 %v3832_v22, %v3820_v4  ;;  %v3831_v25 = vmul.f32 %v3829_v23, %v3823_v20 }
0x1f82   : > { %v3836_v26 = vmul.f32 0.7978846, %v3834_v24  ;;  %v3833_v27 = vmul.f32 %v3831_v25, %v3823_v20  ;;  %v6908_v25 = vld [vmem:[%s10479_s8 + $0x2a] ss:$0 sm:$0xff] }
0x1f84   : > { %8485 = vtanh.f32 %v3836_v26  ;;  %v3835_v10 = vadd.f32 %v3833_v27, %v3823_v20 }
0x1f86   : > { %v3837_v42 = vmul.f32 0.7978846, %v3835_v10 }
0x1f87   : > { %v9760_v7 = vpop.f32.mrf.mxu0 }
0x1f88   : > { %8487 = vtanh.f32 %v3837_v42  ;;  %v8296_v42 = vld [vmem:[%s10478_s7 + $0x118] sm:$0xff]  }
0x1f89   : > { %v7862_v12 = vpop.f32.mrf.mxu0 }
0x1f8b   : > { %v9762_v14 = vpop.f32.mrf.mxu0 }
0x1f8d   : > { %v7863_v28 = vpop.f32.mrf.mxu0 }
0x1f8e   : > { %v8298_v28 = vld [vmem:[%s10478_s7 + $0x110] sm:$0xff]  }
0x1f91   : > { %v8486_v39 = vpop.eup %8485 }
0x1f92   : > { %v3840_v44 = vadd.f32 1.0, %v8486_v39  ;;  %v8299_v39 = vld [vmem:[%s10478_s7 + $0x68] sm:$0xff]  }
0x1f94   : > { %v3842_v63 = vmul.f32 %v3840_v44, %v3826_v47  ;;  %v8300_v44 = vld [vmem:[%s10478_s7 + $0x108] sm:$0xff]   ;;  %v8302_v47 = vld [vmem:[%s10478_s7 + $0x100] sm:$0xff]  }
0x1f95   : > { %v8488_v38 = vpop.eup %8487 }
0x1f96   : > { %v3841_v5 = vadd.f32 1.0, %v8488_v38  ;;  %v8301_v38 = vld [vmem:[%s10478_s7 + $0x60] sm:$0xff]  }
0x1f98   : > { %v3843_v13 = vmul.f32 %v3841_v5, %v3827_v2 }
0x1f9a   : > { %v3844_v6 = vpack.c.bf16 %v3843_v13, %v3842_v63  ;;  %v6927_v13 = vld [vmem:[%s10484_s13] ss:$0 sm:$0xff] }
0x1f9c   : > { %7849 = vmatmul.mubr.bf16.vlgmr.msra.gmra.mxu1 %v3844_v6 }
0x1f9d   : > { %7884 = vmatprep.mubr.msk.bf16.mxu1 %vm8642_vm0, %v8641_v1  ;;  %7877 = vmatpush3.bf16.msra.mxu1 %v8295_v31 }
0x1f9e   : > { %7878 = vmatprep.subr.bf16.mxu1 %v8641_v1 }
0x1fa1   : > { %7879 = vmatpush3.bf16.msra.mxu1 %v8297_v36 }
0x1fa2   : > { %7880 = vmatprep.subr.bf16.mxu1 %v8641_v1 }
0x1fa5   : > { %7881 = vmatpush3.bf16.msra.mxu1 %v8299_v39 }
0x1fa6   : > { %7882 = vmatprep.subr.bf16.mxu1 %v8641_v1 }
0x1fa9   : > { %7883 = vmatpush3.bf16.msra.mxu1 %v8301_v38 }
0x1faa   : > { %7900 = vmatprep.subr.bf16.mxu1 %v8641_v1 }
0x205c   : > { %v3949_v8 = vpop.f32.mrf.mxu1 }
0x205d   : > { %v3950_v43 = vadd.f32 %v6898_v32, %v3949_v8 }
0x205e   : > { %v7850_v33 = vpop.f32.mrf.mxu1 }
0x205f   : > { %v3956_v57 = vadd.f32 %v3950_v43, %v9696_v52 }
0x2060   : > { %v3952_v35 = vpop.f32.mrf.mxu1 }
0x2061   : > { %v3953_v3 = vadd.f32 %v6898_v32, %v3952_v35  ;;  %v3960_v37 = vsel %vm587_vm2, %v3956_v57, 0.0 }
0x2062   : > { %3961 = vadd.xlane.f32.xlu0 %v3960_v37  ;;  %v7851_v17 = vpop.f32.mrf.mxu1  ;;  %v6936_v37 = vld [vmem:[%s10479_s8 + $0x3] ss:$0 sm:$0xff] }
0x2063   : > { %v3957_v48 = vadd.f32 %v3953_v3, %v9698_v53  ;;  %v8291_v53 = vld [vmem:[%s10483_s12 + $0x18] sm:$0xff]   ;;  %v8306_v3 = vld [vmem:[%s10478_s7 + $0x1a0] sm:$0xff]  }
0x2064   : > { %7865 = vmatpush3.bf16.msra.mxu0 %v8291_v53 }
0x2065   : > { %v3963_v50 = vsel %vm1490_vm3, %v3957_v48, 0.0  ;;  %7866 = vmatprep.subr.bf16.mxu0 %v8641_v1 }
0x2066   : > { %3964 = vadd.xlane.f32.xlu1 %v3963_v50 }
0x2068   : > { %7867 = vmatpush3.bf16.msra.mxu0 %v8292_v59 }
0x2069   : > { %7868 = vmatprep.subr.bf16.mxu0 %v8641_v1 }
0x206c   : > { %7869 = vmatpush3.bf16.msra.mxu0 %v8293_v11 }
0x206d   : > { %7870 = vmatprep.subr.bf16.mxu0 %v8641_v1 }
0x2070   : > { %7871 = vmatpush3.bf16.msra.mxu0 %v8294_v60 }
0x2071   : > { %7888 = vmatprep.subr.bf16.mxu0 %v8641_v1 }
0x20eb   : > { %v3962_v51 = vpop.xlane.xlu0 %3961 }
0x20ec   : > { %v3966_v54 = vmul.f32 0.015625, %v3962_v51 }
0x20ee   : > { %v3968_v30 = vsub.f32 %v3956_v57, %v3966_v54  ;;  %v8303_v57 = vld [vmem:[%s10478_s7 + $0x1b8] sm:$0xff]  }
0x20ef   : > { %v3965_v41 = vpop.xlane.xlu1 %3964 }
0x20f0   : > { %v3967_v55 = vmul.f32 0.015625, %v3965_v41  ;;  %v3970_v56 = vmul.f32 %v3968_v30, %v3968_v30 }
0x20f2   : > { %v3969_v29 = vsub.f32 %v3957_v48, %v3967_v55  ;;  %v3972_v52 = vsel %vm587_vm2, %v3970_v56, 0.0 }
0x20f3   : > { %3973 = vadd.xlane.f32.xlu0 %v3972_v52 }
0x20f4   : > { %v3971_v58 = vmul.f32 %v3969_v29, %v3969_v29 }
0x20f6   : > { %v3975_v49 = vsel %vm1490_vm3, %v3971_v58, 0.0 }
0x20f7   : > { %3976 = vadd.xlane.f32.xlu1 %v3975_v49 }
0x217c   : > { %v3974_v46 = vpop.xlane.xlu0 %3973 }
0x217d   : > { %v3978_v34 = vmul.f32 0.015625, %v3974_v46 }
0x217f   : > { %v3980_v4 = vadd.f32 1e-05, %v3978_v34 }
0x2180   : > { %v3977_v9 = vpop.xlane.xlu1 %3976 }
0x2181   : > { %8489 = vrsqrt.f32 %v3980_v4  ;;  %v3979_v0 = vmul.f32 0.015625, %v3977_v9 }
0x2183   : > { %v3981_v19 = vadd.f32 1e-05, %v3979_v0  ;;  %v6964_v0 = vld [vmem:[%s10479_s8 + $0xd] ss:$0 sm:$0xff] }
0x2185   : > { %8491 = vrsqrt.f32 %v3981_v19 }
0x218e   : > { %v8490_v45 = vpop.eup %8489 }
0x218f   : > { %v3984_v20 = vmul.f32 %v8490_v45, %v3968_v30  ;;  %v6950_v30 = vld [vmem:[%s10479_s8 + $0x8] ss:$0 sm:$0xff] }
0x2191   : > { %v3990_v24 = vmul.f32 %v6907_v21, %v3984_v20 }
0x2192   : > { %v8492_v22 = vpop.eup %8491 }
0x2193   : > { %v3985_v23 = vmul.f32 %v8492_v22, %v3969_v29  ;;  %v3996_v27 = vadd.f32 %v6908_v25, %v3990_v24 }
0x2195   : > { %v3991_v26 = vmul.f32 %v6907_v21, %v3985_v23 }
0x2197   : > { %v3997_v10 = vadd.f32 %v6908_v25, %v3991_v26 }
0x2199   : > { %v3998_v12 = vpack.c.bf16 %v3997_v10, %v3996_v27 }
0x219b   : > { %7873 = vmatmul.mubr.msk.bf16.vlgmr.msra.gmra.mxu0 %vm587_vm2, %v3998_v12 }
0x219c   : > { %7889 = vmatpush3.bf16.msra.mxu0 %v8296_v42  ;;  %7896 = vmatprep.mubr.msk.bf16.mxu0 %vm8642_vm0, %v8641_v1 }
0x219d   : > { %7890 = vmatprep.subr.bf16.mxu0 %v8641_v1 }
0x21a0   : > { %7891 = vmatpush3.bf16.msra.mxu0 %v8298_v28 }
0x21a1   : > { %7892 = vmatprep.subr.bf16.mxu0 %v8641_v1 }
0x21a4   : > { %7893 = vmatpush3.bf16.msra.mxu0 %v8300_v44 }
0x21a5   : > { %7894 = vmatprep.subr.bf16.mxu0 %v8641_v1 }
0x21a8   : > { %7895 = vmatpush3.bf16.msra.mxu0 %v8302_v47 }
0x21a9   : > { %7912 = vmatprep.subr.bf16.mxu0 %v8641_v1 }
0x225b   : > { %v4142_v2 = vpop.f32.mrf.mxu0 }
0x225c   : > { %v4143_v63 = vadd.f32 %v4142_v2, %v9760_v7  ;;  %v8304_v7 = vld [vmem:[%s10478_s7 + $0x1b0] sm:$0xff]  }
0x225d   : > { %v7874_v5 = vpop.f32.mrf.mxu0 }
0x225e   : > { %v9837_v43 = vadd.f32 %v6927_v13, %v4143_v63 }
0x225f   : > { %v4145_v6 = vpop.f32.mrf.mxu0 }
0x2260   : > { %v4146_v32 = vadd.f32 %v4145_v6, %v9762_v14  ;;  %v8305_v14 = vld [vmem:[%s10478_s7 + $0x1a8] sm:$0xff]  }
0x2261   : > { %v7875_v8 = vpop.f32.mrf.mxu0 }
0x2262   : > { %v9839_v33 = vadd.f32 %v6927_v13, %v4146_v32 }
0x2264   : > { %v4156_v35 = vpack.c.bf16 %v9839_v33, %v9837_v43 }
0x2266   : > { %7885 = vmatmul.mubr.msk.bf16.vlgmr.msra.gmra.mxu1 %vm587_vm2, %v4156_v35  ;;  %7897 = vmatmul.mubr.msk.bf16.vlgmr.msra.gmra.mxu0 %vm587_vm2, %v4156_v35 }
0x2267   : > { %7901 = vmatpush3.bf16.msra.mxu1 %v8303_v57  ;;  %7908 = vmatprep.mubr.msk.bf16.mxu1 %vm8642_vm0, %v8641_v1 }
0x2268   : > { %7902 = vmatprep.subr.bf16.mxu1 %v8641_v1  ;;  %7914 = vmatprep.mubr.msk.bf16.mxu0 %vm8642_vm0, %v8641_v1 }
0x226b   : > { %7903 = vmatpush3.bf16.msra.mxu1 %v8304_v7 }
0x226c   : > { %7904 = vmatprep.subr.bf16.mxu1 %v8641_v1 }
0x226f   : > { %7905 = vmatpush3.bf16.msra.mxu1 %v8305_v14 }
0x2270   : > { %7906 = vmatprep.subr.bf16.mxu1 %v8641_v1 }
0x2273   : > { %7907 = vmatpush3.bf16.msra.mxu1 %v8306_v3 }
0x2274   : > { %7924 = vmatprep.subr.bf16.mxu1 %v8641_v1 }
0x2276   : > { %7909 = vmatmul.mubr.msk.bf16.vlgmr.msra.gmra.mxu1 %vm587_vm2, %v4156_v35 }
0x2277   : > { %7926 = vmatprep.mubr.msk.bf16.mxu1 %vm8642_vm0, %v8641_v1 }
0x2326   : > { %v4232_v17 = vpop.f32.mrf.mxu1  ;;  %v4311_v48 = vpop.f32.mrf.mxu0 }
0x2327   : > { %v4233_v54 = vadd.f32 %v6936_v37, %v4232_v17  ;;  %v4312_v52 = vadd.f32 %v6950_v30, %v4311_v48 }
0x2328   : > { %v7886_v50 = vpop.f32.mrf.mxu1  ;;  %v7898_v51 = vpop.f32.mrf.mxu0 }
0x2329   : > { %v9875_v53 = vmul.f32 %v4233_v54, %v8901_v61  ;;  %v9878_v59 = vmul.f32 %v4233_v54, %v8904_v62  ;;  %v4398_v9 = vmul.f32 %v4233_v54, %v8926_v15  ;;  %v4474_v24 = vmul.f32 %v4233_v54, %v8929_v16 }
0x232a   : > { %v4235_v41 = vpop.f32.mrf.mxu1  ;;  %v4314_v55 = vpop.f32.mrf.mxu0 }
0x232b   : > { %v4236_v56 = vadd.f32 %v6936_v37, %v4235_v41  ;;  %v4315_v29 = vadd.f32 %v6950_v30, %v4314_v55 }
0x232c   : > { %v7887_v58 = vpop.f32.mrf.mxu1  ;;  %v7899_v49 = vpop.f32.mrf.mxu0 }
0x232d   : > { %v9881_v11 = vmul.f32 %v4236_v56, %v8901_v61  ;;  %v9884_v60 = vmul.f32 %v4236_v56, %v8904_v62  ;;  %v4397_v31 = vpack.c.bf16 %v4315_v29, %v4312_v52  ;;  %v4399_v4 = vmul.f32 %v4236_v56, %v8926_v15 }
0x232e   : > { %v4475_v22 = vmul.f32 %v4236_v56, %v8929_v16 }
0x232f   : > { %v4643_v36 = vpack.c.bf16 %v9881_v11, %v9875_v53  ;;  %v4765_v46 = vpack.c.bf16 %v9884_v60, %v9878_v59  ;;  %v9891_v34 = vsel %vm587_vm2, %v4397_v31, 0  ;;  %v4400_v19 = vpack.c.bf16 %v4399_v4, %v4398_v9 }
0x2330   : > { %7913 = vmatpush3.bf16.xpose.msra.mxu0 %v9891_v34  ;;  %v4476_v47 = vpack.c.bf16 %v4475_v22, %v4474_v24 }
0x2331   : > { %7918 = vmatprep.subr.bf16.mxu0 %v8641_v1 }
0x2336   : > { %v4390_v45 = vpop.f32.mrf.mxu1 }
0x2337   : > { %v4391_v20 = vadd.f32 %v6964_v0, %v4390_v45  ;;  %7915 = vmatmul.mubr.msk.bf16.vlgmr.msra.gmra.mxu0 %vm587_vm2, %v4400_v19 }
0x2338   : > { %v7910_v21 = vpop.f32.mrf.mxu1  ;;  %7919 = vmatpush3.bf16.xpose.msra.mxu0 %v9891_v34  ;;  %7920 = vmatprep.mubr.msk.bf16.mxu0 %vm8642_vm0, %v8641_v1 }
0x2339   : > { %7930 = vmatprep.subr.bf16.mxu0 %v8641_v1  ;;  %v4470_v26 = vmul.f32 %v4391_v20, %v8926_v15  ;;  %v4543_v27 = vmul.f32 %v4391_v20, %v8929_v16  ;;  %v9910_v10 = vmul.f32 %v4391_v20, %v8901_v61  ;;  %v9913_v42 = vmul.f32 %v4391_v20, %v8904_v62 }
0x233a   : > { %v4393_v23 = vpop.f32.mrf.mxu1 }
0x233b   : > { %v4394_v25 = vadd.f32 %v6964_v0, %v4393_v23 }
0x233c   : > { %v7911_v12 = vpop.f32.mrf.mxu1 }
0x233d   : > { %v4471_v28 = vmul.f32 %v4394_v25, %v8926_v15  ;;  %v4544_v39 = vmul.f32 %v4394_v25, %v8929_v16  ;;  %v9918_v44 = vmul.f32 %v4394_v25, %v8901_v61  ;;  %v9921_v38 = vmul.f32 %v4394_v25, %v8904_v62 }
0x233f   : > { %v4545_v2 = vpack.c.bf16 %v4544_v39, %v4543_v27  ;;  %v4472_v5 = vpack.c.bf16 %v4471_v28, %v4470_v26  ;;  %v4712_v63 = vpack.c.bf16 %v9918_v44, %v9910_v10  ;;  %v4834_v13 = vpack.c.bf16 %v9921_v38, %v9913_v42  ;;  %7921 = vmatmul.mubr.msk.bf16.vlgmr.msra.gmra.mxu0 %vm587_vm2, %v4476_v47 }
0x2340   : > { %7932 = vmatprep.mubr.msk.bf16.mxu0 %vm8642_vm0, %v8641_v1 }
0x2341   : > { %v4551_v6 = vand.u32 %v4545_v2, %v8966_v40  ;;  %v4598_v32 = vand.u32 %v4472_v5, %v8966_v40 }
0x2343   : > { %7925 = vmatpush3.bf16.msra.mxu1 %v4551_v6  ;;  %7931 = vmatpush3.bf16.msra.mxu0 %v4598_v32 }
0x2344   : > { %7936 = vmatprep.subr.bf16.mxu1 %v8641_v1  ;;  %7942 = vmatprep.subr.bf16.mxu0 %v8641_v1 }
0x23f7   : > { %v4441_v8 = vpop.f32.mrf.mxu0 }
0x23f8   : > { %v4448_v49 = vsel %vm959_vm15, %v4441_v8, -inf }
0x23f9   : > { %v7916_v57 = vpop.f32.mrf.mxu0 }
0x23fb   : > { %v4444_v35 = vpop.f32.mrf.mxu0 }
0x23fc   : > { %v4451_v4 = vsel %vm963_vm1, %v4444_v35, -inf }
0x23fd   : > { %v7917_v7 = vpop.f32.mrf.mxu0 }
0x23ff   : > { %v4514_v14 = vpop.f32.mrf.mxu0 }
0x2400   : > { %v4521_v3 = vsel %vm959_vm15, %v4514_v14, -inf }
0x2401   : > { %4522 = vmax.xlane.f32.xlu0 %v4521_v3  ;;  %v7922_v37 = vpop.f32.mrf.mxu0 }
0x2403   : > { %v4517_v17 = vpop.f32.mrf.mxu0 }
0x2404   : > { %v4524_v48 = vsel %vm963_vm1, %v4517_v17, -inf }
0x2405   : > { %4525 = vmax.xlane.f32.xlu1 %v4524_v48  ;;  %v7923_v50 = vpop.f32.mrf.mxu0 }
0x248a   : > { %v4523_v51 = vpop.xlane.xlu0 %4522 }
0x248b   : > { %v4527_v54 = vsub.f32 %v4514_v14, %v4523_v51 }
0x248d   : > { %v4529_v30 = vmul.f32 1.442695, %v4527_v54 }
0x248e   : > { %v4526_v41 = vpop.xlane.xlu1 %4525 }
0x248f   : > { %8493 = vpow2.f32 %v4529_v30  ;;  %v4528_v55 = vsub.f32 %v4517_v17, %v4526_v41 }
0x2491   : > { %v4531_v56 = vmul.f32 1.442695, %v4528_v55 }
0x2493   : > { %8495 = vpow2.f32 %v4531_v56 }
0x249c   : > { %v8494_v29 = vpop.eup %8493 }
0x249d   : > { %v4533_v52 = vsel %vm959_vm15, %v8494_v29, 0.0 }
0x249e   : > { %4534 = vadd.xlane.f32.xlu0 %v4533_v52 }
0x24a0   : > { %v8496_v58 = vpop.eup %8495 }
0x24a1   : > { %v4536_v31 = vsel %vm963_vm1, %v8496_v58, 0.0 }
0x24a2   : > { %4449 = vmax.xlane.f32.xlu0 %v4448_v49  ;;  %4537 = vadd.xlane.f32.xlu1 %v4536_v31 }
0x24a6   : > { %4452 = vmax.xlane.f32.xlu1 %v4451_v4 }
0x2527   : > { %v4535_v9 = vpop.xlane.xlu0 %4534 }
0x2528   : > { %8497 = vrcp.f32 %v4535_v9 }
0x252b   : > { %v4538_v0 = vpop.xlane.xlu1 %4537  ;;  %v4450_v23 = vpop.xlane.xlu0 %4449 }
0x252c   : > { %8499 = vrcp.f32 %v4538_v0  ;;  %v4454_v24 = vsub.f32 %v4441_v8, %v4450_v23 }
0x252f   : > { %v4453_v53 = vpop.xlane.xlu1 %4452 }
0x2535   : > { %v8498_v19 = vpop.eup %8497 }
0x2536   : > { %v4541_v20 = vmul.f32 %v8498_v19, %v8494_v29 }
0x2539   : > { %v8500_v45 = vpop.eup %8499 }
0x253a   : > { %v4542_v21 = vmul.f32 %v8500_v45, %v8496_v58 }
0x253c   : > { %v4546_v22 = vpack.c.bf16 %v4542_v21, %v4541_v20 }
0x253e   : > { %7927 = vmatmul.mubr.msk.bf16.vlgmr.msra.gmra.mxu1 %vm959_vm15, %v4546_v22 }
0x253f   : > { %7937 = vmatpush3.bf16.xpose.msra.mxu1 %v9891_v34  ;;  %7938 = vmatprep.mubr.msk.bf16.mxu1 %vm8642_vm0, %v8641_v1 }
0x2540   : > { %7948 = vmatprep.subr.bf16.mxu1 %v8641_v1 }
0x2546   : > { %7939 = vmatmul.mubr.msk.bf16.vlgmr.msra.gmra.mxu1 %vm587_vm2, %v4643_v36  ;;  %v4456_v36 = vmul.f32 1.442695, %v4454_v24 }
0x2547   : > { %7949 = vmatpush3.bf16.xpose.msra.mxu1 %v9891_v34  ;;  %7950 = vmatprep.mubr.msk.bf16.mxu1 %vm8642_vm0, %v8641_v1  ;;  %v4455_v34 = vsub.f32 %v4444_v35, %v4453_v53 }
0x2548   : > { %7960 = vmatprep.subr.bf16.mxu1 %v8641_v1  ;;  %8501 = vpow2.f32 %v4456_v36 }
0x2549   : > { %v4458_v27 = vmul.f32 1.442695, %v4455_v34  ;;  %v4718_v34 = vand.u32 %v4712_v63, %v8966_v40 }
0x254b   : > { %8503 = vpow2.f32 %v4458_v27 }
0x254e   : > { %7951 = vmatmul.mubr.msk.bf16.vlgmr.msra.gmra.mxu1 %vm587_vm2, %v4765_v46 }
0x254f   : > { %7968 = vmatprep.mubr.msk.bf16.mxu1 %vm8642_vm0, %v8641_v1 }
0x2555   : > { %v8502_v6 = vpop.eup %8501 }
0x2556   : > { %v4460_v57 = vsel %vm959_vm15, %v8502_v6, 0.0 }
0x2558   : > { %v8504_v7 = vpop.eup %8503 }
0x2559   : > { %v4463_v3 = vsel %vm963_vm1, %v8504_v7, 0.0 }
0x25fe   : > { %v9959_v11 = vpop.f32.mrf.mxu1 }
0x2600   : > { %v7928_v25 = vpop.f32.mrf.mxu1 }
0x2602   : > { %v9961_v26 = vpop.f32.mrf.mxu1 }
0x2604   : > { %v7929_v12 = vpop.f32.mrf.mxu1 }
0x2606   : > { %v4681_v28 = vpop.f32.mrf.mxu1 }
0x2607   : > { %v4688_v59 = vsel %vm959_vm15, %v4681_v28, -inf }
0x2608   : > { %4689 = vmax.xlane.f32.xlu0 %v4688_v59  ;;  %v7940_v60 = vpop.f32.mrf.mxu1 }
0x260a   : > { %v4684_v46 = vpop.f32.mrf.mxu1 }
0x260b   : > { %v4691_v39 = vsel %vm963_vm1, %v4684_v46, -inf }
0x260c   : > { %4692 = vmax.xlane.f32.xlu1 %v4691_v39  ;;  %v7941_v47 = vpop.f32.mrf.mxu1 }
0x260e   : > { %v4803_v2 = vpop.f32.mrf.mxu1 }
0x260f   : > { %v4810_v5 = vsel %vm959_vm15, %v4803_v2, -inf }
0x2610   : > { %4811 = vmax.xlane.f32.xlu0 %v4810_v5  ;;  %v7952_v32 = vpop.f32.mrf.mxu1 }
0x2612   : > { %v4806_v8 = vpop.f32.mrf.mxu1 }
0x2613   : > { %v4813_v35 = vsel %vm963_vm1, %v4806_v8, -inf }
0x2614   : > { %4461 = vadd.xlane.f32.xlu0 %v4460_v57  ;;  %4814 = vmax.xlane.f32.xlu1 %v4813_v35  ;;  %v7953_v14 = vpop.f32.mrf.mxu1  ;;  %v8308_v57 = vld [vmem:[%s10478_s7 + $0x250] sm:$0xff]   ;;  %v8309_v35 = vld [vmem:[%s10478_s7 + $0x248] sm:$0xff]  }
0x2618   : > { %4464 = vadd.xlane.f32.xlu1 %v4463_v3 }
0x2691   : > { %v4690_v37 = vpop.xlane.xlu0 %4689 }
0x2692   : > { %v4694_v17 = vsub.f32 %v4681_v28, %v4690_v37 }
0x2694   : > { %v4696_v48 = vmul.f32 1.442695, %v4694_v17 }
0x2695   : > { %v4693_v50 = vpop.xlane.xlu1 %4692 }
0x2696   : > { %8505 = vpow2.f32 %v4696_v48  ;;  %v4695_v51 = vsub.f32 %v4684_v46, %v4693_v50  ;;  %v4840_v46 = vand.u32 %v4834_v13, %v8966_v40 }
0x2698   : > { %v4698_v54 = vmul.f32 1.442695, %v4695_v51 }
0x2699   : > { %v4812_v30 = vpop.xlane.xlu0 %4811 }
0x269a   : > { %8507 = vpow2.f32 %v4698_v54  ;;  %v4816_v41 = vsub.f32 %v4803_v2, %v4812_v30 }
0x269c   : > { %v4818_v55 = vmul.f32 1.442695, %v4816_v41 }
0x269d   : > { %v4815_v56 = vpop.xlane.xlu1 %4814  ;;  %v4462_v29 = vpop.xlane.xlu0 %4461 }
0x269e   : > { %8509 = vpow2.f32 %v4818_v55  ;;  %v4817_v52 = vsub.f32 %v4806_v8, %v4815_v56  ;;  %v8307_v8 = vld [vmem:[%s10478_s7 + $0x258] sm:$0xff]  }
0x269f   : > { %8511 = vrcp.f32 %v4462_v29  ;;  %7961 = vmatpush3.bf16.msra.mxu1 %v8307_v8 }
0x26a0   : > { %v4820_v58 = vmul.f32 1.442695, %v4817_v52  ;;  %7962 = vmatprep.subr.bf16.mxu1 %v8641_v1 }
0x26a1   : > { %v4465_v49 = vpop.xlane.xlu1 %4464 }
0x26a2   : > { %8513 = vpow2.f32 %v4820_v58 }
0x26a3   : > { %v8506_v31 = vpop.eup %8505  ;;  %8515 = vrcp.f32 %v4465_v49  ;;  %7963 = vmatpush3.bf16.msra.mxu1 %v8308_v57  ;;  %v6986_v49 = vld [vmem:[%s10479_s8 + $0x12] ss:$0 sm:$0xff] }
0x26a4   : > { %v4700_v4 = vsel %vm959_vm15, %v8506_v31, 0.0  ;;  %7964 = vmatprep.subr.bf16.mxu1 %v8641_v1 }
0x26a5   : > { %4701 = vadd.xlane.f32.xlu0 %v4700_v4 }
0x26a7   : > { %v8508_v9 = vpop.eup %8507  ;;  %7965 = vmatpush3.bf16.msra.mxu1 %v8309_v35 }
0x26a8   : > { %v4703_v0 = vsel %vm963_vm1, %v8508_v9, 0.0  ;;  %7966 = vmatprep.subr.bf16.mxu1 %v8641_v1 }
0x26a9   : > { %4704 = vadd.xlane.f32.xlu1 %v4703_v0 }
0x26ab   : > { %v8510_v19 = vpop.eup %8509 }
0x26ac   : > { %v4822_v45 = vsel %vm959_vm15, %v8510_v19, 0.0  ;;  %v8512_v20 = vpop.eup %8511 }
0x26ad   : > { %4823 = vadd.xlane.f32.xlu0 %v4822_v45  ;;  %v4468_v24 = vmul.f32 %v8512_v20, %v8502_v6 }
0x26af   : > { %v8514_v21 = vpop.eup %8513 }
0x26b0   : > { %v8516_v22 = vpop.eup %8515  ;;  %v4825_v23 = vsel %vm963_vm1, %v8514_v21, 0.0 }
0x26b1   : > { %v4469_v53 = vmul.f32 %v8516_v22, %v8504_v7  ;;  %4826 = vadd.xlane.f32.xlu1 %v4825_v23  ;;  %v8310_v7 = vld [vmem:[%s10478_s7 + $0x240] sm:$0xff]  }
0x26b2   : > { %7967 = vmatpush3.bf16.msra.mxu1 %v8310_v7  ;;  %v8315_v7 = vld [vmem:[%s10483_s12 + $0x78] sm:$0xff]  }
0x26b3   : > { %v4473_v36 = vpack.c.bf16 %v4469_v53, %v4468_v24  ;;  %7984 = vmatprep.subr.bf16.mxu1 %v8641_v1 }
0x26b5   : > { %7933 = vmatmul.mubr.msk.bf16.vlgmr.msra.gmra.mxu0 %vm959_vm15, %v4473_v36 }
0x26b6   : > { %7943 = vmatpush3.bf16.msra.mxu0 %v4718_v34  ;;  %7944 = vmatprep.mubr.msk.bf16.mxu0 %vm8642_vm0, %v8641_v1 }
0x26b7   : > { %7954 = vmatprep.subr.bf16.mxu0 %v8641_v1 }
0x272e   : > { %v4702_v25 = vpop.xlane.xlu0 %4701 }
0x272f   : > { %8517 = vrcp.f32 %v4702_v25 }
0x2732   : > { %v4705_v27 = vpop.xlane.xlu1 %4704 }
0x2733   : > { %8519 = vrcp.f32 %v4705_v27 }
0x2736   : > { %v4824_v12 = vpop.xlane.xlu0 %4823 }
0x2737   : > { %8521 = vrcp.f32 %v4824_v12 }
0x273a   : > { %v4827_v28 = vpop.xlane.xlu1 %4826 }
0x273b   : > { %8523 = vrcp.f32 %v4827_v28  ;;  %v8312_v28 = vld [vmem:[%s10480_s9 + $0x70] sm:$0xff]  }
0x273c   : > { %v8518_v59 = vpop.eup %8517 }
0x273d   : > { %v4708_v10 = vmul.f32 %v8518_v59, %v8506_v31  ;;  %v8313_v59 = vld [vmem:[%s10480_s9 + $0x68] sm:$0xff]  }
0x2740   : > { %v8520_v60 = vpop.eup %8519 }
0x2741   : > { %v4709_v44 = vmul.f32 %v8520_v60, %v8508_v9  ;;  %v8314_v60 = vld [vmem:[%s10480_s9 + $0x60] sm:$0xff]  }
0x2743   : > { %v4713_v63 = vpack.c.bf16 %v4709_v44, %v4708_v10 }
0x2744   : > { %v8522_v39 = vpop.eup %8521 }
0x2745   : > { %7945 = vmatmul.mubr.msk.bf16.vlgmr.msra.gmra.mxu0 %vm959_vm15, %v4713_v63  ;;  %v4830_v2 = vmul.f32 %v8522_v39, %v8510_v19 }
0x2746   : > { %7955 = vmatpush3.bf16.msra.mxu0 %v4840_v46  ;;  %7956 = vmatprep.mubr.msk.bf16.mxu0 %vm8642_vm0, %v8641_v1 }
0x2747   : > { %7972 = vmatprep.subr.bf16.mxu0 %v8641_v1 }
0x2748   : > { %v8524_v47 = vpop.eup %8523 }
0x2749   : > { %v4831_v5 = vmul.f32 %v8524_v47, %v8514_v21 }
0x274b   : > { %v4835_v6 = vpack.c.bf16 %v4831_v5, %v4830_v2 }
0x274d   : > { %7957 = vmatmul.mubr.msk.bf16.vlgmr.msra.gmra.mxu0 %vm959_vm15, %v4835_v6  ;;  %v6992_v6 = vld [vmem:[%s10479_s8 + $0x17] ss:$0 sm:$0xff] }
0x274e   : > { %7980 = vmatprep.mubr.msk.bf16.mxu0 %vm8642_vm0, %v8641_v1 }
0x2775   : > { %v4634_v42 = vpop.f32.mrf.mxu0 }
0x2776   : > { %v4635_v50 = vadd.f32 %v4634_v42, %v9959_v11 }
0x2777   : > { %v7934_v38 = vpop.f32.mrf.mxu0 }
0x2779   : > { %v4637_v13 = vpop.f32.mrf.mxu0 }
0x277a   : > { %v4638_v51 = vadd.f32 %v4637_v13, %v9961_v26 }
0x277b   : > { %v7935_v32 = vpop.f32.mrf.mxu0 }
0x277c   : > { %v6993_v32 = vld [vmem:[%s10479_s8 + $0x1c] ss:$0 sm:$0xff] }
0x2805   : > { %v4754_v14 = vpop.f32.mrf.mxu0 }
0x2806   : > { %v4761_v30 = vadd.f32 %v4754_v14, %v4635_v50  ;;  %v8320_v50 = vld [vmem:[%s10482_s11 + $0xf0] sm:$0xff]  }
0x2807   : > { %v7946_v3 = vpop.f32.mrf.mxu0 }
0x2808   : > { %v8316_v3 = vld [vmem:[%s10483_s12 + $0x70] sm:$0xff]  }
0x2809   : > { %v4757_v37 = vpop.f32.mrf.mxu0 }
0x280a   : > { %v4762_v41 = vadd.f32 %v4757_v37, %v4638_v51  ;;  %v8317_v37 = vld [vmem:[%s10483_s12 + $0x68] sm:$0xff]   ;;  %v8322_v51 = vld [vmem:[%s10482_s11 + $0xe0] sm:$0xff]  }
0x280b   : > { %v7947_v17 = vpop.f32.mrf.mxu0 }
0x280c   : > { %v8318_v17 = vld [vmem:[%s10483_s12 + $0x60] sm:$0xff]  }
0x280d   : > { %v4876_v48 = vpop.f32.mrf.mxu0 }
0x280e   : > { %v4883_v56 = vadd.f32 %v4876_v48, %v4761_v30  ;;  %v8319_v48 = vld [vmem:[%s10482_s11 + $0xf8] sm:$0xff]   ;;  %v8324_v30 = vld [vmem:[%s10482_s11 + $0xd0] sm:$0xff]  }
0x280f   : > { %v7958_v54 = vpop.f32.mrf.mxu0 }
0x2810   : > { %v8323_v54 = vld [vmem:[%s10482_s11 + $0xd8] sm:$0xff]  }
0x2811   : > { %v4879_v55 = vpop.f32.mrf.mxu0 }
0x2812   : > { %v4884_v29 = vadd.f32 %v4879_v55, %v4762_v41  ;;  %v8325_v41 = vld [vmem:[%s10482_s11 + $0xc8] sm:$0xff]   ;;  %v8326_v55 = vld [vmem:[%s10482_s11 + $0xc0] sm:$0xff]  }
0x2813   : > { %v7959_v52 = vpop.f32.mrf.mxu0 }
0x2814   : > { %v4885_v58 = vpack.c.bf16 %v4884_v29, %v4883_v56  ;;  %v7002_v56 = vld [vmem:[%s10481_s10 + $0x3] ss:$0 sm:$0xff] }
0x2816   : > { %7969 = vmatmul.mubr.msk.bf16.vlgmr.msra.gmra.mxu1 %vm587_vm2, %v4885_v58 }
0x2817   : > { %8000 = vmatprep.mubr.msk.bf16.mxu1 %vm8642_vm0, %v8641_v1  ;;  %7985 = vmatpush3.bf16.msra.mxu1 %v8319_v48 }
0x2818   : > { %7986 = vmatprep.subr.bf16.mxu1 %v8641_v1 }
0x281b   : > { %7987 = vmatpush3.bf16.msra.mxu1 %v8320_v50 }
0x281c   : > { %7988 = vmatprep.subr.bf16.mxu1 %v8641_v1 }
0x28d6   : > { %v4961_v11 = vpop.f32.mrf.mxu1 }
0x28d7   : > { %v4962_v31 = vadd.f32 %v6986_v49, %v4961_v11 }
0x28d8   : > { %v7970_v26 = vpop.f32.mrf.mxu1 }
0x28d9   : > { %v4968_v4 = vadd.f32 %v4962_v31, %v9837_v43 }
0x28da   : > { %v4964_v9 = vpop.f32.mrf.mxu1 }
0x28db   : > { %v4965_v0 = vadd.f32 %v6986_v49, %v4964_v9  ;;  %v4972_v19 = vsel %vm587_vm2, %v4968_v4, 0.0 }
0x28dc   : > { %4973 = vadd.xlane.f32.xlu0 %v4972_v19  ;;  %v7971_v45 = vpop.f32.mrf.mxu1 }
0x28dd   : > { %v4969_v20 = vadd.f32 %v4965_v0, %v9839_v33  ;;  %v8311_v33 = vld [vmem:[%s10480_s9 + $0x78] sm:$0xff]  }
0x28de   : > { %7973 = vmatpush3.bf16.msra.mxu0 %v8311_v33 }
0x28df   : > { %v4975_v21 = vsel %vm1490_vm3, %v4969_v20, 0.0  ;;  %7974 = vmatprep.subr.bf16.mxu0 %v8641_v1 }
0x28e0   : > { %4976 = vadd.xlane.f32.xlu1 %v4975_v21 }
0x28e2   : > { %7975 = vmatpush3.bf16.msra.mxu0 %v8312_v28 }
0x28e3   : > { %7976 = vmatprep.subr.bf16.mxu0 %v8641_v1 }
0x28e6   : > { %7977 = vmatpush3.bf16.msra.mxu0 %v8313_v59 }
0x28e7   : > { %7978 = vmatprep.subr.bf16.mxu0 %v8641_v1 }
0x28ea   : > { %7979 = vmatpush3.bf16.msra.mxu0 %v8314_v60 }
0x28eb   : > { %8004 = vmatprep.subr.bf16.mxu0 %v8641_v1 }
0x2965   : > { %v4974_v22 = vpop.xlane.xlu0 %4973 }
0x2966   : > { %v4978_v23 = vmul.f32 0.015625, %v4974_v22 }
0x2968   : > { %v4980_v24 = vsub.f32 %v4968_v4, %v4978_v23 }
0x2969   : > { %v4977_v53 = vpop.xlane.xlu1 %4976 }
0x296a   : > { %v4979_v36 = vmul.f32 0.015625, %v4977_v53  ;;  %v4982_v34 = vmul.f32 %v4980_v24, %v4980_v24 }
0x296c   : > { %v4981_v25 = vsub.f32 %v4969_v20, %v4979_v36  ;;  %v4984_v43 = vsel %vm587_vm2, %v4982_v34, 0.0 }
0x296d   : > { %4985 = vadd.xlane.f32.xlu0 %v4984_v43 }
0x296e   : > { %v4983_v27 = vmul.f32 %v4981_v25, %v4981_v25 }
0x2970   : > { %v4987_v12 = vsel %vm1490_vm3, %v4983_v27, 0.0 }
0x2971   : > { %4988 = vadd.xlane.f32.xlu1 %v4987_v12 }
0x29f6   : > { %v4986_v10 = vpop.xlane.xlu0 %4985 }
0x29f7   : > { %v4990_v44 = vmul.f32 0.015625, %v4986_v10 }
0x29f9   : > { %v4992_v63 = vadd.f32 1e-05, %v4990_v44  ;;  %v7024_v44 = vld [vmem:[%s10479_s8 + $0x21] ss:$0 sm:$0xff] }
0x29fa   : > { %v4989_v46 = vpop.xlane.xlu1 %4988 }
0x29fb   : > { %8525 = vrsqrt.f32 %v4992_v63  ;;  %v4991_v39 = vmul.f32 0.015625, %v4989_v46 }
0x29fd   : > { %v4993_v47 = vadd.f32 1e-05, %v4991_v39 }
0x29ff   : > { %8527 = vrsqrt.f32 %v4993_v47 }
0x2a08   : > { %v8526_v2 = vpop.eup %8525 }
0x2a09   : > { %v4996_v5 = vmul.f32 %v8526_v2, %v4980_v24 }
0x2a0b   : > { %v5002_v38 = vmul.f32 %v6992_v6, %v4996_v5 }
0x2a0c   : > { %v8528_v42 = vpop.eup %8527 }
0x2a0d   : > { %v4997_v13 = vmul.f32 %v8528_v42, %v4981_v25  ;;  %v10044_v57 = vadd.f32 %v6993_v32, %v5002_v38 }
0x2a0f   : > { %v5003_v8 = vmul.f32 %v6992_v6, %v4997_v13 }
0x2a11   : > { %v10046_v35 = vadd.f32 %v6993_v32, %v5003_v8 }
0x2a13   : > { %v5010_v14 = vpack.c.bf16 %v10046_v35, %v10044_v57 }
0x2a15   : > { %7981 = vmatmul.mubr.msk.bf16.vlgmr.msra.gmra.mxu0 %vm587_vm2, %v5010_v14 }
0x2a16   : > { %8005 = vmatpush3.bf16.msra.mxu0 %v8315_v7  ;;  %8012 = vmatprep.mubr.msk.bf16.mxu0 %vm8642_vm0, %v8641_v1 }
0x2a17   : > { %8006 = vmatprep.subr.bf16.mxu0 %v8641_v1 }
0x2a1a   : > { %8007 = vmatpush3.bf16.msra.mxu0 %v8316_v3 }
0x2a1b   : > { %8008 = vmatprep.subr.bf16.mxu0 %v8641_v1 }
0x2a1e   : > { %8009 = vmatpush3.bf16.msra.mxu0 %v8317_v37 }
0x2a1f   : > { %8010 = vmatprep.subr.bf16.mxu0 %v8641_v1 }
0x2a22   : > { %8011 = vmatpush3.bf16.msra.mxu0 %v8318_v17 }
0x2a23   : > { %8016 = vmatprep.subr.bf16.mxu0 %v8641_v1 }
0x2a25   : > { %8013 = vmatmul.mubr.msk.bf16.vlgmr.msra.gmra.mxu0 %vm587_vm2, %v9188_v18  ;;  %v8321_v18 = vld [vmem:[%s10482_s11 + $0xe8] sm:$0xff]  }
0x2a26   : > { %8024 = vmatprep.mubr.msk.bf16.mxu0 %vm8642_vm0, %v8641_v1  ;;  %7989 = vmatpush3.bf16.msra.mxu1 %v8321_v18  ;;  %v8328_v18 = vld [vmem:[%s10483_s12 + $0x30] sm:$0xff]  }
0x2a27   : > { %7990 = vmatprep.subr.bf16.mxu1 %v8641_v1 }
0x2a2a   : > { %7991 = vmatpush3.bf16.msra.mxu1 %v8322_v51  ;;  %v8329_v51 = vld [vmem:[%s10483_s12 + $0x28] sm:$0xff]  }
0x2a2b   : > { %7992 = vmatprep.subr.bf16.mxu1 %v8641_v1 }
0x2a2e   : > { %7993 = vmatpush3.bf16.msra.mxu1 %v8323_v54  ;;  %v8330_v54 = vld [vmem:[%s10483_s12 + $0x20] sm:$0xff]  }
0x2a2f   : > { %7994 = vmatprep.subr.bf16.mxu1 %v8641_v1 }
0x2a32   : > { %7995 = vmatpush3.bf16.msra.mxu1 %v8324_v30  ;;  %v8331_v30 = vld [vmem:[%s10478_s7 + $0x98] sm:$0xff]  }
0x2a33   : > { %7996 = vmatprep.subr.bf16.mxu1 %v8641_v1 }
0x2a36   : > { %7997 = vmatpush3.bf16.msra.mxu1 %v8325_v41  ;;  %v8333_v41 = vld [vmem:[%s10478_s7 + $0x90] sm:$0xff]  }
0x2a37   : > { %7998 = vmatprep.subr.bf16.mxu1 %v8641_v1 }
0x2a3a   : > { %7999 = vmatpush3.bf16.msra.mxu1 %v8326_v55 }
0x2a3b   : > { %8028 = vmatprep.subr.bf16.mxu1 %v8641_v1 }
0x2ad5   : > { %v5086_v29 = vpop.f32.mrf.mxu0 }
0x2ad6   : > { %v5087_v52 = vadd.f32 %v7002_v56, %v5086_v29 }
0x2ad7   : > { %v7982_v58 = vpop.f32.mrf.mxu0 }
0x2ad8   : > { %v5095_v49 = vmul.f32 0.044715, %v5087_v52  ;;  %v5093_v12 = vmul.f32 0.5, %v5087_v52 }
0x2ad9   : > { %v5089_v11 = vpop.f32.mrf.mxu0 }
0x2ada   : > { %v5097_v31 = vmul.f32 %v5095_v49, %v5087_v52  ;;  %v5090_v26 = vadd.f32 %v7002_v56, %v5089_v11 }
0x2adb   : > { %v7983_v4 = vpop.f32.mrf.mxu0 }
0x2adc   : > { %v5099_v9 = vmul.f32 %v5097_v31, %v5087_v52  ;;  %v5096_v0 = vmul.f32 0.044715, %v5090_v26  ;;  %v5094_v33 = vmul.f32 0.5, %v5090_v26 }
0x2ade   : > { %v5101_v19 = vadd.f32 %v5099_v9, %v5087_v52  ;;  %v5098_v45 = vmul.f32 %v5096_v0, %v5090_v26 }
0x2ae0   : > { %v5103_v20 = vmul.f32 0.7978846, %v5101_v19  ;;  %v5100_v21 = vmul.f32 %v5098_v45, %v5090_v26  ;;  %v7034_v19 = vld [vmem:[%s10479_s8 + $0x2b] ss:$0 sm:$0xff] }
0x2ae2   : > { %8529 = vtanh.f32 %v5103_v20  ;;  %v5102_v22 = vadd.f32 %v5100_v21, %v5090_v26  ;;  %v7033_v26 = vld [vmem:[%s10479_s8 + $0x26] ss:$0 sm:$0xff] }
0x2ae4   : > { %v5104_v23 = vmul.f32 0.7978846, %v5102_v22  ;;  %v8332_v22 = vld [vmem:[%s10478_s7 + $0x138] sm:$0xff]  }
0x2ae5   : > { %v10108_v24 = vpop.f32.mrf.mxu0 }
0x2ae6   : > { %8531 = vtanh.f32 %v5104_v23 }
0x2ae7   : > { %v8014_v53 = vpop.f32.mrf.mxu0 }
0x2ae8   : > { %v8334_v53 = vld [vmem:[%s10478_s7 + $0x130] sm:$0xff]  }
0x2ae9   : > { %v10110_v36 = vpop.f32.mrf.mxu0 }
0x2aeb   : > { %v8015_v34 = vpop.f32.mrf.mxu0 }
0x2aec   : > { %v8335_v34 = vld [vmem:[%s10478_s7 + $0x88] sm:$0xff]  }
0x2aef   : > { %v8530_v25 = vpop.eup %8529 }
0x2af0   : > { %v5107_v43 = vadd.f32 1.0, %v8530_v25  ;;  %v8336_v25 = vld [vmem:[%s10478_s7 + $0x128] sm:$0xff]  }
0x2af2   : > { %v5109_v59 = vmul.f32 %v5107_v43, %v5093_v12  ;;  %v8337_v43 = vld [vmem:[%s10478_s7 + $0x80] sm:$0xff]  }
0x2af3   : > { %v8532_v27 = vpop.eup %8531 }
0x2af4   : > { %v5108_v28 = vadd.f32 1.0, %v8532_v27  ;;  %v8338_v27 = vld [vmem:[%s10478_s7 + $0x120] sm:$0xff]  }
0x2af6   : > { %v5110_v60 = vmul.f32 %v5108_v28, %v5094_v33 }
0x2af8   : > { %v5111_v10 = vpack.c.bf16 %v5110_v60, %v5109_v59  ;;  %v7061_v59 = vld [vmem:[%s10484_s13 + $0x1] ss:$0 sm:$0xff] }
0x2afa   : > { %8001 = vmatmul.mubr.bf16.vlgmr.msra.gmra.mxu1 %v5111_v10 }
0x2afb   : > { %8036 = vmatprep.mubr.msk.bf16.mxu1 %vm8642_vm0, %v8641_v1  ;;  %8029 = vmatpush3.bf16.msra.mxu1 %v8331_v30 }
0x2afc   : > { %8030 = vmatprep.subr.bf16.mxu1 %v8641_v1 }
0x2aff   : > { %8031 = vmatpush3.bf16.msra.mxu1 %v8333_v41 }
0x2b00   : > { %8032 = vmatprep.subr.bf16.mxu1 %v8641_v1 }
0x2b03   : > { %8033 = vmatpush3.bf16.msra.mxu1 %v8335_v34 }
0x2b04   : > { %8034 = vmatprep.subr.bf16.mxu1 %v8641_v1 }
0x2b07   : > { %8035 = vmatpush3.bf16.msra.mxu1 %v8337_v43 }
0x2b08   : > { %8052 = vmatprep.subr.bf16.mxu1 %v8641_v1 }
0x2bba   : > { %v5216_v63 = vpop.f32.mrf.mxu1 }
0x2bbb   : > { %v5217_v46 = vadd.f32 %v7024_v44, %v5216_v63 }
0x2bbc   : > { %v8002_v39 = vpop.f32.mrf.mxu1 }
0x2bbd   : > { %v5223_v47 = vadd.f32 %v5217_v46, %v10044_v57  ;;  %v8339_v39 = vld [vmem:[%s10478_s7 + $0x1d8] sm:$0xff]  }
0x2bbe   : > { %v5219_v2 = vpop.f32.mrf.mxu1 }
0x2bbf   : > { %v5220_v5 = vadd.f32 %v7024_v44, %v5219_v2  ;;  %v5227_v6 = vsel %vm587_vm2, %v5223_v47, 0.0  ;;  %v8342_v2 = vld [vmem:[%s10478_s7 + $0x1c0] sm:$0xff]  }
0x2bc0   : > { %5228 = vadd.xlane.f32.xlu0 %v5227_v6  ;;  %v8003_v42 = vpop.f32.mrf.mxu1 }
0x2bc1   : > { %v5224_v38 = vadd.f32 %v5220_v5, %v10046_v35  ;;  %v8327_v35 = vld [vmem:[%s10483_s12 + $0x38] sm:$0xff]   ;;  %v7070_v5 = vld [vmem:[%s10479_s8 + $0x4] ss:$0 sm:$0xff] }
0x2bc2   : > { %8017 = vmatpush3.bf16.msra.mxu0 %v8327_v35 }
0x2bc3   : > { %v5230_v13 = vsel %vm1490_vm3, %v5224_v38, 0.0  ;;  %8018 = vmatprep.subr.bf16.mxu0 %v8641_v1 }
0x2bc4   : > { %5231 = vadd.xlane.f32.xlu1 %v5230_v13 }
0x2bc6   : > { %8019 = vmatpush3.bf16.msra.mxu0 %v8328_v18 }
0x2bc7   : > { %8020 = vmatprep.subr.bf16.mxu0 %v8641_v1 }
0x2bca   : > { %8021 = vmatpush3.bf16.msra.mxu0 %v8329_v51 }
0x2bcb   : > { %8022 = vmatprep.subr.bf16.mxu0 %v8641_v1 }
0x2bce   : > { %8023 = vmatpush3.bf16.msra.mxu0 %v8330_v54 }
0x2bcf   : > { %8040 = vmatprep.subr.bf16.mxu0 %v8641_v1 }
0x2c49   : > { %v5229_v32 = vpop.xlane.xlu0 %5228 }
0x2c4a   : > { %v5233_v8 = vmul.f32 0.015625, %v5229_v32 }
0x2c4c   : > { %v5235_v7 = vsub.f32 %v5223_v47, %v5233_v8  ;;  %v7084_v8 = vld [vmem:[%s10479_s8 + $0x9] ss:$0 sm:$0xff] }
0x2c4d   : > { %v5232_v14 = vpop.xlane.xlu1 %5231 }
0x2c4e   : > { %v5234_v3 = vmul.f32 0.015625, %v5232_v14  ;;  %v5237_v37 = vmul.f32 %v5235_v7, %v5235_v7 }
0x2c50   : > { %v5236_v17 = vsub.f32 %v5224_v38, %v5234_v3  ;;  %v5239_v57 = vsel %vm587_vm2, %v5237_v37, 0.0 }
0x2c51   : > { %5240 = vadd.xlane.f32.xlu0 %v5239_v57 }
0x2c52   : > { %v5238_v48 = vmul.f32 %v5236_v17, %v5236_v17 }
0x2c54   : > { %v5242_v50 = vsel %vm1490_vm3, %v5238_v48, 0.0 }
0x2c55   : > { %5243 = vadd.xlane.f32.xlu1 %v5242_v50 }
0x2cda   : > { %v5241_v55 = vpop.xlane.xlu0 %5240 }
0x2cdb   : > { %v5245_v56 = vmul.f32 0.015625, %v5241_v55 }
0x2cdd   : > { %v5247_v29 = vadd.f32 1e-05, %v5245_v56 }
0x2cde   : > { %v5244_v52 = vpop.xlane.xlu1 %5243 }
0x2cdf   : > { %8533 = vrsqrt.f32 %v5247_v29  ;;  %v5246_v58 = vmul.f32 0.015625, %v5244_v52  ;;  %v7098_v52 = vld [vmem:[%s10479_s8 + $0xe] ss:$0 sm:$0xff] }
0x2ce1   : > { %v5248_v49 = vadd.f32 1e-05, %v5246_v58 }
0x2ce3   : > { %8535 = vrsqrt.f32 %v5248_v49 }
0x2cec   : > { %v8534_v11 = vpop.eup %8533 }
0x2ced   : > { %v5251_v31 = vmul.f32 %v8534_v11, %v5235_v7 }
0x2cef   : > { %v5257_v9 = vmul.f32 %v7033_v26, %v5251_v31 }
0x2cf0   : > { %v8536_v4 = vpop.eup %8535 }
0x2cf1   : > { %v5252_v0 = vmul.f32 %v8536_v4, %v5236_v17  ;;  %v5263_v20 = vadd.f32 %v7034_v19, %v5257_v9 }
0x2cf3   : > { %v5258_v45 = vmul.f32 %v7033_v26, %v5252_v0 }
0x2cf5   : > { %v5264_v21 = vadd.f32 %v7034_v19, %v5258_v45 }
0x2cf7   : > { %v5265_v23 = vpack.c.bf16 %v5264_v21, %v5263_v20 }
0x2cf9   : > { %8025 = vmatmul.mubr.msk.bf16.vlgmr.msra.gmra.mxu0 %vm587_vm2, %v5265_v23 }
0x2cfa   : > { %8041 = vmatpush3.bf16.msra.mxu0 %v8332_v22  ;;  %8048 = vmatprep.mubr.msk.bf16.mxu0 %vm8642_vm0, %v8641_v1 }
0x2cfb   : > { %8042 = vmatprep.subr.bf16.mxu0 %v8641_v1 }
0x2cfe   : > { %8043 = vmatpush3.bf16.msra.mxu0 %v8334_v53 }
0x2cff   : > { %8044 = vmatprep.subr.bf16.mxu0 %v8641_v1 }
0x2d02   : > { %8045 = vmatpush3.bf16.msra.mxu0 %v8336_v25 }
0x2d03   : > { %8046 = vmatprep.subr.bf16.mxu0 %v8641_v1 }
0x2d06   : > { %8047 = vmatpush3.bf16.msra.mxu0 %v8338_v27 }
0x2d07   : > { %8064 = vmatprep.subr.bf16.mxu0 %v8641_v1 }
0x2db9   : > { %v5410_v12 = vpop.f32.mrf.mxu0 }
0x2dba   : > { %v5411_v28 = vadd.f32 %v5410_v12, %v10108_v24  ;;  %v8340_v24 = vld [vmem:[%s10478_s7 + $0x1d0] sm:$0xff]  }
0x2dbb   : > { %v8026_v33 = vpop.f32.mrf.mxu0 }
0x2dbc   : > { %v10185_v63 = vadd.f32 %v7061_v59, %v5411_v28 }
0x2dbd   : > { %v5413_v60 = vpop.f32.mrf.mxu0 }
0x2dbe   : > { %v5414_v10 = vadd.f32 %v5413_v60, %v10110_v36  ;;  %v8341_v36 = vld [vmem:[%s10478_s7 + $0x1c8] sm:$0xff]  }
0x2dbf   : > { %v8027_v44 = vpop.f32.mrf.mxu0 }
0x2dc0   : > { %v10187_v46 = vadd.f32 %v7061_v59, %v5414_v10 }
0x2dc2   : > { %v5424_v47 = vpack.c.bf16 %v10187_v46, %v10185_v63 }
0x2dc4   : > { %8037 = vmatmul.mubr.msk.bf16.vlgmr.msra.gmra.mxu1 %vm587_vm2, %v5424_v47  ;;  %8049 = vmatmul.mubr.msk.bf16.vlgmr.msra.gmra.mxu0 %vm587_vm2, %v5424_v47 }
0x2dc5   : > { %8053 = vmatpush3.bf16.msra.mxu1 %v8339_v39  ;;  %8060 = vmatprep.mubr.msk.bf16.mxu1 %vm8642_vm0, %v8641_v1 }
0x2dc6   : > { %8054 = vmatprep.subr.bf16.mxu1 %v8641_v1  ;;  %8066 = vmatprep.mubr.msk.bf16.mxu0 %vm8642_vm0, %v8641_v1 }
0x2dc9   : > { %8055 = vmatpush3.bf16.msra.mxu1 %v8340_v24 }
0x2dca   : > { %8056 = vmatprep.subr.bf16.mxu1 %v8641_v1 }
0x2dcd   : > { %8057 = vmatpush3.bf16.msra.mxu1 %v8341_v36 }
0x2dce   : > { %8058 = vmatprep.subr.bf16.mxu1 %v8641_v1 }
0x2dd1   : > { %8059 = vmatpush3.bf16.msra.mxu1 %v8342_v2 }
0x2dd2   : > { %8076 = vmatprep.subr.bf16.mxu1 %v8641_v1 }
0x2dd4   : > { %8061 = vmatmul.mubr.msk.bf16.vlgmr.msra.gmra.mxu1 %vm587_vm2, %v5424_v47 }
0x2dd5   : > { %8078 = vmatprep.mubr.msk.bf16.mxu1 %vm8642_vm0, %v8641_v1 }
0x2e84   : > { %v5500_v6 = vpop.f32.mrf.mxu1  ;;  %v5579_v42 = vpop.f32.mrf.mxu0 }
0x2e85   : > { %v5501_v32 = vadd.f32 %v7070_v5, %v5500_v6  ;;  %v5580_v17 = vadd.f32 %v7084_v8, %v5579_v42 }
0x2e86   : > { %v8038_v38 = vpop.f32.mrf.mxu1  ;;  %v8050_v13 = vpop.f32.mrf.mxu0 }
0x2e87   : > { %v10223_v50 = vmul.f32 %v5501_v32, %v8901_v61  ;;  %v10226_v35 = vmul.f32 %v5501_v32, %v8904_v62  ;;  %v5666_v29 = vmul.f32 %v5501_v32, %v8926_v15  ;;  %v5742_v9 = vmul.f32 %v5501_v32, %v8929_v16 }
0x2e88   : > { %v5503_v7 = vpop.f32.mrf.mxu1  ;;  %v5582_v14 = vpop.f32.mrf.mxu0 }
0x2e89   : > { %v5504_v3 = vadd.f32 %v7070_v5, %v5503_v7  ;;  %v5583_v37 = vadd.f32 %v7084_v8, %v5582_v14 }
0x2e8a   : > { %v8039_v57 = vpop.f32.mrf.mxu1  ;;  %v8051_v48 = vpop.f32.mrf.mxu0 }
0x2e8b   : > { %v10229_v18 = vmul.f32 %v5504_v3, %v8901_v61  ;;  %v10232_v51 = vmul.f32 %v5504_v3, %v8904_v62  ;;  %v5665_v54 = vpack.c.bf16 %v5583_v37, %v5580_v17  ;;  %v5667_v56 = vmul.f32 %v5504_v3, %v8926_v15 }
0x2e8c   : > { %v5743_v26 = vmul.f32 %v5504_v3, %v8929_v16 }
0x2e8d   : > { %v5911_v30 = vpack.c.bf16 %v10229_v18, %v10223_v50  ;;  %v6033_v41 = vpack.c.bf16 %v10232_v51, %v10226_v35  ;;  %v10239_v55 = vsel %vm587_vm2, %v5665_v54, 0  ;;  %v5668_v58 = vpack.c.bf16 %v5667_v56, %v5666_v29 }
0x2e8e   : > { %8065 = vmatpush3.bf16.xpose.msra.mxu0 %v10239_v55  ;;  %v5744_v43 = vpack.c.bf16 %v5743_v26, %v5742_v9 }
0x2e8f   : > { %8070 = vmatprep.subr.bf16.mxu0 %v8641_v1 }
0x2e94   : > { %v5658_v49 = vpop.f32.mrf.mxu1 }
0x2e95   : > { %v5659_v11 = vadd.f32 %v7098_v52, %v5658_v49  ;;  %8067 = vmatmul.mubr.msk.bf16.vlgmr.msra.gmra.mxu0 %vm587_vm2, %v5668_v58 }
0x2e96   : > { %v8062_v31 = vpop.f32.mrf.mxu1  ;;  %8071 = vmatpush3.bf16.xpose.msra.mxu0 %v10239_v55  ;;  %8072 = vmatprep.mubr.msk.bf16.mxu0 %vm8642_vm0, %v8641_v1 }
0x2e97   : > { %8082 = vmatprep.subr.bf16.mxu0 %v8641_v1  ;;  %v5738_v19 = vmul.f32 %v5659_v11, %v8926_v15  ;;  %v5811_v45 = vmul.f32 %v5659_v11, %v8929_v16  ;;  %v10258_v20 = vmul.f32 %v5659_v11, %v8901_v61  ;;  %v10261_v21 = vmul.f32 %v5659_v11, %v8904_v62 }
0x2e98   : > { %v5661_v4 = vpop.f32.mrf.mxu1 }
0x2e99   : > { %v5662_v0 = vadd.f32 %v7098_v52, %v5661_v4 }
0x2e9a   : > { %v8063_v22 = vpop.f32.mrf.mxu1 }
0x2e9b   : > { %v5739_v23 = vmul.f32 %v5662_v0, %v8926_v15  ;;  %v5812_v53 = vmul.f32 %v5662_v0, %v8929_v16  ;;  %v10266_v34 = vmul.f32 %v5662_v0, %v8901_v61  ;;  %v10269_v25 = vmul.f32 %v5662_v0, %v8904_v62 }
0x2e9d   : > { %v5813_v27 = vpack.c.bf16 %v5812_v53, %v5811_v45  ;;  %v5740_v12 = vpack.c.bf16 %v5739_v23, %v5738_v19  ;;  %v5980_v33 = vpack.c.bf16 %v10266_v34, %v10258_v20  ;;  %v6102_v28 = vpack.c.bf16 %v10269_v25, %v10261_v21  ;;  %8073 = vmatmul.mubr.msk.bf16.vlgmr.msra.gmra.mxu0 %vm587_vm2, %v5744_v43 }
0x2e9e   : > { %8084 = vmatprep.mubr.msk.bf16.mxu0 %vm8642_vm0, %v8641_v1 }
0x2e9f   : > { %v5819_v15 = vand.u32 %v5813_v27, %v8966_v40  ;;  %v5866_v16 = vand.u32 %v5740_v12, %v8966_v40 }
0x2ea1   : > { %8077 = vmatpush3.bf16.msra.mxu1 %v5819_v15  ;;  %8083 = vmatpush3.bf16.msra.mxu0 %v5866_v16 }
0x2ea2   : > { %8088 = vmatprep.subr.bf16.mxu1 %v8641_v1  ;;  %8094 = vmatprep.subr.bf16.mxu0 %v8641_v1 }
0x2f55   : > { %v5709_v61 = vpop.f32.mrf.mxu0 }
0x2f56   : > { %v5716_v14 = vsel %vm959_vm15, %v5709_v61, -inf }
0x2f57   : > { %v8068_v62 = vpop.f32.mrf.mxu0 }
0x2f59   : > { %v5712_v59 = vpop.f32.mrf.mxu0 }
0x2f5a   : > { %v5719_v37 = vsel %vm963_vm1, %v5712_v59, -inf }
0x2f5b   : > { %v8069_v60 = vpop.f32.mrf.mxu0 }
0x2f5d   : > { %v5782_v10 = vpop.f32.mrf.mxu0 }
0x2f5e   : > { %v5789_v44 = vsel %vm959_vm15, %v5782_v10, -inf }
0x2f5f   : > { %5790 = vmax.xlane.f32.xlu0 %v5789_v44  ;;  %v8074_v39 = vpop.f32.mrf.mxu0 }
0x2f61   : > { %v5785_v47 = vpop.f32.mrf.mxu0 }
0x2f62   : > { %v5792_v24 = vsel %vm963_vm1, %v5785_v47, -inf }
0x2f63   : > { %5793 = vmax.xlane.f32.xlu1 %v5792_v24  ;;  %v8075_v36 = vpop.f32.mrf.mxu0 }
0x2fe8   : > { %v5791_v2 = vpop.xlane.xlu0 %5790 }
0x2fe9   : > { %v5795_v5 = vsub.f32 %v5782_v10, %v5791_v2 }
0x2feb   : > { %v5797_v6 = vmul.f32 1.442695, %v5795_v5 }
0x2fec   : > { %v5794_v42 = vpop.xlane.xlu1 %5793 }
0x2fed   : > { %8537 = vpow2.f32 %v5797_v6  ;;  %v5796_v38 = vsub.f32 %v5785_v47, %v5794_v42 }
0x2fef   : > { %v5799_v13 = vmul.f32 1.442695, %v5796_v38 }
0x2ff1   : > { %8539 = vpow2.f32 %v5799_v13 }
0x2ffa   : > { %v8538_v32 = vpop.eup %8537 }
0x2ffb   : > { %v5801_v8 = vsel %vm959_vm15, %v8538_v32, 0.0 }
0x2ffc   : > { %5802 = vadd.xlane.f32.xlu0 %v5801_v8 }
0x2ffe   : > { %v8540_v7 = vpop.eup %8539 }
0x2fff   : > { %v5804_v3 = vsel %vm963_vm1, %v8540_v7, 0.0 }
0x3000   : > { %5717 = vmax.xlane.f32.xlu0 %v5716_v14  ;;  %5805 = vadd.xlane.f32.xlu1 %v5804_v3 }
0x3004   : > { %5720 = vmax.xlane.f32.xlu1 %v5719_v37 }
0x3085   : > { %v5803_v17 = vpop.xlane.xlu0 %5802 }
0x3086   : > { %8541 = vrcp.f32 %v5803_v17 }
0x3089   : > { %v5806_v57 = vpop.xlane.xlu1 %5805  ;;  %v5718_v58 = vpop.xlane.xlu0 %5717 }
0x308a   : > { %8543 = vrcp.f32 %v5806_v57  ;;  %v5722_v49 = vsub.f32 %v5709_v61, %v5718_v58 }
0x308d   : > { %v5721_v50 = vpop.xlane.xlu1 %5720 }
0x3093   : > { %v8542_v48 = vpop.eup %8541 }
0x3094   : > { %v5809_v56 = vmul.f32 %v8542_v48, %v8538_v32 }
0x3097   : > { %v8544_v54 = vpop.eup %8543 }
0x3098   : > { %v5810_v29 = vmul.f32 %v8544_v54, %v8540_v7 }
0x309a   : > { %v5814_v52 = vpack.c.bf16 %v5810_v29, %v5809_v56 }
0x309c   : > { %8079 = vmatmul.mubr.msk.bf16.vlgmr.msra.gmra.mxu1 %vm959_vm15, %v5814_v52  ;;  %v5986_v52 = vand.u32 %v5980_v33, %v8966_v40 }
0x309d   : > { %8089 = vmatpush3.bf16.xpose.msra.mxu1 %v10239_v55  ;;  %8090 = vmatprep.mubr.msk.bf16.mxu1 %vm8642_vm0, %v8641_v1 }
0x309e   : > { %8100 = vmatprep.subr.bf16.mxu1 %v8641_v1 }
0x30a4   : > { %8091 = vmatmul.mubr.msk.bf16.vlgmr.msra.gmra.mxu1 %vm587_vm2, %v5911_v30  ;;  %v5724_v30 = vmul.f32 1.442695, %v5722_v49 }
0x30a5   : > { %8101 = vmatpush3.bf16.xpose.msra.mxu1 %v10239_v55  ;;  %8102 = vmatprep.mubr.msk.bf16.mxu1 %vm8642_vm0, %v8641_v1  ;;  %v5723_v55 = vsub.f32 %v5712_v59, %v5721_v50 }
0x30a6   : > { %8112 = vmatprep.subr.bf16.mxu1 %v8641_v1  ;;  %8545 = vpow2.f32 %v5724_v30 }
0x30a7   : > { %v5726_v26 = vmul.f32 1.442695, %v5723_v55 }
0x30a9   : > { %8547 = vpow2.f32 %v5726_v26  ;;  %v6108_v26 = vand.u32 %v6102_v28, %v8966_v40 }
0x30ac   : > { %8103 = vmatmul.mubr.msk.bf16.vlgmr.msra.gmra.mxu1 %vm587_vm2, %v6033_v41 }
0x30ad   : > { %8120 = vmatprep.mubr.msk.bf16.mxu1 %vm8642_vm0, %v8641_v1 }
0x30b3   : > { %v8546_v23 = vpop.eup %8545 }
0x30b4   : > { %v5728_v27 = vsel %vm959_vm15, %v8546_v23, 0.0 }
0x30b6   : > { %v8548_v15 = vpop.eup %8547 }
0x30b7   : > { %v5731_v61 = vsel %vm963_vm1, %v8548_v15, 0.0 }
0x315c   : > { %v10307_v18 = vpop.f32.mrf.mxu1 }
0x315e   : > { %v8080_v11 = vpop.f32.mrf.mxu1 }
0x3160   : > { %v10309_v31 = vpop.f32.mrf.mxu1 }
0x3162   : > { %v8081_v4 = vpop.f32.mrf.mxu1 }
0x3164   : > { %v5949_v9 = vpop.f32.mrf.mxu1 }
0x3165   : > { %v5956_v35 = vsel %vm959_vm15, %v5949_v9, -inf }
0x3166   : > { %5957 = vmax.xlane.f32.xlu0 %v5956_v35  ;;  %v8092_v51 = vpop.f32.mrf.mxu1 }
0x3168   : > { %v5952_v41 = vpop.f32.mrf.mxu1 }
0x3169   : > { %v5959_v0 = vsel %vm963_vm1, %v5952_v41, -inf }
0x316a   : > { %5960 = vmax.xlane.f32.xlu1 %v5959_v0  ;;  %v8093_v19 = vpop.f32.mrf.mxu1  ;;  %v8343_v0 = vld [vmem:[%s10478_s7 + $0x278] sm:$0xff]  }
0x316b   : > { %8113 = vmatpush3.bf16.msra.mxu1 %v8343_v0  ;;  %v8344_v19 = vld [vmem:[%s10478_s7 + $0x270] sm:$0xff]   ;;  %v8353_v0 = vld [vmem:[%s10482_s11 + $0x128] sm:$0xff]  }
0x316c   : > { %v6071_v45 = vpop.f32.mrf.mxu1  ;;  %8114 = vmatprep.subr.bf16.mxu1 %v8641_v1 }
0x316d   : > { %v6078_v22 = vsel %vm959_vm15, %v6071_v45, -inf }
0x316e   : > { %6079 = vmax.xlane.f32.xlu0 %v6078_v22  ;;  %v8104_v53 = vpop.f32.mrf.mxu1  ;;  %v8346_v22 = vld [vmem:[%s10478_s7 + $0x260] sm:$0xff]  }
0x316f   : > { %8115 = vmatpush3.bf16.msra.mxu1 %v8344_v19  ;;  %v8354_v19 = vld [vmem:[%s10482_s11 + $0x120] sm:$0xff]  }
0x3170   : > { %v6074_v43 = vpop.f32.mrf.mxu1  ;;  %8116 = vmatprep.subr.bf16.mxu1 %v8641_v1 }
0x3171   : > { %v6081_v12 = vsel %vm963_vm1, %v6074_v43, -inf }
0x3172   : > { %5729 = vadd.xlane.f32.xlu0 %v5728_v27  ;;  %6082 = vmax.xlane.f32.xlu1 %v6081_v12  ;;  %v8105_v16 = vpop.f32.mrf.mxu1 }
0x3176   : > { %5732 = vadd.xlane.f32.xlu1 %v5731_v61 }
0x31ef   : > { %v5958_v62 = vpop.xlane.xlu0 %5957 }
0x31f0   : > { %v5962_v59 = vsub.f32 %v5949_v9, %v5958_v62 }
0x31f2   : > { %v5964_v60 = vmul.f32 1.442695, %v5962_v59 }
0x31f3   : > { %v5961_v10 = vpop.xlane.xlu1 %5960 }
0x31f4   : > { %8549 = vpow2.f32 %v5964_v60  ;;  %v5963_v44 = vsub.f32 %v5952_v41, %v5961_v10 }
0x31f6   : > { %v5966_v39 = vmul.f32 1.442695, %v5963_v44 }
0x31f7   : > { %v6080_v47 = vpop.xlane.xlu0 %6079 }
0x31f8   : > { %8551 = vpow2.f32 %v5966_v39  ;;  %v6084_v24 = vsub.f32 %v6071_v45, %v6080_v47  ;;  %v8345_v45 = vld [vmem:[%s10478_s7 + $0x268] sm:$0xff]  }
0x31f9   : > { %8117 = vmatpush3.bf16.msra.mxu1 %v8345_v45  ;;  %v8355_v45 = vld [vmem:[%s10482_s11 + $0x118] sm:$0xff]  }
0x31fa   : > { %v6086_v36 = vmul.f32 1.442695, %v6084_v24  ;;  %8118 = vmatprep.subr.bf16.mxu1 %v8641_v1  ;;  %v7120_v24 = vld [vmem:[%s10479_s8 + $0x13] ss:$0 sm:$0xff] }
0x31fb   : > { %v6083_v2 = vpop.xlane.xlu1 %6082  ;;  %v5730_v5 = vpop.xlane.xlu0 %5729 }
0x31fc   : > { %8553 = vpow2.f32 %v6086_v36  ;;  %v6085_v6 = vsub.f32 %v6074_v43, %v6083_v2 }
0x31fd   : > { %8555 = vrcp.f32 %v5730_v5  ;;  %8119 = vmatpush3.bf16.msra.mxu1 %v8346_v22  ;;  %v8356_v22 = vld [vmem:[%s10482_s11 + $0x110] sm:$0xff]  }
0x31fe   : > { %v6088_v42 = vmul.f32 1.442695, %v6085_v6  ;;  %8136 = vmatprep.subr.bf16.mxu1 %v8641_v1 }
0x31ff   : > { %v5733_v38 = vpop.xlane.xlu1 %5732 }
0x3200   : > { %8557 = vpow2.f32 %v6088_v42 }
0x3201   : > { %v8550_v13 = vpop.eup %8549  ;;  %8559 = vrcp.f32 %v5733_v38 }
0x3202   : > { %v5968_v32 = vsel %vm959_vm15, %v8550_v13, 0.0 }
0x3203   : > { %5969 = vadd.xlane.f32.xlu0 %v5968_v32 }
0x3205   : > { %v8552_v8 = vpop.eup %8551 }
0x3206   : > { %v5971_v7 = vsel %vm963_vm1, %v8552_v8, 0.0 }
0x3207   : > { %5972 = vadd.xlane.f32.xlu1 %v5971_v7 }
0x3209   : > { %v8554_v14 = vpop.eup %8553 }
0x320a   : > { %v6090_v3 = vsel %vm959_vm15, %v8554_v14, 0.0  ;;  %v8556_v37 = vpop.eup %8555 }
0x320b   : > { %6091 = vadd.xlane.f32.xlu0 %v6090_v3  ;;  %v5736_v54 = vmul.f32 %v8556_v37, %v8546_v23 }
0x320d   : > { %v8558_v17 = vpop.eup %8557 }
0x320e   : > { %v8560_v57 = vpop.eup %8559  ;;  %v6093_v48 = vsel %vm963_vm1, %v8558_v17, 0.0 }
0x320f   : > { %v5737_v56 = vmul.f32 %v8560_v57, %v8548_v15  ;;  %6094 = vadd.xlane.f32.xlu1 %v6093_v48 }
0x3211   : > { %v5741_v29 = vpack.c.bf16 %v5737_v56, %v5736_v54  ;;  %v8348_v56 = vld [vmem:[%s10480_s9 + $0x90] sm:$0xff]  }
0x3213   : > { %8085 = vmatmul.mubr.msk.bf16.vlgmr.msra.gmra.mxu0 %vm959_vm15, %v5741_v29  ;;  %v8349_v29 = vld [vmem:[%s10480_s9 + $0x88] sm:$0xff]  }
0x3214   : > { %8095 = vmatpush3.bf16.msra.mxu0 %v5986_v52  ;;  %8096 = vmatprep.mubr.msk.bf16.mxu0 %vm8642_vm0, %v8641_v1  ;;  %v8350_v52 = vld [vmem:[%s10480_s9 + $0x80] sm:$0xff]  }
0x3215   : > { %8106 = vmatprep.subr.bf16.mxu0 %v8641_v1 }
0x328c   : > { %v5970_v58 = vpop.xlane.xlu0 %5969 }
0x328d   : > { %8561 = vrcp.f32 %v5970_v58 }
0x3290   : > { %v5973_v49 = vpop.xlane.xlu1 %5972 }
0x3291   : > { %8563 = vrcp.f32 %v5973_v49 }
0x3294   : > { %v6092_v50 = vpop.xlane.xlu0 %6091 }
0x3295   : > { %8565 = vrcp.f32 %v6092_v50 }
0x3298   : > { %v6095_v30 = vpop.xlane.xlu1 %6094 }
0x3299   : > { %8567 = vrcp.f32 %v6095_v30 }
0x329a   : > { %v8562_v55 = vpop.eup %8561 }
0x329b   : > { %v5976_v20 = vmul.f32 %v8562_v55, %v8550_v13 }
0x329e   : > { %v8564_v11 = vpop.eup %8563 }
0x329f   : > { %v5977_v34 = vmul.f32 %v8564_v11, %v8552_v8 }
0x32a1   : > { %v5981_v33 = vpack.c.bf16 %v5977_v34, %v5976_v20 }
0x32a2   : > { %v8566_v4 = vpop.eup %8565 }
0x32a3   : > { %8097 = vmatmul.mubr.msk.bf16.vlgmr.msra.gmra.mxu0 %vm959_vm15, %v5981_v33  ;;  %v6098_v35 = vmul.f32 %v8566_v4, %v8554_v14  ;;  %v7126_v33 = vld [vmem:[%s10479_s8 + $0x18] ss:$0 sm:$0xff] }
0x32a4   : > { %8107 = vmatpush3.bf16.msra.mxu0 %v6108_v26  ;;  %8108 = vmatprep.mubr.msk.bf16.mxu0 %vm8642_vm0, %v8641_v1 }
0x32a5   : > { %8124 = vmatprep.subr.bf16.mxu0 %v8641_v1 }
0x32a6   : > { %v8568_v9 = vpop.eup %8567 }
0x32a7   : > { %v6099_v51 = vmul.f32 %v8568_v9, %v8558_v17 }
0x32a9   : > { %v6103_v41 = vpack.c.bf16 %v6099_v51, %v6098_v35  ;;  %v7127_v35 = vld [vmem:[%s10479_s8 + $0x1d] ss:$0 sm:$0xff] }
0x32ab   : > { %8109 = vmatmul.mubr.msk.bf16.vlgmr.msra.gmra.mxu0 %vm959_vm15, %v6103_v41 }
0x32ac   : > { %8132 = vmatprep.mubr.msk.bf16.mxu0 %vm8642_vm0, %v8641_v1 }
0x32d3   : > { %v5902_v21 = vpop.f32.mrf.mxu0 }
0x32d4   : > { %v5903_v15 = vadd.f32 %v5902_v21, %v10307_v18 }
0x32d5   : > { %v8086_v40 = vpop.f32.mrf.mxu0 }
0x32d7   : > { %v5905_v25 = vpop.f32.mrf.mxu0 }
0x32d8   : > { %v5906_v16 = vadd.f32 %v5905_v25, %v10309_v31  ;;  %v8351_v25 = vld [vmem:[%s10482_s11 + $0x138] sm:$0xff]  }
0x32d9   : > { %v8087_v28 = vpop.f32.mrf.mxu0 }
0x32da   : > { %v8352_v28 = vld [vmem:[%s10482_s11 + $0x130] sm:$0xff]  }
0x3363   : > { %v6022_v23 = vpop.f32.mrf.mxu0 }
0x3364   : > { %v6029_v62 = vadd.f32 %v6022_v23, %v5903_v15  ;;  %v8357_v23 = vld [vmem:[%s10482_s11 + $0x108] sm:$0xff]  }
0x3365   : > { %v8098_v53 = vpop.f32.mrf.mxu0 }
0x3366   : > { %v8358_v53 = vld [vmem:[%s10482_s11 + $0x100] sm:$0xff]  }
0x3367   : > { %v6025_v43 = vpop.f32.mrf.mxu0 }
0x3368   : > { %v6030_v59 = vadd.f32 %v6025_v43, %v5906_v16  ;;  %v7136_v43 = vld [vmem:[%s10481_s10 + $0x4] ss:$0 sm:$0xff] }
0x3369   : > { %v8099_v27 = vpop.f32.mrf.mxu0 }
0x336b   : > { %v6144_v12 = vpop.f32.mrf.mxu0 }
0x336c   : > { %v6151_v10 = vadd.f32 %v6144_v12, %v6029_v62 }
0x336d   : > { %v8110_v61 = vpop.f32.mrf.mxu0 }
0x336f   : > { %v6147_v60 = vpop.f32.mrf.mxu0 }
0x3370   : > { %v6152_v44 = vadd.f32 %v6147_v60, %v6030_v59 }
0x3371   : > { %v8111_v39 = vpop.f32.mrf.mxu0 }
0x3372   : > { %v6153_v47 = vpack.c.bf16 %v6152_v44, %v6151_v10 }
0x3374   : > { %8121 = vmatmul.mubr.msk.bf16.vlgmr.msra.gmra.mxu1 %vm587_vm2, %v6153_v47 }
0x3375   : > { %8152 = vmatprep.mubr.msk.bf16.mxu1 %vm8642_vm0, %v8641_v1  ;;  %8137 = vmatpush3.bf16.msra.mxu1 %v8351_v25  ;;  %vm6516_vm0 = vcmask 519168  }
0x3376   : > { %8138 = vmatprep.subr.bf16.mxu1 %v8641_v1 }
0x3379   : > { %8139 = vmatpush3.bf16.msra.mxu1 %v8352_v28 }
0x337a   : > { %8140 = vmatprep.subr.bf16.mxu1 %v8641_v1 }
0x337d   : > { %8141 = vmatpush3.bf16.msra.mxu1 %v8353_v0 }
0x337e   : > { %8142 = vmatprep.subr.bf16.mxu1 %v8641_v1 }
0x3381   : > { %8143 = vmatpush3.bf16.msra.mxu1 %v8354_v19 }
0x3382   : > { %8144 = vmatprep.subr.bf16.mxu1 %v8641_v1 }
0x3385   : > { %8145 = vmatpush3.bf16.msra.mxu1 %v8355_v45 }
0x3386   : > { %8146 = vmatprep.subr.bf16.mxu1 %v8641_v1 }
0x3389   : > { %8147 = vmatpush3.bf16.msra.mxu1 %v8356_v22 }
0x338a   : > { %8148 = vmatprep.subr.bf16.mxu1 %v8641_v1 }
0x338d   : > { %8149 = vmatpush3.bf16.msra.mxu1 %v8357_v23 }
0x338e   : > { %8150 = vmatprep.subr.bf16.mxu1 %v8641_v1 }
0x3391   : > { %8151 = vmatpush3.bf16.msra.mxu1 %v8358_v53 }
0x3434   : > { %v6229_v18 = vpop.f32.mrf.mxu1 }
0x3435   : > { %v6230_v36 = vadd.f32 %v7120_v24, %v6229_v18 }
0x3436   : > { %v8122_v31 = vpop.f32.mrf.mxu1 }
0x3437   : > { %v6236_v2 = vadd.f32 %v6230_v36, %v10185_v63 }
0x3438   : > { %v6232_v5 = vpop.f32.mrf.mxu1 }
0x3439   : > { %v6233_v6 = vadd.f32 %v7120_v24, %v6232_v5  ;;  %v6240_v42 = vsel %vm587_vm2, %v6236_v2, 0.0 }
0x343a   : > { %6241 = vadd.xlane.f32.xlu0 %v6240_v42  ;;  %v8123_v38 = vpop.f32.mrf.mxu1 }
0x343b   : > { %v6237_v13 = vadd.f32 %v6233_v6, %v10187_v46  ;;  %v8347_v46 = vld [vmem:[%s10480_s9 + $0x98] sm:$0xff]  }
0x343c   : > { %8125 = vmatpush3.bf16.msra.mxu0 %v8347_v46 }
0x343d   : > { %v6243_v32 = vsel %vm1490_vm3, %v6237_v13, 0.0  ;;  %8126 = vmatprep.subr.bf16.mxu0 %v8641_v1 }
0x343e   : > { %6244 = vadd.xlane.f32.xlu1 %v6243_v32 }
0x3440   : > { %8127 = vmatpush3.bf16.msra.mxu0 %v8348_v56 }
0x3441   : > { %8128 = vmatprep.subr.bf16.mxu0 %v8641_v1 }
0x3444   : > { %8129 = vmatpush3.bf16.msra.mxu0 %v8349_v29 }
0x3445   : > { %8130 = vmatprep.subr.bf16.mxu0 %v8641_v1 }
0x3448   : > { %8131 = vmatpush3.bf16.msra.mxu0 %v8350_v52 }
0x34c3   : > { %v6242_v8 = vpop.xlane.xlu0 %6241 }
0x34c4   : > { %v6246_v7 = vmul.f32 0.015625, %v6242_v8 }
0x34c6   : > { %v6248_v14 = vsub.f32 %v6236_v2, %v6246_v7  ;;  %v7158_v7 = vld [vmem:[%s10479_s8 + $0x22] ss:$0 sm:$0xff] }
0x34c7   : > { %v6245_v3 = vpop.xlane.xlu1 %6244 }
0x34c8   : > { %v6247_v37 = vmul.f32 0.015625, %v6245_v3  ;;  %v6250_v17 = vmul.f32 %v6248_v14, %v6248_v14 }
0x34ca   : > { %v6249_v57 = vsub.f32 %v6237_v13, %v6247_v37  ;;  %v6252_v63 = vsel %vm587_vm2, %v6250_v17, 0.0 }
0x34cb   : > { %6253 = vadd.xlane.f32.xlu0 %v6252_v63 }
0x34cc   : > { %v6251_v48 = vmul.f32 %v6249_v57, %v6249_v57 }
0x34ce   : > { %v6255_v54 = vsel %vm1490_vm3, %v6251_v48, 0.0 }
0x34cf   : > { %6256 = vadd.xlane.f32.xlu1 %v6255_v54 }
0x3554   : > { %v6254_v58 = vpop.xlane.xlu0 %6253 }
0x3555   : > { %v6258_v49 = vmul.f32 0.015625, %v6254_v58 }
0x3557   : > { %v6260_v50 = vadd.f32 1e-05, %v6258_v49 }
0x3558   : > { %v6257_v30 = vpop.xlane.xlu1 %6256 }
0x3559   : > { %8569 = vrsqrt.f32 %v6260_v50  ;;  %v6259_v55 = vmul.f32 0.015625, %v6257_v30 }
0x355b   : > { %v6261_v11 = vadd.f32 1e-05, %v6259_v55  ;;  %v7167_v55 = vld [vmem:[%s10479_s8 + $0x27] ss:$0 sm:$0xff] }
0x355d   : > { %8571 = vrsqrt.f32 %v6261_v11 }
0x3566   : > { %v8570_v20 = vpop.eup %8569 }
0x3567   : > { %v6264_v34 = vmul.f32 %v8570_v20, %v6248_v14  ;;  %v7168_v20 = vld [vmem:[%s10479_s8 + $0x2c] ss:$0 sm:$0xff] }
0x3569   : > { %v6270_v4 = vmul.f32 %v7126_v33, %v6264_v34 }
0x356a   : > { %v8572_v26 = vpop.eup %8571 }
0x356b   : > { %v6265_v9 = vmul.f32 %v8572_v26, %v6249_v57  ;;  %v6276_v41 = vadd.f32 %v7127_v35, %v6270_v4 }
0x356d   : > { %v6271_v51 = vmul.f32 %v7126_v33, %v6265_v9 }
0x356f   : > { %v6277_v21 = vadd.f32 %v7127_v35, %v6271_v51 }
0x3571   : > { %v6278_v40 = vpack.c.bf16 %v6277_v21, %v6276_v41 }
0x3573   : > { %8133 = vmatmul.mubr.msk.bf16.vlgmr.msra.gmra.mxu0 %vm587_vm2, %v6278_v40 }
0x3633   : > { %v6354_v27 = vpop.f32.mrf.mxu0 }
0x3634   : > { %v6355_v12 = vadd.f32 %v7136_v43, %v6354_v27 }
0x3635   : > { %v8134_v15 = vpop.f32.mrf.mxu0 }
0x3636   : > { %v6363_v16 = vmul.f32 0.044715, %v6355_v12  ;;  %v6361_v6 = vmul.f32 0.5, %v6355_v12 }
0x3637   : > { %v6357_v61 = vpop.f32.mrf.mxu0 }
0x3638   : > { %v6365_v62 = vmul.f32 %v6363_v16, %v6355_v12  ;;  %v6358_v59 = vadd.f32 %v7136_v43, %v6357_v61 }
0x3639   : > { %v8135_v60 = vpop.f32.mrf.mxu0 }
0x363a   : > { %v6367_v10 = vmul.f32 %v6365_v62, %v6355_v12  ;;  %v6364_v44 = vmul.f32 0.044715, %v6358_v59  ;;  %v6362_v42 = vmul.f32 0.5, %v6358_v59 }
0x363c   : > { %v6369_v39 = vadd.f32 %v6367_v10, %v6355_v12  ;;  %v6366_v47 = vmul.f32 %v6364_v44, %v6358_v59 }
0x363e   : > { %v6371_v24 = vmul.f32 0.7978846, %v6369_v39  ;;  %v6368_v18 = vmul.f32 %v6366_v47, %v6358_v59 }
0x3640   : > { %8573 = vtanh.f32 %v6371_v24  ;;  %v6370_v1 = vadd.f32 %v6368_v18, %v6358_v59 }
0x3642   : > { %v6372_v36 = vmul.f32 0.7978846, %v6370_v1 }
0x3644   : > { %8575 = vtanh.f32 %v6372_v36 }
0x364d   : > { %v8574_v31 = vpop.eup %8573 }
0x364e   : > { %v6375_v2 = vadd.f32 1.0, %v8574_v31 }
0x3650   : > { %v6377_v13 = vmul.f32 %v6375_v2, %v6361_v6 }
0x3651   : > { %v8576_v5 = vpop.eup %8575 }
0x3652   : > { %v6376_v38 = vadd.f32 1.0, %v8576_v5 }
0x3654   : > { %v6378_v32 = vmul.f32 %v6376_v38, %v6362_v42 }
0x3656   : > { %v6379_v8 = vpack.c.bf16 %v6378_v32, %v6377_v13 }
0x3658   : > { %8153 = vmatmul.mubr.bf16.vlgmr.msra.gmra.mxu1 %v6379_v8 }
0x3718   : > { %v6484_v14 = vpop.f32.mrf.mxu1 }
0x3719   : > { %v6485_v3 = vadd.f32 %v7158_v7, %v6484_v14 }
0x371a   : > { %v8154_v37 = vpop.f32.mrf.mxu1 }
0x371b   : > { %v6490_v17 = vadd.f32 %v6485_v3, %v6276_v41 }
0x371c   : > { %v6487_v57 = vpop.f32.mrf.mxu1 }
0x371d   : > { %v6493_v63 = vsel %vm587_vm2, %v6490_v17, 0.0 }
0x371e   : > { %6494 = vadd.xlane.f32.xlu0 %v6493_v63  ;;  %v8155_v48 = vpop.f32.mrf.mxu1 }
0x37a7   : > { %v6495_v54 = vpop.xlane.xlu0 %6494 }
0x37a8   : > { %v6496_v46 = vmul.f32 0.015625, %v6495_v54 }
0x37aa   : > { %v6497_v56 = vsub.f32 %v6490_v17, %v6496_v46 }
0x37ac   : > { %v6498_v29 = vmul.f32 %v6497_v56, %v6497_v56 }
0x37ae   : > { %v6499_v52 = vsel %vm587_vm2, %v6498_v29, 0.0 }
0x37af   : > { %6500 = vadd.xlane.f32.xlu1 %v6499_v52 }
0x3838   : > { %v6501_v58 = vpop.xlane.xlu1 %6500 }
0x3839   : > { %v6502_v49 = vmul.f32 0.015625, %v6501_v58 }
0x383b   : > { %v6503_v50 = vadd.f32 1e-05, %v6502_v49 }
0x383d   : > { %8577 = vrsqrt.f32 %v6503_v50 }
0x384a   : > { %v8578_v30 = vpop.eup %8577 }
0x384b   : > { %v6505_v11 = vmul.f32 %v8578_v30, %v6497_v56 }
0x384d   : > { %v6510_v34 = vmul.f32 %v7167_v55, %v6505_v11 }
0x384f   : > { %v6515_v33 = vadd.f32 %v7168_v20, %v6510_v34 }
0x3851   : > { %6517 = vst.msk [vmem:[%s471_s4] sm:$0xf] %vm6516_vm0, %v6515_v33 }
0x3852   : > { %8592 = shalt.err (!%p8589_p3)
}
0x3853   : > { %s8593_s15 = scalar_lea.hbm %s6530_s0, 64  ;;  %s8597_s4 = scalar_lea.hbm %s10485_s14, 128 }
0x3854   : > { %p8594_p4 = scmp.ne.s32.totalorder %s6530_s0, %s8593_s15  ;;  %p8598_p9 = scmp.lt.s32.totalorder %s6530_s0, %s10485_s14 }
0x3855   : > { %p8599_p10 = scmp.lt.s32.totalorder %s8597_s4, %s8593_s15 }
0x3856   : > { %p8595_p7 = pnand %p8594_p4, %p8758_p5 }
0x3857   : > { %p8600_p11 = por %p8599_p10, %p8598_p9 }
0x3858   : > { %p8596_p8 = pneg %p8595_p7 }
0x385a   : > { %p8601_p12 = pnand %p8600_p11, %p8596_p8 }
0x385c   : > { %8604 = shalt.err (!%p8601_p12)
}
0x385d   : > { %8156 = dma.vmem_to_hbm [thread:$0]  (%p8758_p5), %s6533_s22, 64, %s6530_s0, %s6519_s25  }
0x385e PF: > { %p8162_p13 = scmp.ge.s32.totalorder %s8639_s16, 2  ;;  %s6544_s26 = sand.u32 1, %s8627_s29  }
0x385f   : > { %s6545_s18 = scalar_lea.sflag [#allocation3], %s6544_s26 }
0x3860   : > { %p8159_p0 = pnand %p8162_p13, %p8762_p6 }
0x3862   : > { %p8160_p1 = pneg %p8159_p0 }
0x3864   : > { %8622 = dma.done.wait (%p8160_p1), %s6545_s18, 64  }
0x3865   : > { %8624 = vsyncadd (%p8160_p1), %s6545_s18, 4294967232  ;;  %s10497_s20 = sld [smem:[#allocation5_spill]]  ;;  %p24_p2 = scmp.ge.s32.totalorder %s8745_s19, 4  }
0x3866   : > { %s10498_s15 = sld [smem:[#allocation6_spill]]  ;;  %s10499_s29 = smov %s8631_s30 }
0x3867   : > { %s10501_s16 = smov %s8745_s19  ;;  %26 = sbr.rel (!%p24_p2) target bundleno = 7 (0x7), region = 144 }
0x386b   : > { %s10500_s30 = smov %s10497_s20 }
0x386c   :  { %6550 = vsyncpa [#allocation3], 1 }
0x386d   :  { %6552 = vsyncpa [#allocation3 + $0x1], 1 }

</bundles_post_ra>
